<compile_context>
chip_gen: v5e
topology: v5e:2x2
jax: 0.10.0
libtpu: 0.0.40
codegen_flags: <defaults>
</compile_context>

<pallas_src>
import jax
import jax.numpy as jnp
from jax.experimental import pallas as pl
from jax.experimental.pallas import tpu as pltpu

_BN_EPS = 1e-5
_VMEM_LIMIT = 64 * 1024 * 1024    # fits v5e / v6e / v7x physical VMEM
_VMEM_BUDGET = 48 * 1024 * 1024   # max fused-kernel footprint we allow


def _conv3x3_bn_relu(xp, w, gamma, beta):
    """One conv->BN->ReLU stage on VMEM-resident values.

    xp    : (N, H+2, W+2, Cin) f32  spatially zero-padded activation
    w     : (9*Cin, Cout)      bf16 HWIO weights flattened (ky, kx, ci)-major
    gamma : (1, Cout)          f32  BN weight
    beta  : (1, Cout)          f32  BN bias
    returns (N*H*W, Cout) f32
    """
    N, Hp, Wp, Cin = xp.shape
    H, W = Hp - 2, Wp - 2
    nhw = N * H * W

    # im2col: 9 shifted views concatenated on the channel (lane) axis -> a
    # single K = 9*Cin MXU matmul; accumulation happens inside the MXU.
    cols = []
    for ky in range(3):
        for kx in range(3):
            cols.append(xp[:, ky:ky + H, kx:kx + W, :].reshape(nhw, Cin))
    patches = jnp.concatenate(cols, axis=-1).astype(jnp.bfloat16)
    acc = jnp.dot(patches, w, preferred_element_type=jnp.float32)  # (nhw, Cout)

    # Training-mode BatchNorm, one pass (sum & sum-of-squares, f32), folded
    # into a single scale*x + shift FMA.  Conv bias is omitted: it cancels
    # against the batch-mean subtraction.
    inv_n = 1.0 / float(nhw)
    mean = jnp.sum(acc, axis=0, keepdims=True) * inv_n
    mean_sq = jnp.sum(acc * acc, axis=0, keepdims=True) * inv_n
    var = mean_sq - mean * mean
    scale = gamma * jax.lax.rsqrt(var + _BN_EPS)
    shift = beta - scale * mean
    return jnp.maximum(acc * scale + shift, 0.0)


def down_fused_kernel(xw_ref, w1_ref, w2_ref, g1_ref, be1_ref, g2_ref, be2_ref,
                      o_ref, pad1_ref, pad2_ref):
    """MaxPool2d(2) + (conv3x3 -> BN -> ReLU) x 2, fully fused in VMEM.

    xw_ref : (4, N, H, W, Cin) f32 -- the four 2x2 pooling-window shards
    w1_ref : (9*Cin, C1) bf16      -- stage-1 weights, im2col layout
    w2_ref : (9*C1,  C2) bf16      -- stage-2 weights, im2col layout
    g*/be* : (1, C) f32            -- BN weight / bias per stage
    o_ref  : (N*H*W, C2) f32       -- flattened NHWC output
    pad1/2 : VMEM scratch holding zero-padded stage inputs (SAME padding)
    """
    _, N, H, W, Cin = xw_ref.shape
    C1 = w1_ref.shape[-1]

    # MaxPool2d(2): elementwise max of the four window shards (pure VPU).
    pooled = jnp.maximum(jnp.maximum(xw_ref[0], xw_ref[1]),
                         jnp.maximum(xw_ref[2], xw_ref[3]))

    # Stage 1: SAME padding via zero-initialized VMEM scratch.
    pad1_ref[...] = jnp.zeros_like(pad1_ref)
    pad1_ref[:, 1:H + 1, 1:W + 1, :] = pooled
    y1 = _conv3x3_bn_relu(pad1_ref[...], w1_ref[...], g1_ref[...], be1_ref[...])

    # Stage 2: the intermediate activation never leaves VMEM.
    pad2_ref[...] = jnp.zeros_like(pad2_ref)
    pad2_ref[:, 1:H + 1, 1:W + 1, :] = y1.reshape(N, H, W, C1)
    o_ref[...] = _conv3x3_bn_relu(pad2_ref[...], w2_ref[...], g2_ref[...],
                                  be2_ref[...])


def _vmem_estimate(N, H, W, Cin, C1, C2):
    """Rough fused-kernel VMEM footprint in bytes (inputs + scratch + temps)."""
    nhw = N * H * W
    io = 4 * nhw * Cin * 4 + nhw * C2 * 4                       # shards + out
    wts = 2 * 9 * (Cin * C1 + C1 * C2) + 4 * 2 * (C1 + C2)      # weights + BN
    pads = N * (H + 2) * (W + 2) * (Cin + C1) * 4               # pad scratch
    temps = nhw * 9 * (Cin + C1) * 2 + 2 * nhw * (C1 + C2) * 4  # im2col + acc
    return io + wts + pads + temps


@jax.jit
def down_forward(x_nchw, params):
    """Forward of Down(in_ch, out_ch, DoubleConv) on NCHW float32 input."""
    N, Cin, H, W = x_nchw.shape
    assert H % 2 == 0 and W % 2 == 0, "MaxPool2d(2) needs even spatial dims"
    H2, W2 = H // 2, W // 2
    C1 = params["w1"].shape[-1]
    C2 = params["w2"].shape[-1]
    nhw = N * H2 * W2

    if _vmem_estimate(N, H2, W2, Cin, C1, C2) > _VMEM_BUDGET:
        # TODO(synk): tiled grid + two-pass BN path for shapes that don't fit.
        raise NotImplementedError(
            "fused Down kernel requires the tiled two-pass-BN path for this shape")

    x = x_nchw.astype(jnp.float32)
    # One XLA transpose builds the four 2x2 pooling-window shards AND performs
    # the NCHW -> NHWC layout change (no separate transpose, no wrapper pad).
    xw = x.reshape(N, Cin, H2, 2, W2, 2)
    xw = jnp.transpose(xw, (3, 5, 0, 2, 4, 1)).reshape(4, N, H2, W2, Cin)

    # HWIO (3,3,Cin,Cout) -> (9*Cin, Cout) im2col layout, bf16 for the MXU.
    w1 = params["w1"].reshape(9 * Cin, C1).astype(jnp.bfloat16)
    w2 = params["w2"].reshape(9 * C1, C2).astype(jnp.bfloat16)
    g1 = params["g1"].reshape(1, C1).astype(jnp.float32)
    be1 = params["be1"].reshape(1, C1).astype(jnp.float32)
    g2 = params["g2"].reshape(1, C2).astype(jnp.float32)
    be2 = params["be2"].reshape(1, C2).astype(jnp.float32)
    # NOTE: conv biases b1/b2 are intentionally NOT passed -- training-mode BN
    # cancels a per-channel constant bias exactly.

    cost = pl.CostEstimate(
        flops=2 * nhw * 9 * (Cin * C1 + C1 * C2)
              + nhw * (3 * Cin + 8 * (C1 + C2)),
        transcendentals=C1 + C2,
        bytes_accessed=4 * nhw * Cin * 4 + nhw * C2 * 4
                       + 2 * 9 * (Cin * C1 + C1 * C2) + 4 * 2 * (C1 + C2),
    )

    out_flat = pl.pallas_call(
        down_fused_kernel,
        out_shape=jax.ShapeDtypeStruct((nhw, C2), jnp.float32),
        in_specs=[pl.BlockSpec(memory_space=pltpu.MemorySpace.VMEM)] * 7,
        out_specs=pl.BlockSpec(memory_space=pltpu.MemorySpace.VMEM),
        scratch_shapes=[
            pltpu.VMEM((N, H2 + 2, W2 + 2, Cin), jnp.float32),
            pltpu.VMEM((N, H2 + 2, W2 + 2, C1), jnp.float32),
        ],
        compiler_params=pltpu.CompilerParams(vmem_limit_bytes=_VMEM_LIMIT),
        cost_estimate=cost,
    )(xw, w1, w2, g1, be1, g2, be2)

    out = out_flat.reshape(N, H2, W2, C2)
    return jnp.transpose(out, (0, 3, 1, 2))  # NHWC -> NCHW


# ----------------------------- pure-JAX reference -----------------------------

def _ref_conv_bn_relu(x_nhwc, w, b, gamma, beta):
    """conv3x3(SAME, +bias) -> training-mode BN -> ReLU (NHWC).  Matmul
    operands cast to bf16 (f32 accumulation) to mirror the kernel's MXU policy."""
    y = jax.lax.conv_general_dilated(
        x_nhwc.astype(jnp.bfloat16), w.astype(jnp.bfloat16),
        window_strides=(1, 1), padding="SAME",
        dimension_numbers=("NHWC", "HWIO", "NHWC"),
        preferred_element_type=jnp.float32)
    y = y + b
    mean = jnp.mean(y, axis=(0, 1, 2), keepdims=True)
    var = jnp.mean((y - mean) ** 2, axis=(0, 1, 2), keepdims=True)
    y = gamma * (y - mean) * jax.lax.rsqrt(var + _BN_EPS) + beta
    return jnp.maximum(y, 0.0)


def _ref_down(x_nchw, params):
    x = jnp.transpose(x_nchw, (0, 2, 3, 1)).astype(jnp.float32)  # NCHW -> NHWC
    N, H, W, C = x.shape
    x = jnp.max(x.reshape(N, H // 2, 2, W // 2, 2, C), axis=(2, 4))  # MaxPool2d(2)
    y = _ref_conv_bn_relu(x, params["w1"], params["b1"], params["g1"], params["be1"])
    y = _ref_conv_bn_relu(y, params["w2"], params["b2"], params["g2"], params["be2"])
    return jnp.transpose(y, (0, 3, 1, 2))


def make_params(key, in_ch, out_ch):
    ks = jax.random.split(key, 8)
    # PyTorch Conv2d weights are (out, in, kh, kw); convert to HWIO.
    w1_oihw = jax.random.normal(ks[0], (out_ch, in_ch, 3, 3), jnp.float32) * 0.1
    w2_oihw = jax.random.normal(ks[1], (out_ch, out_ch, 3, 3), jnp.float32) * 0.1
    return {
        "w1": jnp.transpose(w1_oihw, (2, 3, 1, 0)),
        "b1": jax.random.normal(ks[2], (out_ch,), jnp.float32) * 0.05,
        "g1": 1.0 + 0.1 * jax.random.normal(ks[3], (out_ch,), jnp.float32),
        "be1": 0.1 * jax.random.normal(ks[4], (out_ch,), jnp.float32),
        "w2": jnp.transpose(w2_oihw, (2, 3, 1, 0)),
        "b2": jax.random.normal(ks[5], (out_ch,), jnp.float32) * 0.05,
        "g2": 1.0 + 0.1 * jax.random.normal(ks[6], (out_ch,), jnp.float32),
        "be2": 0.1 * jax.random.normal(ks[7], (out_ch,), jnp.float32),
    }


if __name__ == "__main__":
    N, in_ch, out_ch, H, W = 2, 4, 8, 16, 16
    key = jax.random.PRNGKey(0)
    k_x, k_p = jax.random.split(key)
    x = jax.random.normal(k_x, (N, in_ch, H, W), jnp.float32)  # NCHW like PyTorch
    params = make_params(k_p, in_ch, out_ch)

    out = jax.block_until_ready(down_forward(x, params))
    assert out.shape == (N, out_ch, H // 2, W // 2), out.shape

    ref = _ref_down(x, params)
    # bf16 matmul operands (with f32 accumulation) bound achievable agreement;
    # a real bug (wrong tap order / BN) would be orders of magnitude larger.
    assert jnp.allclose(out, ref, atol=5e-3, rtol=5e-3), \
        float(jnp.max(jnp.abs(out - ref)))

    print("KERNEL_OK")
</pallas_src>

<mosaic_0001>
module attributes {stable_mosaic.version = 11 : i64} {
  func.func @down_fused_kernel(%arg0: memref<4x2x8x8x4xf32, #tpu.memory_space<vmem>>, %arg1: memref<36x8xbf16, #tpu.memory_space<vmem>>, %arg2: memref<72x8xbf16, #tpu.memory_space<vmem>>, %arg3: memref<1x8xf32, #tpu.memory_space<vmem>>, %arg4: memref<1x8xf32, #tpu.memory_space<vmem>>, %arg5: memref<1x8xf32, #tpu.memory_space<vmem>>, %arg6: memref<1x8xf32, #tpu.memory_space<vmem>>, %arg7: memref<128x8xf32, #tpu.memory_space<vmem>>, %arg8: memref<2x10x10x4xf32, #tpu.memory_space<vmem>>, %arg9: memref<2x10x10x8xf32, #tpu.memory_space<vmem>>) attributes {dimension_semantics = [], scalar_prefetch = 0 : i64, scratch_operands = 2 : i64, tpu.core_type = #tpu.core_type<tc>} {
    %c0 = arith.constant 0 : index
    %c0_0 = arith.constant 0 : index
    %c0_1 = arith.constant 0 : index
    %c0_2 = arith.constant 0 : index
    %c0_3 = arith.constant 0 : index
    %0 = vector.load %arg0[%c0, %c0_0, %c0_1, %c0_2, %c0_3] : memref<4x2x8x8x4xf32, #tpu.memory_space<vmem>>, vector<1x2x8x8x4xf32>
    %1 = vector.shape_cast %0 : vector<1x2x8x8x4xf32> to vector<2x8x8x4xf32>
    %c1 = arith.constant 1 : index
    %c0_4 = arith.constant 0 : index
    %c0_5 = arith.constant 0 : index
    %c0_6 = arith.constant 0 : index
    %c0_7 = arith.constant 0 : index
    %2 = vector.load %arg0[%c1, %c0_4, %c0_5, %c0_6, %c0_7] : memref<4x2x8x8x4xf32, #tpu.memory_space<vmem>>, vector<1x2x8x8x4xf32>
    %3 = vector.shape_cast %2 : vector<1x2x8x8x4xf32> to vector<2x8x8x4xf32>
    %4 = arith.maximumf %1, %3 : vector<2x8x8x4xf32>
    %c2 = arith.constant 2 : index
    %c0_8 = arith.constant 0 : index
    %c0_9 = arith.constant 0 : index
    %c0_10 = arith.constant 0 : index
    %c0_11 = arith.constant 0 : index
    %5 = vector.load %arg0[%c2, %c0_8, %c0_9, %c0_10, %c0_11] : memref<4x2x8x8x4xf32, #tpu.memory_space<vmem>>, vector<1x2x8x8x4xf32>
    %6 = vector.shape_cast %5 : vector<1x2x8x8x4xf32> to vector<2x8x8x4xf32>
    %c3 = arith.constant 3 : index
    %c0_12 = arith.constant 0 : index
    %c0_13 = arith.constant 0 : index
    %c0_14 = arith.constant 0 : index
    %c0_15 = arith.constant 0 : index
    %7 = vector.load %arg0[%c3, %c0_12, %c0_13, %c0_14, %c0_15] : memref<4x2x8x8x4xf32, #tpu.memory_space<vmem>>, vector<1x2x8x8x4xf32>
    %8 = vector.shape_cast %7 : vector<1x2x8x8x4xf32> to vector<2x8x8x4xf32>
    %9 = arith.maximumf %6, %8 : vector<2x8x8x4xf32>
    %10 = arith.maximumf %4, %9 : vector<2x8x8x4xf32>
    %cst = arith.constant 0.000000e+00 : f32
    %11 = vector.broadcast %cst : f32 to vector<2x10x10x4xf32>
    %c0_16 = arith.constant 0 : index
    %c0_17 = arith.constant 0 : index
    %c0_18 = arith.constant 0 : index
    %c0_19 = arith.constant 0 : index
    %12 = vector.load %arg8[%c0_16, %c0_17, %c0_18, %c0_19] : memref<2x10x10x4xf32, #tpu.memory_space<vmem>>, vector<2x10x10x4xf32>
    tpu.vector_store %arg8[%c0_16, %c0_17, %c0_18, %c0_19], %11 {strides = array<i32>} : memref<2x10x10x4xf32, #tpu.memory_space<vmem>>, vector<2x10x10x4xf32>,
    %c0_20 = arith.constant 0 : index
    %c1_21 = arith.constant 1 : index
    %c1_22 = arith.constant 1 : index
    %c0_23 = arith.constant 0 : index
    %13 = vector.load %arg8[%c0_20, %c1_21, %c1_22, %c0_23] : memref<2x10x10x4xf32, #tpu.memory_space<vmem>>, vector<2x8x8x4xf32>
    tpu.vector_store %arg8[%c0_20, %c1_21, %c1_22, %c0_23], %10 {strides = array<i32>} : memref<2x10x10x4xf32, #tpu.memory_space<vmem>>, vector<2x8x8x4xf32>,
    %c0_24 = arith.constant 0 : index
    %c0_25 = arith.constant 0 : index
    %c0_26 = arith.constant 0 : index
    %c0_27 = arith.constant 0 : index
    %14 = vector.load %arg8[%c0_24, %c0_25, %c0_26, %c0_27] : memref<2x10x10x4xf32, #tpu.memory_space<vmem>>, vector<2x10x10x4xf32>
    %c0_28 = arith.constant 0 : index
    %c0_29 = arith.constant 0 : index
    %15 = vector.load %arg1[%c0_28, %c0_29] : memref<36x8xbf16, #tpu.memory_space<vmem>>, vector<36x8xbf16>
    %c0_30 = arith.constant 0 : index
    %c0_31 = arith.constant 0 : index
    %16 = vector.load %arg3[%c0_30, %c0_31] : memref<1x8xf32, #tpu.memory_space<vmem>>, vector<1x8xf32>
    %c0_32 = arith.constant 0 : index
    %c0_33 = arith.constant 0 : index
    %17 = vector.load %arg4[%c0_32, %c0_33] : memref<1x8xf32, #tpu.memory_space<vmem>>, vector<1x8xf32>
    %18 = vector.extract_strided_slice %14 {offsets = [0, 0, 0, 0], sizes = [2, 8, 8, 4], strides = [1, 1, 1, 1]} : vector<2x10x10x4xf32> to vector<2x8x8x4xf32>
    %19 = vector.shape_cast %18 : vector<2x8x8x4xf32> to vector<128x4xf32>
    %20 = vector.extract_strided_slice %14 {offsets = [0, 0, 1, 0], sizes = [2, 8, 8, 4], strides = [1, 1, 1, 1]} : vector<2x10x10x4xf32> to vector<2x8x8x4xf32>
    %21 = vector.shape_cast %20 : vector<2x8x8x4xf32> to vector<128x4xf32>
    %22 = vector.extract_strided_slice %14 {offsets = [0, 0, 2, 0], sizes = [2, 8, 8, 4], strides = [1, 1, 1, 1]} : vector<2x10x10x4xf32> to vector<2x8x8x4xf32>
    %23 = vector.shape_cast %22 : vector<2x8x8x4xf32> to vector<128x4xf32>
    %24 = vector.extract_strided_slice %14 {offsets = [0, 1, 0, 0], sizes = [2, 8, 8, 4], strides = [1, 1, 1, 1]} : vector<2x10x10x4xf32> to vector<2x8x8x4xf32>
    %25 = vector.shape_cast %24 : vector<2x8x8x4xf32> to vector<128x4xf32>
    %26 = vector.extract_strided_slice %14 {offsets = [0, 1, 1, 0], sizes = [2, 8, 8, 4], strides = [1, 1, 1, 1]} : vector<2x10x10x4xf32> to vector<2x8x8x4xf32>
    %27 = vector.shape_cast %26 : vector<2x8x8x4xf32> to vector<128x4xf32>
    %28 = vector.extract_strided_slice %14 {offsets = [0, 1, 2, 0], sizes = [2, 8, 8, 4], strides = [1, 1, 1, 1]} : vector<2x10x10x4xf32> to vector<2x8x8x4xf32>
    %29 = vector.shape_cast %28 : vector<2x8x8x4xf32> to vector<128x4xf32>
    %30 = vector.extract_strided_slice %14 {offsets = [0, 2, 0, 0], sizes = [2, 8, 8, 4], strides = [1, 1, 1, 1]} : vector<2x10x10x4xf32> to vector<2x8x8x4xf32>
    %31 = vector.shape_cast %30 : vector<2x8x8x4xf32> to vector<128x4xf32>
    %32 = vector.extract_strided_slice %14 {offsets = [0, 2, 1, 0], sizes = [2, 8, 8, 4], strides = [1, 1, 1, 1]} : vector<2x10x10x4xf32> to vector<2x8x8x4xf32>
    %33 = vector.shape_cast %32 : vector<2x8x8x4xf32> to vector<128x4xf32>
    %34 = vector.extract_strided_slice %14 {offsets = [0, 2, 2, 0], sizes = [2, 8, 8, 4], strides = [1, 1, 1, 1]} : vector<2x10x10x4xf32> to vector<2x8x8x4xf32>
    %35 = vector.shape_cast %34 : vector<2x8x8x4xf32> to vector<128x4xf32>
    %36 = tpu.concatenate %19, %21, %23, %25, %27, %29, %31, %33, %35 in 1 : vector<128x4xf32>, vector<128x4xf32>, vector<128x4xf32>, vector<128x4xf32>, vector<128x4xf32>, vector<128x4xf32>, vector<128x4xf32>, vector<128x4xf32>, vector<128x4xf32> -> vector<128x36xf32>
    %37 = arith.truncf %36 : vector<128x36xf32> to vector<128x36xbf16>
    %cst_34 = arith.constant dense<0.000000e+00> : vector<128x8xf32>
    %38 = tpu.matmul %37, %15, %cst_34 {dimension_numbers = #tpu.dot_dimension_numbers<[1], [0], [0], [1], [0, 0, 1, 1], [], []>} : vector<128x36xbf16>, vector<36x8xbf16>, vector<128x8xf32> -> vector<128x8xf32>
    %cst_35 = arith.constant dense<0.000000e+00> : vector<8xf32>
    %39 = vector.multi_reduction <add>, %38, %cst_35 [0] : vector<128x8xf32> to vector<8xf32>
    %40 = vector.shape_cast %39 : vector<8xf32> to vector<1x8xf32>
    %cst_36 = arith.constant 7.812500e-03 : f32
    %41 = vector.broadcast %cst_36 : f32 to vector<1x8xf32>
    %42 = arith.mulf %40, %41 : vector<1x8xf32>
    %43 = arith.mulf %38, %38 : vector<128x8xf32>
    %cst_37 = arith.constant dense<0.000000e+00> : vector<8xf32>
    %44 = vector.multi_reduction <add>, %43, %cst_37 [0] : vector<128x8xf32> to vector<8xf32>
    %45 = vector.shape_cast %44 : vector<8xf32> to vector<1x8xf32>
    %cst_38 = arith.constant 7.812500e-03 : f32
    %46 = vector.broadcast %cst_38 : f32 to vector<1x8xf32>
    %47 = arith.mulf %45, %46 : vector<1x8xf32>
    %48 = arith.mulf %42, %42 : vector<1x8xf32>
    %49 = arith.subf %47, %48 : vector<1x8xf32>
    %cst_39 = arith.constant 9.99999974E-6 : f32
    %50 = vector.broadcast %cst_39 : f32 to vector<1x8xf32>
    %51 = arith.addf %49, %50 : vector<1x8xf32>
    %52 = math.rsqrt %51 : vector<1x8xf32>
    %53 = arith.mulf %16, %52 : vector<1x8xf32>
    %54 = arith.mulf %53, %42 : vector<1x8xf32>
    %55 = arith.subf %17, %54 : vector<1x8xf32>
    %56 = vector.broadcast %53 : vector<1x8xf32> to vector<128x8xf32>
    %57 = arith.mulf %38, %56 : vector<128x8xf32>
    %58 = vector.broadcast %55 : vector<1x8xf32> to vector<128x8xf32>
    %59 = arith.addf %57, %58 : vector<128x8xf32>
    %cst_40 = arith.constant 0.000000e+00 : f32
    %60 = vector.broadcast %cst_40 : f32 to vector<128x8xf32>
    %61 = arith.maximumf %59, %60 : vector<128x8xf32>
    %cst_41 = arith.constant 0.000000e+00 : f32
    %62 = vector.broadcast %cst_41 : f32 to vector<2x10x10x8xf32>
    %c0_42 = arith.constant 0 : index
    %c0_43 = arith.constant 0 : index
    %c0_44 = arith.constant 0 : index
    %c0_45 = arith.constant 0 : index
    %63 = vector.load %arg9[%c0_42, %c0_43, %c0_44, %c0_45] : memref<2x10x10x8xf32, #tpu.memory_space<vmem>>, vector<2x10x10x8xf32>
    tpu.vector_store %arg9[%c0_42, %c0_43, %c0_44, %c0_45], %62 {strides = array<i32>} : memref<2x10x10x8xf32, #tpu.memory_space<vmem>>, vector<2x10x10x8xf32>,
    %64 = vector.shape_cast %61 : vector<128x8xf32> to vector<2x8x8x8xf32>
    %c0_46 = arith.constant 0 : index
    %c1_47 = arith.constant 1 : index
    %c1_48 = arith.constant 1 : index
    %c0_49 = arith.constant 0 : index
    %65 = vector.load %arg9[%c0_46, %c1_47, %c1_48, %c0_49] : memref<2x10x10x8xf32, #tpu.memory_space<vmem>>, vector<2x8x8x8xf32>
    tpu.vector_store %arg9[%c0_46, %c1_47, %c1_48, %c0_49], %64 {strides = array<i32>} : memref<2x10x10x8xf32, #tpu.memory_space<vmem>>, vector<2x8x8x8xf32>,
    %c0_50 = arith.constant 0 : index
    %c0_51 = arith.constant 0 : index
    %c0_52 = arith.constant 0 : index
    %c0_53 = arith.constant 0 : index
    %66 = vector.load %arg9[%c0_50, %c0_51, %c0_52, %c0_53] : memref<2x10x10x8xf32, #tpu.memory_space<vmem>>, vector<2x10x10x8xf32>
    %c0_54 = arith.constant 0 : index
    %c0_55 = arith.constant 0 : index
    %67 = vector.load %arg2[%c0_54, %c0_55] : memref<72x8xbf16, #tpu.memory_space<vmem>>, vector<72x8xbf16>
    %c0_56 = arith.constant 0 : index
    %c0_57 = arith.constant 0 : index
    %68 = vector.load %arg5[%c0_56, %c0_57] : memref<1x8xf32, #tpu.memory_space<vmem>>, vector<1x8xf32>
    %c0_58 = arith.constant 0 : index
    %c0_59 = arith.constant 0 : index
    %69 = vector.load %arg6[%c0_58, %c0_59] : memref<1x8xf32, #tpu.memory_space<vmem>>, vector<1x8xf32>
    %70 = vector.extract_strided_slice %66 {offsets = [0, 0, 0, 0], sizes = [2, 8, 8, 8], strides = [1, 1, 1, 1]} : vector<2x10x10x8xf32> to vector<2x8x8x8xf32>
    %71 = vector.shape_cast %70 : vector<2x8x8x8xf32> to vector<128x8xf32>
    %72 = vector.extract_strided_slice %66 {offsets = [0, 0, 1, 0], sizes = [2, 8, 8, 8], strides = [1, 1, 1, 1]} : vector<2x10x10x8xf32> to vector<2x8x8x8xf32>
    %73 = vector.shape_cast %72 : vector<2x8x8x8xf32> to vector<128x8xf32>
    %74 = vector.extract_strided_slice %66 {offsets = [0, 0, 2, 0], sizes = [2, 8, 8, 8], strides = [1, 1, 1, 1]} : vector<2x10x10x8xf32> to vector<2x8x8x8xf32>
    %75 = vector.shape_cast %74 : vector<2x8x8x8xf32> to vector<128x8xf32>
    %76 = vector.extract_strided_slice %66 {offsets = [0, 1, 0, 0], sizes = [2, 8, 8, 8], strides = [1, 1, 1, 1]} : vector<2x10x10x8xf32> to vector<2x8x8x8xf32>
    %77 = vector.shape_cast %76 : vector<2x8x8x8xf32> to vector<128x8xf32>
    %78 = vector.extract_strided_slice %66 {offsets = [0, 1, 1, 0], sizes = [2, 8, 8, 8], strides = [1, 1, 1, 1]} : vector<2x10x10x8xf32> to vector<2x8x8x8xf32>
    %79 = vector.shape_cast %78 : vector<2x8x8x8xf32> to vector<128x8xf32>
    %80 = vector.extract_strided_slice %66 {offsets = [0, 1, 2, 0], sizes = [2, 8, 8, 8], strides = [1, 1, 1, 1]} : vector<2x10x10x8xf32> to vector<2x8x8x8xf32>
    %81 = vector.shape_cast %80 : vector<2x8x8x8xf32> to vector<128x8xf32>
    %82 = vector.extract_strided_slice %66 {offsets = [0, 2, 0, 0], sizes = [2, 8, 8, 8], strides = [1, 1, 1, 1]} : vector<2x10x10x8xf32> to vector<2x8x8x8xf32>
    %83 = vector.shape_cast %82 : vector<2x8x8x8xf32> to vector<128x8xf32>
    %84 = vector.extract_strided_slice %66 {offsets = [0, 2, 1, 0], sizes = [2, 8, 8, 8], strides = [1, 1, 1, 1]} : vector<2x10x10x8xf32> to vector<2x8x8x8xf32>
    %85 = vector.shape_cast %84 : vector<2x8x8x8xf32> to vector<128x8xf32>
    %86 = vector.extract_strided_slice %66 {offsets = [0, 2, 2, 0], sizes = [2, 8, 8, 8], strides = [1, 1, 1, 1]} : vector<2x10x10x8xf32> to vector<2x8x8x8xf32>
    %87 = vector.shape_cast %86 : vector<2x8x8x8xf32> to vector<128x8xf32>
    %88 = tpu.concatenate %71, %73, %75, %77, %79, %81, %83, %85, %87 in 1 : vector<128x8xf32>, vector<128x8xf32>, vector<128x8xf32>, vector<128x8xf32>, vector<128x8xf32>, vector<128x8xf32>, vector<128x8xf32>, vector<128x8xf32>, vector<128x8xf32> -> vector<128x72xf32>
    %89 = arith.truncf %88 : vector<128x72xf32> to vector<128x72xbf16>
    %cst_60 = arith.constant dense<0.000000e+00> : vector<128x8xf32>
    %90 = tpu.matmul %89, %67, %cst_60 {dimension_numbers = #tpu.dot_dimension_numbers<[1], [0], [0], [1], [0, 0, 1, 1], [], []>} : vector<128x72xbf16>, vector<72x8xbf16>, vector<128x8xf32> -> vector<128x8xf32>
    %cst_61 = arith.constant dense<0.000000e+00> : vector<8xf32>
    %91 = vector.multi_reduction <add>, %90, %cst_61 [0] : vector<128x8xf32> to vector<8xf32>
    %92 = vector.shape_cast %91 : vector<8xf32> to vector<1x8xf32>
    %cst_62 = arith.constant 7.812500e-03 : f32
    %93 = vector.broadcast %cst_62 : f32 to vector<1x8xf32>
    %94 = arith.mulf %92, %93 : vector<1x8xf32>
    %95 = arith.mulf %90, %90 : vector<128x8xf32>
    %cst_63 = arith.constant dense<0.000000e+00> : vector<8xf32>
    %96 = vector.multi_reduction <add>, %95, %cst_63 [0] : vector<128x8xf32> to vector<8xf32>
    %97 = vector.shape_cast %96 : vector<8xf32> to vector<1x8xf32>
    %cst_64 = arith.constant 7.812500e-03 : f32
    %98 = vector.broadcast %cst_64 : f32 to vector<1x8xf32>
    %99 = arith.mulf %97, %98 : vector<1x8xf32>
    %100 = arith.mulf %94, %94 : vector<1x8xf32>
    %101 = arith.subf %99, %100 : vector<1x8xf32>
    %cst_65 = arith.constant 9.99999974E-6 : f32
    %102 = vector.broadcast %cst_65 : f32 to vector<1x8xf32>
    %103 = arith.addf %101, %102 : vector<1x8xf32>
    %104 = math.rsqrt %103 : vector<1x8xf32>
    %105 = arith.mulf %68, %104 : vector<1x8xf32>
    %106 = arith.mulf %105, %94 : vector<1x8xf32>
    %107 = arith.subf %69, %106 : vector<1x8xf32>
    %108 = vector.broadcast %105 : vector<1x8xf32> to vector<128x8xf32>
    %109 = arith.mulf %90, %108 : vector<128x8xf32>
    %110 = vector.broadcast %107 : vector<1x8xf32> to vector<128x8xf32>
    %111 = arith.addf %109, %110 : vector<128x8xf32>
    %cst_66 = arith.constant 0.000000e+00 : f32
    %112 = vector.broadcast %cst_66 : f32 to vector<128x8xf32>
    %113 = arith.maximumf %111, %112 : vector<128x8xf32>
    %c0_67 = arith.constant 0 : index
    %c0_68 = arith.constant 0 : index
    %114 = vector.load %arg7[%c0_67, %c0_68] : memref<128x8xf32, #tpu.memory_space<vmem>>, vector<128x8xf32>
    tpu.vector_store %arg7[%c0_67, %c0_68], %113 {strides = array<i32>} : memref<128x8xf32, #tpu.memory_space<vmem>>, vector<128x8xf32>,
    return
  }
}

</mosaic_0001>

<bundles_post_ra>
// kernel: down_forward.1
= control target key start
LH: loop header
LB: loop body
LE: loop exit
PB: predicated region body
PF: predicated region fallthrough
CT: control target
= control target key end

     0   :  { %vm142_vm0 = vcmask 31744   ;;  %vm144_vm1 = vcmask 25600   ;;  %v5223_v3 = vmov 0.0   ;;  %vm280_vm2 = vcmask 1046528   ;;  %s3034_s17 = smov 4   ;;  %s3035_s26 = smov 8   ;;  %s5215_s0 = inlined_call_operand.vmem [shape: f32[4,2,8,8,4], index: 0, kind: input, shape index: {}]   ;;  %s5216_s1 = inlined_call_operand.vmem [shape: bf16[36,8], index: 1, kind: input, shape index: {}]   ;;  %s5217_s3 = inlined_call_operand.vmem [shape: f32[1,8], index: 3, kind: input, shape index: {}]   ;;  %s5218_s4 = inlined_call_operand.vmem [shape: f32[1,8], index: 4, kind: input, shape index: {}]   ;;  %s5219_s2 = inlined_call_operand.vmem [shape: bf16[72,8], index: 2, kind: input, shape index: {}]   ;;  %s5220_s5 = inlined_call_operand.vmem [shape: f32[1,8], index: 5, kind: input, shape index: {}]   ;;  %s5221_s6 = inlined_call_operand.vmem [shape: f32[1,8], index: 6, kind: input, shape index: {}]   ;;  %s5222_s7 = inlined_call_operand.vmem [shape: f32[128,8], index: 7, kind: output, shape index: {}]  }
   0x1   :  { %v35_v0 = vld [vmem:[%s5215_s0 + $0x40] sm:$0xff]  ;;  %v36_v1 = vld [vmem:[%s5215_s0 + $0x48] sm:$0xff]  ;;  %164 = vst.msk [vmem:[#allocation2 + $0xa0] sm:$0xff] %vm142_vm0, %v5223_v3  ;;  %v30_v26 = vld [vmem:[%s5215_s0 + $0x18] sm:$0xff]  ;;  %vm329_vm3 = vcmask 1045504   ;;  %s3038_s21 = smov 20  }
   0x2   :  { %v2280_v2 = vld [vmem:[%s5215_s0 + $0xc0] sm:$0xff]  ;;  %v2281_v4 = vld [vmem:[%s5215_s0 + $0xc8] sm:$0xff]  ;;  %165 = vst.msk [vmem:[#allocation2 + $0xa8] sm:$0x3] %vm144_vm1, %v5223_v3  ;;  %v2275_v27 = vld [vmem:[%s5215_s0 + $0x98] sm:$0xff]  ;;  %s3039_s22 = smov 16  }
   0x3   :  { %v68_v5 = vmax.f32 %v35_v0, %v2280_v2  ;;  %v2296_v6 = vld [vmem:[%s5215_s0 + $0x140] sm:$0xff]  ;;  %v2297_v7 = vld [vmem:[%s5215_s0 + $0x148] sm:$0xff]  ;;  %v69_v8 = vmax.f32 %v36_v1, %v2281_v4  ;;  %166 = vst.msk [vmem:[#allocation2 + $0xb0] sm:$0xff] %vm142_vm0, %v5223_v3  ;;  %v2291_v28 = vld [vmem:[%s5215_s0 + $0x118] sm:$0xff]  ;;  %v63_v43 = vmax.f32 %v30_v26, %v2275_v27  ;;  %s3040_s23 = smov 32   ;;  %s3041_s24 = smov 28  }
   0x4   :  { %v2312_v9 = vld [vmem:[%s5215_s0 + $0x1c0] sm:$0xff]  ;;  %v2313_v10 = vld [vmem:[%s5215_s0 + $0x1c8] sm:$0xff]  ;;  %167 = vst.msk [vmem:[#allocation2 + $0xb8] sm:$0x3] %vm144_vm1, %v5223_v3  ;;  %v2307_v32 = vld [vmem:[%s5215_s0 + $0x198] sm:$0xff]  ;;  %vm810_vm4 = vcmask 64512  }
   0x5   :  { %v118_v11 = vmax.f32 %v2296_v6, %v2312_v9  ;;  %v119_v12 = vmax.f32 %v2297_v7, %v2313_v10  ;;  %168 = vst.msk [vmem:[#allocation2 + $0xc0] sm:$0xff] %vm142_vm0, %v5223_v3  ;;  %v31_v29 = vld [vmem:[%s5215_s0 + $0x20] sm:$0xff]  ;;  %v28_v37 = vld [vmem:[%s5215_s0 + $0x8] sm:$0xff]  ;;  %v37_v42 = vld [vmem:[%s5215_s0 + $0x50] sm:$0xff]  ;;  %v113_v44 = vmax.f32 %v2291_v28, %v2307_v32  ;;  %vm827_vm5 = vcmask 97280   ;;  %s3044_s12 = smov 64  }
   0x6   :  { %169 = vst.msk [vmem:[#allocation2 + $0xc8] sm:$0x3] %vm144_vm1, %v5223_v3  ;;  %v2276_v30 = vld [vmem:[%s5215_s0 + $0xa0] sm:$0xff]  ;;  %v2273_v38 = vld [vmem:[%s5215_s0 + $0x88] sm:$0xff]  ;;  %v2282_v45 = vld [vmem:[%s5215_s0 + $0xd0] sm:$0xff]  ;;  %vm977_vm6 = vcmask 1041408  }
   0x7   :  { %v134_v13 = vmax.f32 %v68_v5, %v118_v11  ;;  %v135_v14 = vmax.f32 %v69_v8, %v119_v12  ;;  %143 = vst.msk [vmem:[#allocation2] sm:$0xff] %vm142_vm0, %v5223_v3  ;;  %v2292_v31 = vld [vmem:[%s5215_s0 + $0x120] sm:$0xff]  ;;  %v2289_v40 = vld [vmem:[%s5215_s0 + $0x108] sm:$0xff]  ;;  %v2298_v46 = vld [vmem:[%s5215_s0 + $0x150] sm:$0xff]  ;;  %v64_v48 = vmax.f32 %v31_v29, %v2276_v30  ;;  %v61_v58 = vmax.f32 %v28_v37, %v2273_v38  ;;  %s3045_s13 = smov 56  }
   0x8   :  { %v3126_v15 = vld [vmem:[#allocation2 + $0xa0] sm:$0xff]  ;;  %145 = vst.msk [vmem:[#allocation2 + $0x8] sm:$0x3] %vm144_vm1, %v5223_v3  ;;  %v2305_v41 = vld [vmem:[%s5215_s0 + $0x188] sm:$0xff]  ;;  %v2314_v47 = vld [vmem:[%s5215_s0 + $0x1d0] sm:$0xff]  ;;  %v129_v63 = vmax.f32 %v63_v43, %v113_v44  ;;  %v70_v0 = vmax.f32 %v37_v42, %v2282_v45  ;;  %vm844_vm7 = vcmask 130048  }
   0x9   :  { %193 = vst.msk [vmem:[#allocation2 + $0xb1] sm:$0xff] %vm142_vm0, %v134_v13  ;;  %v3128_v16 = vld [vmem:[#allocation2 + $0xa8] sm:$0x3]  ;;  %v305_v17 = vrot.slane %v3126_v15, 1  ;;  %v2308_v33 = vld [vmem:[%s5215_s0 + $0x1a0] sm:$0xff]  ;;  %v33_v51 = vld [vmem:[%s5215_s0 + $0x30] sm:$0xff]  ;;  %v111_v59 = vmax.f32 %v2289_v40, %v2305_v41  ;;  %v120_v1 = vmax.f32 %v2298_v46, %v2314_v47 }
   0xa   :  { %194 = vst.msk [vmem:[#allocation2 + $0xc1] sm:$0xff] %vm142_vm0, %v135_v14  ;;  %v306_v18 = vrot.slane %v3128_v16, 1  ;;  %v27_v34 = vld [vmem:[%s5215_s0] sm:$0xff]  ;;  %v114_v49 = vmax.f32 %v2292_v31, %v2308_v33  ;;  %v32_v50 = vld [vmem:[%s5215_s0 + $0x28] sm:$0xff]  ;;  %v2278_v55 = vld [vmem:[%s5215_s0 + $0xb0] sm:$0xff]  ;;  %vm861_vm8 = vcmask 162816  }
   0xb   :  { %146 = vst.msk [vmem:[#allocation2 + $0x10] sm:$0xff] %vm142_vm0, %v5223_v3  ;;  %v2272_v35 = vld [vmem:[%s5215_s0 + $0x80] sm:$0xff]  ;;  %v2277_v52 = vld [vmem:[%s5215_s0 + $0xa8] sm:$0xff]  ;;  %v2294_v60 = vld [vmem:[%s5215_s0 + $0x130] sm:$0xff]  ;;  %v66_v13 = vmax.f32 %v33_v51, %v2278_v55  ;;  %v136_v29 = vmax.f32 %v70_v0, %v120_v1  ;;  %vm878_vm9 = vcmask 195584   ;;  %vm895_vm10 = vcmask 228352  }
   0xc   :  { %147 = vst.msk [vmem:[#allocation2 + $0x18] sm:$0x3] %vm144_vm1, %v5223_v3  ;;  %v307_v21 = vsel %vm280_vm2, %v305_v17, %v306_v18  ;;  %v2288_v36 = vld [vmem:[%s5215_s0 + $0x100] sm:$0xff]  ;;  %v60_v53 = vmax.f32 %v27_v34, %v2272_v35  ;;  %v2293_v56 = vld [vmem:[%s5215_s0 + $0x128] sm:$0xff]  ;;  %v2310_v61 = vld [vmem:[%s5215_s0 + $0x1b0] sm:$0xff]  ;;  %v130_v6 = vmax.f32 %v64_v48, %v114_v49  ;;  %v65_v9 = vmax.f32 %v32_v50, %v2277_v52 }
   0xd   :  { %148 = vst.msk [vmem:[#allocation2 + $0x20] sm:$0xff] %vm142_vm0, %v5223_v3  ;;  %v2304_v39 = vld [vmem:[%s5215_s0 + $0x180] sm:$0xff]  ;;  %v2309_v57 = vld [vmem:[%s5215_s0 + $0x1a8] sm:$0xff]  ;;  %v29_v62 = vld [vmem:[%s5215_s0 + $0x10] sm:$0xff]  ;;  %v116_v14 = vmax.f32 %v2294_v60, %v2310_v61  ;;  %vm912_vm11 = vcmask 261120   ;;  %vm952_vm12 = vcmask 293888  }
   0xe   :  { %149 = vst.msk [vmem:[#allocation2 + $0x28] sm:$0x3] %vm144_vm1, %v5223_v3  ;;  %v110_v54 = vmax.f32 %v2288_v36, %v2304_v39  ;;  %v2274_v2 = vld [vmem:[%s5215_s0 + $0x90] sm:$0xff]  ;;  %v3302_v7 = vld [vmem:[#allocation2] sm:$0xff]  ;;  %v115_v10 = vmax.f32 %v2293_v56, %v2309_v57  ;;  %v40_v11 = vld [vmem:[%s5215_s0 + $0x68] sm:$0xff]  ;;  %vm1193_vm13 = vcmask 58368  }
   0xf   :  { %150 = vst.msk [vmem:[#allocation2 + $0x30] sm:$0xff] %vm142_vm0, %v5223_v3  ;;  %v2290_v4 = vld [vmem:[%s5215_s0 + $0x110] sm:$0xff]  ;;  %v3304_v8 = vld [vmem:[#allocation2 + $0x8] sm:$0x3]  ;;  %v38_v31 = vld [vmem:[%s5215_s0 + $0x58] sm:$0xff]  ;;  %v281_v37 = vrot.slane %v3302_v7, 1  ;;  %v132_v39 = vmax.f32 %v66_v13, %v116_v14 }
  0x10   :  { %v3142_v19 = vld [vmem:[#allocation2 + $0xb0] sm:$0xff]  ;;  %v3144_v20 = vld [vmem:[#allocation2 + $0xb8] sm:$0x3]  ;;  %151 = vst.msk [vmem:[#allocation2 + $0x38] sm:$0x3] %vm144_vm1, %v5223_v3  ;;  %v126_v12 = vmax.f32 %v60_v53, %v110_v54  ;;  %v2285_v18 = vld [vmem:[%s5215_s0 + $0xe8] sm:$0xff]  ;;  %v131_v33 = vmax.f32 %v65_v9, %v115_v10 }
  0x11   :  { %v308_v22 = vrot.slane %v3142_v19, 1  ;;  %v309_v23 = vrot.slane %v3144_v20, 1  ;;  %152 = vst.msk [vmem:[#allocation2 + $0x40] sm:$0xff] %vm142_vm0, %v5223_v3  ;;  %v2306_v5 = vld [vmem:[%s5215_s0 + $0x190] sm:$0xff]  ;;  %v2301_v26 = vld [vmem:[%s5215_s0 + $0x168] sm:$0xff]  ;;  %v39_v32 = vld [vmem:[%s5215_s0 + $0x60] sm:$0xff]  ;;  %v73_v40 = vmax.f32 %v40_v11, %v2285_v18 }
  0x12   :  { %153 = vst.msk [vmem:[#allocation2 + $0x48] sm:$0x3] %vm144_vm1, %v5223_v3  ;;  %v41_v17 = vld [vmem:[%s5215_s0 + $0x70] sm:$0xff]  ;;  %v2317_v28 = vld [vmem:[%s5215_s0 + $0x1e8] sm:$0xff]  ;;  %v2283_v34 = vld [vmem:[%s5215_s0 + $0xd8] sm:$0xff]  ;;  %v282_v38 = vrot.slane %v3304_v8, 1 }
  0x13   :  { %v3154_v24 = vsel %vm280_vm2, %v308_v22, %v309_v23  ;;  %154 = vst.msk [vmem:[#allocation2 + $0x50] sm:$0xff] %vm142_vm0, %v5223_v3  ;;  %v127_v22 = vmax.f32 %v61_v58, %v111_v59  ;;  %v62_v23 = vmax.f32 %v29_v62, %v2274_v2  ;;  %v2302_v27 = vld [vmem:[%s5215_s0 + $0x170] sm:$0xff]  ;;  %v2299_v35 = vld [vmem:[%s5215_s0 + $0x158] sm:$0xff]  ;;  %v2284_v41 = vld [vmem:[%s5215_s0 + $0xe0] sm:$0xff]  ;;  %v123_v48 = vmax.f32 %v2301_v26, %v2317_v28 }
  0x14   :  { %5237 = vst [vmem:[#allocation4_spill] sm:$0xff] %v3154_v24  ;;  %v2407_v25 = vpack.i.bf16 %v3154_v24, %v307_v21  ;;  %v2286_v21 = vld [vmem:[%s5215_s0 + $0xf0] sm:$0xff]  ;;  %v2315_v36 = vld [vmem:[%s5215_s0 + $0x1d8] sm:$0xff]  ;;  %v2300_v42 = vld [vmem:[%s5215_s0 + $0x160] sm:$0xff]  ;;  %v71_v50 = vmax.f32 %v38_v31, %v2283_v34  ;;  %v72_v52 = vmax.f32 %v39_v32, %v2284_v41  ;;  %v283_v58 = vsel %vm280_vm2, %v281_v37, %v282_v38 }
  0x15   :  { %155 = vst.msk [vmem:[#allocation2 + $0x58] sm:$0x3] %vm144_vm1, %v5223_v3  ;;  %v2318_v30 = vld [vmem:[%s5215_s0 + $0x1f0] sm:$0xff]  ;;  %v2316_v43 = vld [vmem:[%s5215_s0 + $0x1e0] sm:$0xff]  ;;  %v3365_v45 = vld [vmem:[#allocation2 + $0xc8] sm:$0x3]  ;;  %v74_v47 = vmax.f32 %v41_v17, %v2286_v21  ;;  %v121_v51 = vmax.f32 %v2299_v35, %v2315_v36  ;;  %v139_v60 = vmax.f32 %v73_v40, %v123_v48 }
  0x16   :  { %2408 = vrot.lane.b32.xlu2 %v2407_v25, %s3034_s17  ;;  %156 = vst.msk [vmem:[#allocation2 + $0x60] sm:$0xff] %vm142_vm0, %v5223_v3  ;;  %v112_v25 = vmax.f32 %v2290_v4, %v2306_v5  ;;  %v3363_v44 = vld [vmem:[#allocation2 + $0xc0] sm:$0xff]  ;;  %v124_v49 = vmax.f32 %v2302_v27, %v2318_v30  ;;  %v122_v53 = vmax.f32 %v2300_v42, %v2316_v43  ;;  %v312_v55 = vrot.slane %v3365_v45, 1 }
  0x17   :  { %157 = vst.msk [vmem:[#allocation2 + $0x68] sm:$0x3] %vm144_vm1, %v5223_v3  ;;  %v311_v54 = vrot.slane %v3363_v44, 1  ;;  %v331_v59 = vrot.slane %v3304_v8, 2  ;;  %v330_v2 = vrot.slane %v3302_v7, 2  ;;  %v137_v4 = vmax.f32 %v71_v50, %v121_v51 }
  0x18   :  { %158 = vst.msk [vmem:[#allocation2 + $0x70] sm:$0xff] %vm142_vm0, %v5223_v3  ;;  %v128_v46 = vmax.f32 %v62_v23, %v112_v25  ;;  %v140_v61 = vmax.f32 %v74_v47, %v124_v49  ;;  %v138_v11 = vmax.f32 %v72_v52, %v122_v53 }
  0x19   :  { %159 = vst.msk [vmem:[#allocation2 + $0x78] sm:$0x3] %vm144_vm1, %v5223_v3 }
  0x1a   :  { %160 = vst.msk [vmem:[#allocation2 + $0x80] sm:$0xff] %vm142_vm0, %v5223_v3 }
  0x1b   :  { %161 = vst.msk [vmem:[#allocation2 + $0x88] sm:$0x3] %vm144_vm1, %v5223_v3 }
  0x1c   :  { %162 = vst.msk [vmem:[#allocation2 + $0x90] sm:$0xff] %vm142_vm0, %v5223_v3 }
  0x1d   :  { %163 = vst.msk [vmem:[#allocation2 + $0x98] sm:$0x3] %vm144_vm1, %v5223_v3 }
  0x1e   :  { %170 = vst.msk [vmem:[#allocation2 + $0xd0] sm:$0xff] %vm142_vm0, %v5223_v3 }
  0x1f   :  { %171 = vst.msk [vmem:[#allocation2 + $0xd8] sm:$0x3] %vm144_vm1, %v5223_v3 }
  0x20   :  { %172 = vst.msk [vmem:[#allocation2 + $0xe0] sm:$0xff] %vm142_vm0, %v5223_v3 }
  0x21   :  { %173 = vst.msk [vmem:[#allocation2 + $0xe8] sm:$0x3] %vm144_vm1, %v5223_v3 }
  0x22   :  { %174 = vst.msk [vmem:[#allocation2 + $0xf0] sm:$0xff] %vm142_vm0, %v5223_v3 }
  0x23   :  { %175 = vst.msk [vmem:[#allocation2 + $0xf8] sm:$0x3] %vm144_vm1, %v5223_v3 }
  0x24   :  { %176 = vst.msk [vmem:[#allocation2 + $0x100] sm:$0xff] %vm142_vm0, %v5223_v3 }
  0x25   :  { %177 = vst.msk [vmem:[#allocation2 + $0x108] sm:$0x3] %vm144_vm1, %v5223_v3 }
  0x26   :  { %178 = vst.msk [vmem:[#allocation2 + $0x110] sm:$0xff] %vm142_vm0, %v5223_v3 }
  0x27   :  { %179 = vst.msk [vmem:[#allocation2 + $0x118] sm:$0x3] %vm144_vm1, %v5223_v3 }
  0x28   :  { %180 = vst.msk [vmem:[#allocation2 + $0x120] sm:$0xff] %vm142_vm0, %v5223_v3 }
  0x29   :  { %181 = vst.msk [vmem:[#allocation2 + $0x128] sm:$0x3] %vm144_vm1, %v5223_v3 }
  0x2a   :  { %5238 = vst [vmem:[#allocation5_spill] sm:$0xff] %v3302_v7 }
  0x2b   :  { %182 = vst.msk [vmem:[#allocation2 + $0x130] sm:$0xff] %vm142_vm0, %v5223_v3 }
  0x2c   :  { %183 = vst.msk [vmem:[#allocation2 + $0x138] sm:$0x3] %vm144_vm1, %v5223_v3  ;;  %vm2037_vm1 = vcmask 1043456  }
  0x2d   :  { %188 = vst.msk [vmem:[#allocation2 + $0x41] sm:$0xff] %vm142_vm0, %v129_v63 }
  0x2e   :  { %189 = vst.msk [vmem:[#allocation2 + $0x51] sm:$0xff] %vm142_vm0, %v130_v6 }
  0x2f   :  { %185 = vst.msk [vmem:[#allocation2 + $0x11] sm:$0xff] %vm142_vm0, %v126_v12 }
  0x30   :  { %186 = vst.msk [vmem:[#allocation2 + $0x21] sm:$0xff] %vm142_vm0, %v127_v22  ;;  %v3400_v22 = vsel %vm280_vm2, %v311_v54, %v312_v55 }
  0x31   :  { %195 = vst.msk [vmem:[#allocation2 + $0xd1] sm:$0xff] %vm142_vm0, %v136_v29 }
  0x32   :  { %190 = vst.msk [vmem:[#allocation2 + $0x61] sm:$0xff] %vm142_vm0, %v131_v33 }
  0x33   :  { %191 = vst.msk [vmem:[#allocation2 + $0x71] sm:$0xff] %vm142_vm0, %v132_v39 }
  0x34   :  { %v3373_v56 = vld [vmem:[#allocation2 + $0x40] sm:$0xff]  ;;  %v3375_v57 = vld [vmem:[#allocation2 + $0x48] sm:$0x3]  ;;  %187 = vst.msk [vmem:[#allocation2 + $0x31] sm:$0xff] %vm142_vm0, %v128_v46 }
  0x35   :  { %v3380_v62 = vld [vmem:[#allocation2 + $0x50] sm:$0xff]  ;;  %v3382_v63 = vld [vmem:[#allocation2 + $0x58] sm:$0x3]  ;;  %v293_v0 = vrot.slane %v3373_v56, 1  ;;  %v294_v1 = vrot.slane %v3375_v57, 1  ;;  %5239 = vst [vmem:[#allocation6_spill] sm:$0xff] %v3400_v22 }
  0x36   :  { %v296_v5 = vrot.slane %v3380_v62, 1  ;;  %v297_v6 = vrot.slane %v3382_v63, 1  ;;  %v3389_v9 = vld [vmem:[#allocation2 + $0x10] sm:$0xff]  ;;  %v204_v10 = vld [vmem:[#allocation2 + $0x18] sm:$0x3]  ;;  %198 = vst.msk [vmem:[#allocation2 + $0x101] sm:$0xff] %vm142_vm0, %v139_v60 }
  0x37   :  { %v3392_v12 = vsel %vm280_vm2, %v293_v0, %v294_v1  ;;  %v3394_v13 = vld [vmem:[#allocation2 + $0x20] sm:$0xff]  ;;  %v3396_v14 = vld [vmem:[#allocation2 + $0x28] sm:$0x3]  ;;  %v284_v17 = vrot.slane %v3389_v9, 1  ;;  %v285_v18 = vrot.slane %v204_v10, 1  ;;  %v334_v21 = vrot.slane %v204_v10, 2 }
  0x38   :  { %v3403_v23 = vsel %vm280_vm2, %v296_v5, %v297_v6  ;;  %v287_v25 = vrot.slane %v3394_v13, 1  ;;  %v288_v26 = vrot.slane %v3396_v14, 1  ;;  %v3407_v27 = vld [vmem:[#allocation2 + $0xd0] sm:$0xff]  ;;  %v3409_v28 = vld [vmem:[#allocation2 + $0xd8] sm:$0x3]  ;;  %199 = vst.msk [vmem:[#allocation2 + $0x111] sm:$0xff] %vm142_vm0, %v140_v61  ;;  %v332_v61 = vsel %vm329_vm3, %v330_v2, %v331_v59 }
  0x39   :  { %v3414_v29 = vpack.i.bf16 %v3403_v23, %v3392_v12  ;;  %v3417_v30 = vsel %vm280_vm2, %v284_v17, %v285_v18  ;;  %v314_v31 = vrot.slane %v3407_v27, 1  ;;  %v315_v32 = vrot.slane %v3409_v28, 1  ;;  %v3421_v33 = vld [vmem:[#allocation2 + $0x60] sm:$0xff]  ;;  %v214_v34 = vld [vmem:[#allocation2 + $0x68] sm:$0x3]  ;;  %196 = vst.msk [vmem:[#allocation2 + $0xe1] sm:$0xff] %vm142_vm0, %v137_v4 }
  0x3a   :  { %v2387_v35 = vpack.i.bf16 %v3417_v30, %v283_v58  ;;  %v3425_v36 = vld [vmem:[#allocation2 + $0x70] sm:$0xff]  ;;  %v216_v37 = vld [vmem:[#allocation2 + $0x78] sm:$0x3]  ;;  %v299_v38 = vrot.slane %v3421_v33, 1  ;;  %v300_v39 = vrot.slane %v214_v34, 1  ;;  %197 = vst.msk [vmem:[#allocation2 + $0xf1] sm:$0xff] %vm142_vm0, %v138_v11  ;;  %v3451_v51 = vsel %vm280_vm2, %v287_v25, %v288_v26 }
  0x3b   :  { %2398 = vrot.lane.b32.xlu1 %v3414_v29, %s3034_s17  ;;  %v3432_v40 = vsel %vm280_vm2, %v314_v31, %v315_v32  ;;  %v302_v41 = vrot.slane %v3425_v36, 1  ;;  %v303_v42 = vrot.slane %v216_v37, 1  ;;  %v3435_v43 = vld [vmem:[#allocation2 + $0x30] sm:$0xff]  ;;  %v3437_v46 = vld [vmem:[#allocation2 + $0x38] sm:$0x3]  ;;  %v333_v53 = vrot.slane %v3389_v9, 2 }
  0x3c   :  { %2388 = vrot.lane.b32.xlu0 %v2387_v35, %s3034_s17  ;;  %v3443_v47 = vpack.i.bf16 %v3432_v40, %v3400_v22  ;;  %v3446_v48 = vsel %vm280_vm2, %v299_v38, %v300_v39  ;;  %v290_v49 = vrot.slane %v3435_v43, 1  ;;  %v291_v50 = vrot.slane %v3437_v46, 1  ;;  %v2319_v22 = vld [vmem:[%s5215_s0 + $0x1f8] sm:$0xff] }
  0x3d   :  { %v3454_v52 = vsel %vm280_vm2, %v302_v41, %v303_v42  ;;  %v3466_v58 = vld [vmem:[#allocation2 + $0x100] sm:$0xff]  ;;  %v3468_v60 = vld [vmem:[#allocation2 + $0x108] sm:$0x3]  ;;  %v3474_v0 = vsel %vm329_vm3, %v333_v53, %v334_v21  ;;  %v348_v17 = vrot.slane %v3421_v33, 2  ;;  %v349_v32 = vrot.slane %v214_v34, 2 }
  0x3e   :  { %5240 = vst [vmem:[#allocation7_spill] sm:$0xff] %v3443_v47  ;;  %2413 = vrot.lane.b32.xlu2 %v3443_v47, %s3034_s17  ;;  %v3460_v54 = vsel %vm280_vm2, %v290_v49, %v291_v50  ;;  %v3464_v55 = vpack.i.bf16 %v3454_v52, %v3446_v48  ;;  %v323_v6 = vrot.slane %v3466_v58, 1  ;;  %v324_v10 = vrot.slane %v3468_v60, 1 }
  0x3f   :  { %5241 = vst [vmem:[#allocation8_spill] sm:$0xff] %v3454_v52  ;;  %v3478_v1 = vpack.i.bf16 %v3460_v54, %v3451_v51  ;;  %v3480_v4 = vld [vmem:[#allocation2 + $0x110] sm:$0xff]  ;;  %v3482_v5 = vld [vmem:[#allocation2 + $0x118] sm:$0x3]  ;;  %v2427_v18 = vpack.i.bf16 %v3474_v0, %v332_v61  ;;  %v351_v39 = vrot.slane %v3425_v36, 2  ;;  %v352_v41 = vrot.slane %v216_v37, 2 }
  0x40   :  { %v326_v11 = vrot.slane %v3480_v4, 1  ;;  %v327_v8 = vrot.slane %v3482_v5, 1  ;;  %v3488_v59 = vld [vmem:[#allocation2 + $0xe0] sm:$0xff]  ;;  %v230_v2 = vld [vmem:[#allocation2 + $0xe8] sm:$0x3]  ;;  %v3502_v42 = vsel %vm280_vm2, %v323_v6, %v324_v10  ;;  %v343_v37 = vrot.slane %v3375_v57, 2 }
  0x41   :  { %v3492_v21 = vld [vmem:[#allocation2 + $0xf0] sm:$0xff]  ;;  %v232_v25 = vld [vmem:[#allocation2 + $0xf8] sm:$0x3]  ;;  %v317_v26 = vrot.slane %v3488_v59, 1  ;;  %v318_v31 = vrot.slane %v230_v2, 1  ;;  %5242 = vst [vmem:[#allocation9_spill] sm:$0xff] %v3502_v42  ;;  %v3520_v61 = vsel %vm329_vm3, %v348_v17, %v349_v32  ;;  %v3523_v6 = vsel %vm329_vm3, %v351_v39, %v352_v41 }
  0x42   :  { %v320_v35 = vrot.slane %v3492_v21, 1  ;;  %v321_v38 = vrot.slane %v232_v25, 1  ;;  %v3505_v49 = vsel %vm280_vm2, %v326_v11, %v327_v8  ;;  %5246 = vst [vmem:[#allocation13_spill] sm:$0xff] %v3523_v6  ;;  %v346_v10 = vrot.slane %v3382_v63, 2  ;;  %v2279_v17 = vld [vmem:[%s5215_s0 + $0xb8] sm:$0xff] }
  0x43   :  { %2403 = vrot.lane.b32.xlu1 %v3464_v55, %s3034_s17  ;;  %5243 = vst [vmem:[#allocation10_spill] sm:$0xff] %v3505_v49  ;;  %v3508_v34 = vsel %vm280_vm2, %v317_v26, %v318_v31  ;;  %v3517_v53 = vpack.i.bf16 %v3505_v49, %v3502_v42  ;;  %v342_v8 = vrot.slane %v3373_v56, 2  ;;  %v345_v57 = vrot.slane %v3380_v62, 2  ;;  %v2303_v49 = vld [vmem:[%s5215_s0 + $0x178] sm:$0xff] }
  0x44   :  { %2393 = vrot.lane.b32.xlu0 %v3478_v1, %s3034_s17  ;;  %v3511_v50 = vsel %vm280_vm2, %v320_v35, %v321_v38  ;;  %v336_v26 = vrot.slane %v3394_v13, 2  ;;  %v337_v63 = vrot.slane %v3396_v14, 2  ;;  %v339_v31 = vrot.slane %v3435_v43, 2  ;;  %v2295_v35 = vld [vmem:[%s5215_s0 + $0x138] sm:$0xff] }
  0x45   :  { %5244 = vst [vmem:[#allocation11_spill] sm:$0xff] %v3511_v50  ;;  %v3528_v11 = vpack.i.bf16 %v3511_v50, %v3508_v34  ;;  %v340_v32 = vrot.slane %v3437_v46, 2  ;;  %v2311_v38 = vld [vmem:[%s5215_s0 + $0x1b8] sm:$0xff]  ;;  %v3550_v39 = vpack.i.bf16 %v3523_v6, %v3520_v61  ;;  %v366_v41 = vrot.slane %v3488_v59, 2 }
  0x46   :  { %2428 = vrot.lane.b32.xlu2 %v2427_v18, %s3035_s26  ;;  %5245 = vst [vmem:[#allocation12_spill] sm:$0xff] %v3517_v53  ;;  %v34_v18 = vld [vmem:[%s5215_s0 + $0x38] sm:$0xff]  ;;  %v367_v3 = vrot.slane %v230_v2, 2  ;;  %v369_v7 = vrot.slane %v3492_v21, 2  ;;  %v370_v47 = vrot.slane %v232_v25, 2  ;;  %v3571_v24 = vsel %vm329_vm3, %v342_v8, %v343_v37 }
  0x47   :  { %5247 = vst [vmem:[#allocation14_spill] sm:$0xff] %v3528_v11  ;;  %v42_v14 = vld [vmem:[%s5215_s0 + $0x78] sm:$0xff]  ;;  %v67_v2 = vmax.f32 %v34_v18, %v2279_v17  ;;  %v117_v42 = vmax.f32 %v2295_v35, %v2311_v38  ;;  %v3577_v25 = vsel %vm329_vm3, %v336_v26, %v337_v63  ;;  %v3580_v50 = vsel %vm329_vm3, %v339_v31, %v340_v32 }
  0x48   :  { %v2287_v46 = vld [vmem:[%s5215_s0 + $0xf8] sm:$0xff]  ;;  %v360_v6 = vrot.slane %v3363_v44, 2  ;;  %v125_v37 = vmax.f32 %v2303_v49, %v2319_v22  ;;  %v361_v8 = vrot.slane %v3365_v45, 2  ;;  %v3594_v18 = vsel %vm329_vm3, %v369_v7, %v370_v47  ;;  %s3036_s0 = smov 12  }
  0x49   :  { %v75_v52 = vmax.f32 %v42_v14, %v2287_v46  ;;  %v2432_v17 = vpack.i.bf16 %v3580_v50, %v3577_v25  ;;  %v363_v26 = vrot.slane %v3407_v27, 2  ;;  %v355_v49 = vrot.slane %v3128_v16, 2 }
  0x4a   :  { %v358_v45 = vrot.slane %v3144_v20, 2  ;;  %v357_v63 = vrot.slane %v3142_v19, 2  ;;  %v373_v31 = vrot.slane %v3468_v60, 2  ;;  %v375_v32 = vrot.slane %v3480_v4, 2 }
  0x4b   :  { %2423 = vrot.lane.b32.xlu1 %v3517_v53, %s3034_s17  ;;  %v3574_v53 = vsel %vm329_vm3, %v345_v57, %v346_v10  ;;  %v3591_v57 = vsel %vm329_vm3, %v366_v41, %v367_v3  ;;  %v141_v22 = vmax.f32 %v75_v52, %v125_v37  ;;  %v354_v3 = vrot.slane %v3126_v15, 2 }
  0x4c   :  { %2418 = vrot.lane.b32.xlu0 %v3528_v11, %s3034_s17  ;;  %v133_v11 = vmax.f32 %v67_v2, %v117_v42  ;;  %v3587_v10 = vpack.i.bf16 %v3574_v53, %v3571_v24  ;;  %v364_v42 = vrot.slane %v3409_v28, 2  ;;  %v3607_v7 = vpack.i.bf16 %v3594_v18, %v3591_v57  ;;  %s3037_s17 = smov 24  }
  0x4d   :  { %200 = vst.msk [vmem:[#allocation2 + $0x121] sm:$0xff] %vm142_vm0, %v141_v22  ;;  %v3614_v28 = vsel %vm329_vm3, %v360_v6, %v361_v8  ;;  %v356_v20 = vsel %vm329_vm3, %v354_v3, %v355_v49  ;;  %v3621_v47 = vsel %vm329_vm3, %v357_v63, %v358_v45  ;;  %v372_v6 = vrot.slane %v3466_v58, 2 }
  0x4e   :  { %2443 = vrot.lane.b32.xlu2 %v3550_v39, %s3035_s26  ;;  %192 = vst.msk [vmem:[#allocation2 + $0x81] sm:$0xff] %vm142_vm0, %v133_v11  ;;  %v3617_v16 = vsel %vm329_vm3, %v363_v26, %v364_v42  ;;  %v2447_v11 = vpack.i.bf16 %v3621_v47, %v356_v20  ;;  %v376_v35 = vrot.slane %v3482_v5, 2  ;;  %v2472_v38 = vpack.i.bf16 %v3373_v56, %v3435_v43  ;;  %v220_v20 = vld [vmem:[#allocation2 + $0x98] sm:$0x3] }
  0x4f   :  { %v3627_v52 = vpack.i.bf16 %v3617_v16, %v3614_v28  ;;  %v3640_v14 = vsel %vm329_vm3, %v372_v6, %v373_v31  ;;  %v2467_v60 = vpack.i.bf16 %v3394_v13, %v3389_v9  ;;  %v2487_v41 = vpack.i.bf16 %v3363_v44, %v3142_v19 }
  0x50   :  { %v3643_v46 = vsel %vm329_vm3, %v375_v32, %v376_v35  ;;  %v2477_v26 = vpack.i.bf16 %v3421_v33, %v3380_v62  ;;  %v2557_v22 = vpack.i.bf16 %v3446_v48, %v3403_v23  ;;  %v2497_v49 = vpack.i.bf16 %v3466_v58, %v3492_v21 }
  0x51   :  { %v3649_v5 = vpack.i.bf16 %v3643_v46, %v3640_v14  ;;  %v2492_v45 = vpack.i.bf16 %v3488_v59, %v3407_v27  ;;  %v2517_v3 = vpack.i.bf16 %v3435_v43, %v3394_v13  ;;  %v2512_v63 = vpack.i.bf16 %v3577_v25, %v3474_v0 }
  0x52   :  { %v2507_v23 = vpack.i.bf16 %v3451_v51, %v3417_v30  ;;  %v2532_v48 = vpack.i.bf16 %v3392_v12, %v3460_v54  ;;  %v2542_v12 = vpack.i.bf16 %v3380_v62, %v3373_v56  ;;  %v2537_v30 = vpack.i.bf16 %v3571_v24, %v3580_v50 }
  0x53   :  { %2438 = vrot.lane.b32.xlu1 %v3587_v10, %s3035_s26  ;;  %v2562_v51 = vpack.i.bf16 %v3520_v61, %v3574_v53  ;;  %v2567_v24 = vpack.i.bf16 %v3425_v36, %v3421_v33  ;;  %v2592_v50 = vpack.i.bf16 %v3492_v21, %v3488_v59  ;;  %v2582_v25 = vpack.i.bf16 %v3508_v34, %v3432_v40 }
  0x54   :  { %2433 = vrot.lane.b32.xlu0 %v2432_v17, %s3035_s26  ;;  %v3659_v8 = vld [vmem:[#allocation2 + $0x120] sm:$0xff]  ;;  %v399_v6 = vrot.slane %v220_v20, 1 }
  0x55   :  { %v3655_v2 = vld [vmem:[#allocation2 + $0x80] sm:$0xff]  ;;  %v2502_v42 = vpack.i.bf16 %v3659_v8, %v3480_v4 }
  0x56   :  { %2458 = vrot.lane.b32.xlu2 %v3607_v7, %s3035_s26  ;;  %v2482_v37 = vpack.i.bf16 %v3655_v2, %v3425_v36  ;;  %v382_v53 = vrot.slane %v3655_v2, 1  ;;  %v388_v31 = vrot.slane %v3655_v2, 2 }
  0x5b   :  { %2453 = vrot.lane.b32.xlu1 %v3627_v52, %s3035_s26 }
  0x5c   :  { %2448 = vrot.lane.b32.xlu0 %v2447_v11, %s3035_s26  ;;  %v5249_v11 = vld [vmem:[#allocation8_spill] sm:$0xff] }
  0x5e   :  { %2473 = vrot.lane.b32.xlu2 %v2472_v38, %s3036_s0  ;;  %v5250_v38 = vld [vmem:[#allocation14_spill] sm:$0xff] }
  0x63   :  { %2468 = vrot.lane.b32.xlu1 %v2467_v60, %s3036_s0 }
  0x64   :  { %2463 = vrot.lane.b32.xlu0 %v3649_v5, %s3035_s26 }
  0x66   :  { %2488 = vrot.lane.b32.xlu2 %v2487_v41, %s3036_s0 }
  0x6b   :  { %2483 = vrot.lane.b32.xlu1 %v2482_v37, %s3036_s0 }
  0x6c   :  { %2478 = vrot.lane.b32.xlu0 %v2477_v26, %s3036_s0 }
  0x6e   :  { %2503 = vrot.lane.b32.xlu2 %v2502_v42, %s3036_s0  ;;  %v5251_v42 = vld [vmem:[#allocation13_spill] sm:$0xff] }
  0x70   :  { %v3697_v54 = vpop.permute.xlu2 %2408 }
  0x73   :  { %2498 = vrot.lane.b32.xlu1 %v2497_v49, %s3036_s0 }
  0x74   :  { %2493 = vrot.lane.b32.xlu0 %v2492_v45, %s3036_s0  ;;  %v405_v45 = vrot.slane %v220_v20, 2 }
  0x76   :  { %2518 = vrot.lane.b32.xlu2 %v2517_v3, %s3037_s17  ;;  %v2637_v3 = vpack.i.bf16 %v3640_v14, %v3594_v18 }
  0x7b   :  { %2513 = vrot.lane.b32.xlu1 %v2512_v63, %s3038_s21 }
  0x7c   :  { %2508 = vrot.lane.b32.xlu0 %v2507_v23, %s3039_s22 }
  0x7e   :  { %2533 = vrot.lane.b32.xlu2 %v2532_v48, %s3039_s22 }
  0x83   :  { %2528 = vrot.lane.b32.xlu1 %v2432_v17, %s3040_s23  ;;  %v219_v17 = vld [vmem:[#allocation2 + $0x90] sm:$0xff] }
  0x84   :  { %2523 = vrot.lane.b32.xlu0 %v3478_v1, %s3041_s24  ;;  %v218_v1 = vld [vmem:[#allocation2 + $0x88] sm:$0x3]  ;;  %v2617_v26 = vpack.i.bf16 %v219_v17, %v3655_v2  ;;  %v404_v49 = vrot.slane %v219_v17, 2 }
  0x85   :  { %v383_v61 = vrot.slane %v218_v1, 1  ;;  %v389_v32 = vrot.slane %v218_v1, 2  ;;  %v5253_v1 = vld [vmem:[#allocation9_spill] sm:$0xff] }
  0x86   :  { %2548 = vrot.lane.b32.xlu2 %v3414_v29, %s3041_s24  ;;  %v5248_v29 = vmov 0.0   ;;  %v406_v23 = vsel %vm329_vm3, %v404_v49, %v405_v45  ;;  %v2411_v49 = vunpack.i.h.bf16 %v3697_v54 }
  0x87   :  { %1192 = vst.msk [vmem:[#allocation3] sm:$0xff] %vm810_vm4, %v5248_v29  ;;  %v390_v41 = vsel %vm329_vm3, %v388_v31, %v389_v32 }
  0x88   :  { %1195 = vst.msk [vmem:[#allocation3 + $0x10] sm:$0xff] %vm810_vm4, %v5248_v29 }
  0x89   :  { %1197 = vst.msk [vmem:[#allocation3 + $0x20] sm:$0xff] %vm810_vm4, %v5248_v29 }
  0x8a   :  { %1199 = vst.msk [vmem:[#allocation3 + $0x30] sm:$0xff] %vm810_vm4, %v5248_v29 }
  0x8b   :  { %2543 = vrot.lane.b32.xlu1 %v2542_v12, %s3037_s17  ;;  %1201 = vst.msk [vmem:[#allocation3 + $0x40] sm:$0xff] %vm810_vm4, %v5248_v29 }
  0x8c   :  { %2538 = vrot.lane.b32.xlu0 %v2537_v30, %s3038_s21  ;;  %1203 = vst.msk [vmem:[#allocation3 + $0x50] sm:$0xff] %vm810_vm4, %v5248_v29 }
  0x8d   :  { %1205 = vst.msk [vmem:[#allocation3 + $0x60] sm:$0xff] %vm810_vm4, %v5248_v29 }
  0x8e   :  { %2563 = vrot.lane.b32.xlu2 %v2562_v51, %s3038_s21  ;;  %1207 = vst.msk [vmem:[#allocation3 + $0x70] sm:$0xff] %vm810_vm4, %v5248_v29 }
  0x8f   :  { %1209 = vst.msk [vmem:[#allocation3 + $0x80] sm:$0xff] %vm810_vm4, %v5248_v29 }
  0x90   :  { %1211 = vst.msk [vmem:[#allocation3 + $0x90] sm:$0xff] %vm810_vm4, %v5248_v29 }
  0x91   :  { %1213 = vst.msk [vmem:[#allocation3 + $0xa0] sm:$0xff] %vm810_vm4, %v5248_v29 }
  0x92   :  { %1215 = vst.msk [vmem:[#allocation3 + $0xb0] sm:$0xff] %vm810_vm4, %v5248_v29 }
  0x93   :  { %2558 = vrot.lane.b32.xlu1 %v2557_v22, %s3039_s22  ;;  %1217 = vst.msk [vmem:[#allocation3 + $0xc0] sm:$0xff] %vm810_vm4, %v5248_v29  ;;  %v2612_v22 = vpack.i.bf16 %v390_v41, %v5251_v42  ;;  %v5256_v42 = vld [vmem:[#allocation6_spill] sm:$0xff] }
  0x94   :  { %2553 = vrot.lane.b32.xlu0 %v3587_v10, %s3040_s23  ;;  %1219 = vst.msk [vmem:[#allocation3 + $0xd0] sm:$0xff] %vm810_vm4, %v5248_v29 }
  0x95   :  { %1221 = vst.msk [vmem:[#allocation3 + $0xe0] sm:$0xff] %vm810_vm4, %v5248_v29 }
  0x96   :  { %2578 = vrot.lane.b32.xlu2 %v3550_v39, %s3040_s23  ;;  %v384_v39 = vsel %vm280_vm2, %v382_v53, %v383_v61  ;;  %1223 = vst.msk [vmem:[#allocation3 + $0xf0] sm:$0xff] %vm810_vm4, %v5248_v29  ;;  %v2627_v53 = vpack.i.bf16 %v406_v23, %v390_v41  ;;  %v385_v41 = vrot.slane %v3659_v8, 1 }
  0x97   :  { %1225 = vst.msk [vmem:[#allocation3 + $0x100] sm:$0xff] %vm810_vm4, %v5248_v29 }
  0x98   :  { %v3716_v0 = vpop.permute.xlu2 %2413  ;;  %1227 = vst.msk [vmem:[#allocation3 + $0x110] sm:$0xff] %vm810_vm4, %v5248_v29 }
  0x99   :  { %1229 = vst.msk [vmem:[#allocation3 + $0x120] sm:$0xff] %vm810_vm4, %v5248_v29 }
  0x9a   :  { %1231 = vst.msk [vmem:[#allocation3 + $0x130] sm:$0xff] %vm810_vm4, %v5248_v29 }
  0x9b   :  { %2573 = vrot.lane.b32.xlu1 %v3464_v55, %s3041_s24  ;;  %v2587_v55 = vpack.i.bf16 %v3591_v57, %v3617_v16  ;;  %v2607_v57 = vpack.i.bf16 %v384_v39, %v5249_v11  ;;  %v398_v16 = vrot.slane %v219_v17, 1  ;;  %1230 = vst.msk [vmem:[#allocation3 + $0x128] sm:$0x3] %vm1193_vm13, %v5248_v29 }
  0x9c   :  { %2568 = vrot.lane.b32.xlu0 %v2567_v24, %s3037_s17  ;;  %v5252_v24 = vld [vmem:[#allocation11_spill] sm:$0xff]  ;;  %1194 = vst.msk [vmem:[#allocation3 + $0x8] sm:$0x3] %vm1193_vm13, %v5248_v29 }
  0x9d   :  { %v400_v40 = vsel %vm280_vm2, %v398_v16, %v399_v6  ;;  %v3808_v16 = vld [vmem:[#allocation2 + $0x128] sm:$0x3]  ;;  %1196 = vst.msk [vmem:[#allocation3 + $0x18] sm:$0x3] %vm1193_vm13, %v5248_v29 }
  0x9e   :  { %2593 = vrot.lane.b32.xlu2 %v2592_v50, %s3037_s17  ;;  %v2622_v35 = vpack.i.bf16 %v400_v40, %v384_v39  ;;  %v2632_v50 = vpack.i.bf16 %v5253_v1, %v5252_v24  ;;  %1198 = vst.msk [vmem:[#allocation3 + $0x28] sm:$0x3] %vm1193_vm13, %v5248_v29 }
  0x9f   :  { %1200 = vst.msk [vmem:[#allocation3 + $0x38] sm:$0x3] %vm1193_vm13, %v5248_v29 }
  0xa0   :  { %v3746_v10 = vpop.permute.xlu2 %2428  ;;  %1202 = vst.msk [vmem:[#allocation3 + $0x48] sm:$0x3] %vm1193_vm13, %v5248_v29 }
  0xa1   :  { %1204 = vst.msk [vmem:[#allocation3 + $0x58] sm:$0x3] %vm1193_vm13, %v5248_v29 }
  0xa2   :  { %1206 = vst.msk [vmem:[#allocation3 + $0x68] sm:$0x3] %vm1193_vm13, %v5248_v29 }
  0xa3   :  { %2588 = vrot.lane.b32.xlu1 %v2587_v55, %s3038_s21  ;;  %1208 = vst.msk [vmem:[#allocation3 + $0x78] sm:$0x3] %vm1193_vm13, %v5248_v29 }
  0xa4   :  { %2583 = vrot.lane.b32.xlu0 %v2582_v25, %s3039_s22  ;;  %1210 = vst.msk [vmem:[#allocation3 + $0x88] sm:$0x3] %vm1193_vm13, %v5248_v29 }
  0xa5   :  { %1212 = vst.msk [vmem:[#allocation3 + $0x98] sm:$0x3] %vm1193_vm13, %v5248_v29 }
  0xa6   :  { %2608 = vrot.lane.b32.xlu2 %v2607_v57, %s3039_s22  ;;  %v2642_v57 = vpack.i.bf16 %v3480_v4, %v3466_v58  ;;  %1214 = vst.msk [vmem:[#allocation3 + $0xa8] sm:$0x3] %vm1193_vm13, %v5248_v29 }
  0xa7   :  { %1216 = vst.msk [vmem:[#allocation3 + $0xb8] sm:$0x3] %vm1193_vm13, %v5248_v29 }
  0xa8   :  { %v2444_v34 = vpop.permute.xlu2 %2443  ;;  %1218 = vst.msk [vmem:[#allocation3 + $0xc8] sm:$0x3] %vm1193_vm13, %v5248_v29 }
  0xa9   :  { %v2446_v48 = vunpack.i.h.bf16 %v2444_v34  ;;  %v2445_v12 = vunpack.i.l.bf16 %v2444_v34  ;;  %v2667_v34 = vpack.i.bf16 %v3407_v27, %v3363_v44  ;;  %1220 = vst.msk [vmem:[#allocation3 + $0xd8] sm:$0x3] %vm1193_vm13, %v5248_v29 }
  0xaa   :  { %1222 = vst.msk [vmem:[#allocation3 + $0xe8] sm:$0x3] %vm1193_vm13, %v5248_v29 }
  0xab   :  { %2603 = vrot.lane.b32.xlu1 %v3607_v7, %s3040_s23  ;;  %1224 = vst.msk [vmem:[#allocation3 + $0xf8] sm:$0x3] %vm1193_vm13, %v5248_v29 }
  0xac   :  { %2598 = vrot.lane.b32.xlu0 %v5250_v38, %s3041_s24  ;;  %v5254_v38 = vld [vmem:[#allocation12_spill] sm:$0xff]  ;;  %1226 = vst.msk [vmem:[#allocation3 + $0x108] sm:$0x3] %vm1193_vm13, %v5248_v29 }
  0xad   :  { %v2399_v60 = vpop.permute.xlu1 %2398  ;;  %1228 = vst.msk [vmem:[#allocation3 + $0x118] sm:$0x3] %vm1193_vm13, %v5248_v29 }
  0xae   :  { %v3773_v37 = vpop.permute.xlu0 %2388  ;;  %2623 = vrot.lane.b32.xlu2 %v2622_v35, %s3041_s24  ;;  %v2401_v32 = vunpack.i.h.bf16 %v2399_v60  ;;  %v2400_v35 = vunpack.i.l.bf16 %v2399_v60  ;;  %1232 = vst.msk [vmem:[#allocation3 + $0x138] sm:$0x3] %vm1193_vm13, %v5248_v29 }
  0xb0   :  { %v2459_v7 = vpop.permute.xlu2 %2458  ;;  %v799_v60 = vsel %vm142_vm0, %v3380_v62, %v2401_v32  ;;  %v2415_v62 = vunpack.i.l.bf16 %v3716_v0 }
  0xb1   :  { %v2461_v17 = vunpack.i.h.bf16 %v2459_v7 }
  0xb3   :  { %2618 = vrot.lane.b32.xlu1 %v2617_v26, %s3037_s17  ;;  %v5255_v26 = vld [vmem:[#allocation4_spill] sm:$0xff] }
  0xb4   :  { %2613 = vrot.lane.b32.xlu0 %v2612_v22, %s3038_s21  ;;  %v2657_v22 = vpack.i.bf16 %v5256_v42, %v5255_v26 }
  0xb5   :  { %v2404_v63 = vpop.permute.xlu1 %2403 }
  0xb6   :  { %v2406_v30 = vunpack.i.h.bf16 %v2404_v63  ;;  %v2405_v51 = vunpack.i.l.bf16 %v2404_v63  ;;  %v3783_v2 = vpop.permute.xlu0 %2393  ;;  %2638 = vrot.lane.b32.xlu2 %v2637_v3, %s3038_s21  ;;  %v798_v63 = vsel %vm142_vm0, %v3373_v56, %v2400_v35 }
  0xb8   :  { %v801_v18 = vsel %vm142_vm0, %v3425_v36, %v2406_v30  ;;  %v800_v14 = vsel %vm142_vm0, %v3421_v33, %v2405_v51  ;;  %v3802_v25 = vpop.permute.xlu2 %2473  ;;  %v2460_v36 = vunpack.i.l.bf16 %v2459_v7  ;;  %v2410_v30 = vunpack.i.l.bf16 %v3697_v54 }
  0xb9   :  { %v3793_v61 = vsel %vm810_vm4, %v800_v14, %v2445_v12  ;;  %v3796_v55 = vsel %vm810_vm4, %v801_v18, %v2446_v48  ;;  %v2662_v48 = vpack.i.bf16 %v3614_v28, %v3621_v47  ;;  %v2416_v51 = vunpack.i.h.bf16 %v3716_v0  ;;  %v245_v18 = vld [vmem:[%s5216_s1 + $0x10] sm:$0x3] }
  0xba   :  { %v803_v28 = vsel %vm142_vm0, %v3142_v19, %v2411_v49  ;;  %v802_v47 = vsel %vm142_vm0, %v3126_v15, %v2410_v30  ;;  %v804_v0 = vsel %vm142_vm0, %v3363_v44, %v2415_v62 }
  0xbb   :  { %2633 = vrot.lane.b32.xlu1 %v2632_v50, %s3039_s22  ;;  %v5257_v50 = vld [vmem:[#allocation10_spill] sm:$0xff]  ;;  %v805_v54 = vsel %vm142_vm0, %v3407_v27, %v2416_v51 }
  0xbc   :  { %2628 = vrot.lane.b32.xlu0 %v2627_v53, %s3040_s23  ;;  %v946_v53 = vunpack.c.l.b16 %v245_v18 }
  0xbd   :  { %v3800_v39 = vpop.permute.xlu1 %2423 }
  0xbe   :  { %v2419_v20 = vpop.permute.xlu0 %2418  ;;  %2653 = vrot.lane.b32.xlu2 %v3649_v5, %s3040_s23 }
  0xbf   :  { %v2421_v33 = vunpack.i.h.bf16 %v2419_v20  ;;  %v2420_v11 = vunpack.i.l.bf16 %v2419_v20 }
  0xc0   :  { %v2489_v23 = vpop.permute.xlu2 %2488 }
  0xc1   :  { %v807_v6 = vsel %vm142_vm0, %v3492_v21, %v2421_v33  ;;  %v806_v40 = vsel %vm142_vm0, %v3488_v59, %v2420_v11  ;;  %v386_v21 = vrot.slane %v3808_v16, 1  ;;  %v2491_v15 = vunpack.i.h.bf16 %v2489_v23  ;;  %v239_v11 = vld [vmem:[#allocation2 + $0x130] sm:$0xff] }
  0xc2   :  { %v3817_v31 = vsel %vm810_vm4, %v806_v40, %v2460_v36  ;;  %v3820_v5 = vsel %vm810_vm4, %v807_v6, %v2461_v17  ;;  %v2490_v17 = vunpack.i.l.bf16 %v2489_v23  ;;  %v401_v44 = vrot.slane %v239_v11, 1 }
  0xc3   :  { %2648 = vrot.lane.b32.xlu1 %v5254_v38, %s3041_s24  ;;  %v387_v12 = vsel %vm280_vm2, %v385_v41, %v386_v21  ;;  %v391_v38 = vrot.slane %v3659_v8, 2  ;;  %v392_v41 = vrot.slane %v3808_v16, 2  ;;  %v240_v21 = vld [vmem:[#allocation2 + $0x138] sm:$0x3]  ;;  %v2425_v16 = vunpack.i.l.bf16 %v3800_v39 }
  0xc4   :  { %2643 = vrot.lane.b32.xlu0 %v2642_v57, %s3037_s17  ;;  %v2682_v56 = vpack.i.bf16 %v387_v12, %v5257_v50  ;;  %v949_v57 = vpack.c.b16 %v946_v53, %v946_v53  ;;  %v402_v26 = vrot.slane %v240_v21, 1  ;;  %v407_v18 = vrot.slane %v239_v11, 2 }
  0xc5   :  { %v2439_v59 = vpop.permute.xlu1 %2438 }
  0xc6   :  { %v2441_v45 = vunpack.i.h.bf16 %v2439_v59  ;;  %v2440_v3 = vunpack.i.l.bf16 %v2439_v59  ;;  %v3830_v7 = vpop.permute.xlu0 %2433  ;;  %2668 = vrot.lane.b32.xlu2 %v2667_v34, %s3037_s17  ;;  %v979_v59 = vsel %vm977_vm6, %v949_v57, 0  ;;  %vm1960_vm6 = vcmask 523264  }
  0xc7   :  { %986 = vmatpush.bf16.msra.mxu0 %v979_v59  ;;  %2366 = vmatpush.bf16.msra.mxu3 %v979_v59  ;;  %v5259_v59 = vld [vmem:[#allocation5_spill] sm:$0xff] }
  0xc8   :  { %v3843_v24 = vsel %vm810_vm4, %v798_v63, %v2440_v3  ;;  %v3846_v1 = vsel %vm810_vm4, %v799_v60, %v2441_v45  ;;  %v2504_v34 = vpop.permute.xlu2 %2503  ;;  %v2426_v45 = vunpack.i.h.bf16 %v3800_v39  ;;  %v5258_v3 = vld [vmem:[#allocation7_spill] sm:$0xff]  ;;  %v403_v60 = vsel %vm280_vm2, %v401_v44, %v402_v26 }
  0xc9   :  { %v2697_v23 = vpack.i.bf16 %v403_v60, %v387_v12  ;;  %v2505_v30 = vunpack.i.l.bf16 %v2504_v34  ;;  %v2360_v12 = vld [vmem:[%s5216_s1] sm:$0xff] }
  0xca   :  { %v809_v39 = vsel %vm142_vm0, %v3480_v4, %v2426_v45 }
  0xcb   :  { %2663 = vrot.lane.b32.xlu1 %v2662_v48, %s3038_s21  ;;  %v2506_v48 = vunpack.i.h.bf16 %v2504_v34 }
  0xcc   :  { %2658 = vrot.lane.b32.xlu0 %v2657_v22, %s3039_s22  ;;  %v2361_v22 = vld [vmem:[%s5216_s1 + $0x8] sm:$0xff] }
  0xcd   :  { %v2454_v14 = vpop.permute.xlu1 %2453  ;;  %987 = vmatpush.bf16.msra.mxu0 %v2361_v22  ;;  %2367 = vmatpush.bf16.msra.mxu3 %v2361_v22 }
  0xce   :  { %v2456_v19 = vunpack.i.h.bf16 %v2454_v14  ;;  %v2455_v36 = vunpack.i.l.bf16 %v2454_v14  ;;  %v2449_v20 = vpop.permute.xlu0 %2448  ;;  %2683 = vrot.lane.b32.xlu2 %v2682_v56, %s3039_s22  ;;  %v2692_v56 = vpack.i.bf16 %v239_v11, %v3659_v8 }
  0xcf   :  { %v2451_v27 = vunpack.i.h.bf16 %v2449_v20  ;;  %v2450_v33 = vunpack.i.l.bf16 %v2449_v20 }
  0xd0   :  { %v3865_v6 = vsel %vm810_vm4, %v805_v54, %v2456_v19  ;;  %v3868_v40 = vsel %vm810_vm4, %v804_v0, %v2455_v36  ;;  %v408_v0 = vrot.slane %v240_v21, 2 }
  0xd1   :  { %v820_v32 = vsel %vm810_vm4, %v803_v28, %v2451_v27  ;;  %v819_v35 = vsel %vm810_vm4, %v802_v47, %v2450_v33  ;;  %v808_v28 = vsel %vm142_vm0, %v3466_v58, %v2425_v16  ;;  %v2519_v58 = vpop.permute.xlu2 %2518  ;;  %988 = vmatpush.bf16.msra.mxu0 %v2360_v12  ;;  %2368 = vmatpush.bf16.msra.mxu3 %v2360_v12 }
  0xd2   :  { %v3875_v42 = vsel %vm827_vm5, %v819_v35, %v2490_v17  ;;  %v3883_v49 = vsel %vm827_vm5, %v820_v32, %v2491_v15  ;;  %v409_v53 = vsel %vm329_vm3, %v407_v18, %v408_v0  ;;  %v2390_v35 = vunpack.i.l.bf16 %v3773_v37 }
  0xd3   :  { %2678 = vrot.lane.b32.xlu1 %v3627_v52, %s3040_s23  ;;  %v393_v52 = vsel %vm329_vm3, %v391_v38, %v392_v41  ;;  %v2431_v38 = vunpack.i.h.bf16 %v3746_v10  ;;  %v2430_v41 = vunpack.i.l.bf16 %v3746_v10  ;;  %v2396_v18 = vunpack.i.h.bf16 %v3783_v2 }
  0xd4   :  { %2673 = vrot.lane.b32.xlu0 %v5258_v3, %s3041_s24  ;;  %v2687_v47 = vpack.i.bf16 %v393_v52, %v3643_v46  ;;  %v2702_v27 = vpack.i.bf16 %v409_v53, %v393_v52  ;;  %v794_v26 = vsel %vm142_vm0, %v5259_v59, %v2390_v35  ;;  %v2395_v0 = vunpack.i.l.bf16 %v3783_v2 }
  0xd5   :  { %v2469_v63 = vpop.permute.xlu1 %2468  ;;  %v2436_v53 = vunpack.i.h.bf16 %v3830_v7 }
  0xd6   :  { %v2464_v51 = vpop.permute.xlu0 %2463  ;;  %2698 = vrot.lane.b32.xlu2 %v2697_v23, %s3041_s24  ;;  %v2470_v22 = vunpack.i.l.bf16 %v2469_v63  ;;  %v796_v35 = vsel %vm142_vm0, %v3394_v13, %v2395_v0 }
  0xd7   :  { %v2466_v62 = vunpack.i.h.bf16 %v2464_v51  ;;  %v2465_v50 = vunpack.i.l.bf16 %v2464_v51  ;;  %v2521_v51 = vunpack.i.h.bf16 %v2519_v58 }
  0xd9   :  { %v826_v54 = vsel %vm810_vm4, %v809_v39, %v2466_v62  ;;  %v825_v8 = vsel %vm810_vm4, %v808_v28, %v2465_v50  ;;  %v3923_v33 = vpop.permute.xlu2 %2533  ;;  %v2520_v62 = vunpack.i.l.bf16 %v2519_v58 }
  0xda   :  { %v3904_v14 = vsel %vm827_vm5, %v825_v8, %v2505_v30  ;;  %v3907_v4 = vsel %vm827_vm5, %v826_v54, %v2506_v48  ;;  %v2536_v59 = vunpack.i.h.bf16 %v3923_v33 }
  0xdb   :  { %2693 = vrot.lane.b32.xlu1 %v2692_v56, %s3037_s17 }
  0xdc   :  { %2688 = vrot.lane.b32.xlu0 %v2687_v47, %s3038_s21 }
  0xdd   :  { %v2484_v46 = vpop.permute.xlu1 %2483 }
  0xde   :  { %v2486_v17 = vunpack.i.h.bf16 %v2484_v46  ;;  %v2485_v19 = vunpack.i.l.bf16 %v2484_v46  ;;  %v3912_v36 = vpop.permute.xlu0 %2478 }
  0xe0   :  { %v3916_v20 = vsel %vm827_vm5, %v3793_v61, %v2485_v19  ;;  %v3920_v15 = vsel %vm827_vm5, %v3796_v55, %v2486_v17  ;;  %v2391_v55 = vunpack.i.h.bf16 %v3773_v37  ;;  %v811_v37 = vsel %vm810_vm4, %v794_v26, %v2430_v41 }
  0xe1   :  { %v828_v10 = vsel %vm827_vm5, %v811_v37, %v2470_v22  ;;  %v2435_v17 = vunpack.i.l.bf16 %v3830_v7  ;;  %v2476_v7 = vunpack.i.h.bf16 %v3802_v25  ;;  %v2535_v26 = vunpack.i.l.bf16 %v3923_v33 }
  0xe2   :  { %v795_v21 = vsel %vm142_vm0, %v3389_v9, %v2391_v55  ;;  %v797_v55 = vsel %vm142_vm0, %v3435_v43, %v2396_v18 }
  0xe3   :  { %v812_v52 = vsel %vm810_vm4, %v795_v21, %v2431_v38  ;;  %v2475_v38 = vunpack.i.l.bf16 %v3802_v25  ;;  %v813_v41 = vsel %vm810_vm4, %v796_v35, %v2435_v17  ;;  %v814_v21 = vsel %vm810_vm4, %v797_v55, %v2436_v53 }
  0xe4   :  { %2703 = vrot.lane.b32.xlu0 %v2702_v27, %s3040_s23 }
  0xe5   :  { %v2499_v11 = vpop.permute.xlu1 %2498  ;;  %v830_v13 = vsel %vm827_vm5, %v813_v41, %v2475_v38 }
  0xe6   :  { %v2501_v57 = vunpack.i.h.bf16 %v2499_v11  ;;  %v2500_v44 = vunpack.i.l.bf16 %v2499_v11  ;;  %v3925_v34 = vpop.permute.xlu0 %2493  ;;  %v847_v25 = vsel %vm844_vm7, %v830_v13, %v2535_v26 }
  0xe8   :  { %v3929_v32 = vsel %vm827_vm5, %v3817_v31, %v2500_v44  ;;  %v3933_v61 = vsel %vm827_vm5, %v3820_v5, %v2501_v57  ;;  %v2471_v31 = vunpack.i.h.bf16 %v2469_v63  ;;  %v3943_v5 = vpop.permute.xlu2 %2548 }
  0xea   :  { %v829_v9 = vsel %vm827_vm5, %v812_v52, %v2471_v31 }
  0xed   :  { %v2514_v45 = vpop.permute.xlu1 %2513 }
  0xee   :  { %v2509_v16 = vpop.permute.xlu0 %2508  ;;  %v2516_v23 = vunpack.i.h.bf16 %v2514_v45  ;;  %v2515_v48 = vunpack.i.l.bf16 %v2514_v45 }
  0xef   :  { %v2511_v3 = vunpack.i.h.bf16 %v2509_v16  ;;  %v2510_v60 = vunpack.i.l.bf16 %v2509_v16  ;;  %v831_v16 = vsel %vm827_vm5, %v814_v21, %v2476_v7 }
  0xf0   :  { %v3959_v19 = vpop.permute.xlu2 %2563 }
  0xf1   :  { %v845_v63 = vsel %vm844_vm7, %v828_v10, %v2510_v60  ;;  %v846_v30 = vsel %vm844_vm7, %v829_v9, %v2511_v3  ;;  %v848_v3 = vsel %vm844_vm7, %v831_v16, %v2536_v59  ;;  %v2551_v9 = vunpack.i.h.bf16 %v3943_v5 }
  0xf2   :  { %v862_v50 = vsel %vm861_vm8, %v845_v63, %v2515_v48  ;;  %v863_v56 = vsel %vm861_vm8, %v846_v30, %v2516_v23  ;;  %v2550_v23 = vunpack.i.l.bf16 %v3943_v5 }
  0xf3   :  { %v879_v46 = vsel %vm878_vm9, %v862_v50, %v2520_v62  ;;  %v880_v58 = vsel %vm878_vm9, %v863_v56, %v2521_v51  ;;  %v2481_v56 = vunpack.i.h.bf16 %v3912_v36 }
  0xf5   :  { %v2529_v39 = vpop.permute.xlu1 %2528  ;;  %v833_v0 = vsel %vm827_vm5, %v3846_v1, %v2481_v56 }
  0xf6   :  { %v2531_v28 = vunpack.i.h.bf16 %v2529_v39  ;;  %v2530_v47 = vunpack.i.l.bf16 %v2529_v39  ;;  %v2524_v12 = vpop.permute.xlu0 %2523  ;;  %v2480_v39 = vunpack.i.l.bf16 %v3912_v36  ;;  %v2565_v36 = vunpack.i.l.bf16 %v3959_v19 }
  0xf7   :  { %v2526_v54 = vunpack.i.h.bf16 %v2524_v12  ;;  %v2525_v8 = vunpack.i.l.bf16 %v2524_v12 }
  0xf8   :  { %v2579_v10 = vpop.permute.xlu2 %2578 }
  0xf9   :  { %v896_v27 = vsel %vm895_vm10, %v879_v46, %v2525_v8  ;;  %v897_v11 = vsel %vm895_vm10, %v880_v58, %v2526_v54  ;;  %v832_v46 = vsel %vm827_vm5, %v3843_v24, %v2480_v39  ;;  %v2566_v58 = vunpack.i.h.bf16 %v3959_v19 }
  0xfa   :  { %v913_v57 = vsel %vm912_vm11, %v896_v27, %v2530_v47  ;;  %v914_v44 = vsel %vm912_vm11, %v897_v11, %v2531_v28  ;;  %v2581_v55 = vunpack.i.h.bf16 %v2579_v10  ;;  %v2580_v1 = vunpack.i.l.bf16 %v2579_v10 }
  0xfb   :  { %v929_v2 = vpack.c.bf16 %v914_v44, %v913_v57 }
  0xfd   :  { %2328 = vmatmul.msk.bf16.vlgmr.msra.gmra.mxu0 %vm952_vm12, %v929_v2  ;;  %v2544_v31 = vpop.permute.xlu1 %2543 }
  0xfe   :  { %v2539_v22 = vpop.permute.xlu0 %2538  ;;  %v2546_v60 = vunpack.i.h.bf16 %v2544_v31  ;;  %v2545_v37 = vunpack.i.l.bf16 %v2544_v31 }
  0xff   :  { %v2541_v43 = vunpack.i.h.bf16 %v2539_v22  ;;  %v2540_v45 = vunpack.i.l.bf16 %v2539_v22 }
 0x100   :  { %v2594_v53 = vpop.permute.xlu2 %2593 }
 0x101   :  { %v864_v52 = vsel %vm861_vm8, %v847_v25, %v2540_v45  ;;  %v865_v33 = vsel %vm861_vm8, %v848_v3, %v2541_v43  ;;  %v2496_v43 = vunpack.i.h.bf16 %v3925_v34  ;;  %v2495_v45 = vunpack.i.l.bf16 %v3925_v34 }
 0x102   :  { %v881_v48 = vsel %vm878_vm9, %v864_v52, %v2545_v37  ;;  %v882_v63 = vsel %vm878_vm9, %v865_v33, %v2546_v60 }
 0x103   :  { %v898_v28 = vsel %vm895_vm10, %v881_v48, %v2550_v23  ;;  %v899_v47 = vsel %vm895_vm10, %v882_v63, %v2551_v9  ;;  %v839_v37 = vsel %vm827_vm5, %v3865_v6, %v2496_v43  ;;  %v838_v52 = vsel %vm827_vm5, %v3868_v40, %v2495_v45 }
 0x104   :  { %v2596_v48 = vunpack.i.h.bf16 %v2594_v53  ;;  %v2595_v63 = vunpack.i.l.bf16 %v2594_v53  ;;  %vm1943_vm5 = vcmask 457728  }
 0x105   :  { %v2559_v30 = vpop.permute.xlu1 %2558 }
 0x106   :  { %v2554_v51 = vpop.permute.xlu0 %2553  ;;  %v2561_v12 = vunpack.i.h.bf16 %v2559_v30  ;;  %v2560_v54 = vunpack.i.l.bf16 %v2559_v30 }
 0x107   :  { %v2556_v62 = vunpack.i.h.bf16 %v2554_v51  ;;  %v2555_v50 = vunpack.i.l.bf16 %v2554_v51 }
 0x108   :  { %v849_v17 = vsel %vm844_vm7, %v832_v46, %v2560_v54  ;;  %v850_v27 = vsel %vm844_vm7, %v833_v0, %v2561_v12  ;;  %v2609_v25 = vpop.permute.xlu2 %2608 }
 0x109   :  { %v915_v5 = vsel %vm912_vm11, %v898_v28, %v2555_v50  ;;  %v916_v8 = vsel %vm912_vm11, %v899_v47, %v2556_v62  ;;  %v866_v24 = vsel %vm861_vm8, %v849_v17, %v2565_v36  ;;  %v867_v38 = vsel %vm861_vm8, %v850_v27, %v2566_v58 }
 0x10a   :  { %v930_v18 = vpack.c.bf16 %v916_v8, %v915_v5  ;;  %v2611_v0 = vunpack.i.h.bf16 %v2609_v25  ;;  %v2610_v46 = vunpack.i.l.bf16 %v2609_v25 }
 0x10c   :  { %v851_v27 = vsel %vm844_vm7, %v3916_v20, %v2610_v46 }
 0x10d   :  { %2329 = vmatmul.msk.bf16.gmra.mxu0 %vm952_vm12, %v930_v18  ;;  %v2574_v11 = vpop.permute.xlu1 %2573 }
 0x10e   :  { %v2576_v57 = vunpack.i.h.bf16 %v2574_v11  ;;  %v2575_v44 = vunpack.i.l.bf16 %v2574_v11  ;;  %v2569_v2 = vpop.permute.xlu0 %2568  ;;  %v852_v11 = vsel %vm844_vm7, %v3920_v15, %v2611_v0 }
 0x10f   :  { %v2571_v35 = vunpack.i.h.bf16 %v2569_v2  ;;  %v2570_v7 = vunpack.i.l.bf16 %v2569_v2 }
 0x110   :  { %v2624_v47 = vpop.permute.xlu2 %2623 }
 0x111   :  { %v883_v19 = vsel %vm878_vm9, %v866_v24, %v2570_v7  ;;  %v884_v41 = vsel %vm878_vm9, %v867_v38, %v2571_v35  ;;  %v2626_v35 = vunpack.i.h.bf16 %v2624_v47  ;;  %v2625_v7 = vunpack.i.l.bf16 %v2624_v47 }
 0x112   :  { %v900_v21 = vsel %vm895_vm10, %v883_v19, %v2575_v44  ;;  %v901_v59 = vsel %vm895_vm10, %v884_v41, %v2576_v57 }
 0x113   :  { %v917_v26 = vsel %vm912_vm11, %v900_v21, %v2580_v1  ;;  %v918_v31 = vsel %vm912_vm11, %v901_v59, %v2581_v55 }
 0x114   :  { %v931_v22 = vpack.c.bf16 %v918_v31, %v917_v26 }
 0x115   :  { %v2589_v13 = vpop.permute.xlu1 %2588 }
 0x116   :  { %v2584_v16 = vpop.permute.xlu0 %2583  ;;  %v2591_v33 = vunpack.i.h.bf16 %v2589_v13  ;;  %v2590_v10 = vunpack.i.l.bf16 %v2589_v13 }
 0x117   :  { %v2586_v3 = vunpack.i.h.bf16 %v2584_v16  ;;  %v2585_v60 = vunpack.i.l.bf16 %v2584_v16 }
 0x118   :  { %v2639_v1 = vpop.permute.xlu2 %2638 }
 0x119   :  { %v855_v9 = vsel %vm844_vm7, %v838_v52, %v2585_v60  ;;  %v856_v23 = vsel %vm844_vm7, %v839_v37, %v2586_v3  ;;  %v2641_v13 = vunpack.i.h.bf16 %v2639_v1  ;;  %v2640_v16 = vunpack.i.l.bf16 %v2639_v1 }
 0x11a   :  { %v872_v34 = vsel %vm861_vm8, %v855_v9, %v2590_v10  ;;  %v873_v30 = vsel %vm861_vm8, %v856_v23, %v2591_v33 }
 0x11b   :  { %v889_v39 = vsel %vm878_vm9, %v872_v34, %v2595_v63  ;;  %v890_v28 = vsel %vm878_vm9, %v873_v30, %v2596_v48 }
 0x11d   :  { %2330 = vmatmul.msk.bf16.gmra.mxu0 %vm952_vm12, %v931_v22  ;;  %v2604_v51 = vpop.permute.xlu1 %2603 }
 0x11e   :  { %v2606_v62 = vunpack.i.h.bf16 %v2604_v51  ;;  %v2605_v6 = vunpack.i.l.bf16 %v2604_v51  ;;  %v2599_v50 = vpop.permute.xlu0 %2598 }
 0x11f   :  { %v2601_v56 = vunpack.i.h.bf16 %v2599_v50  ;;  %v2600_v40 = vunpack.i.l.bf16 %v2599_v50 }
 0x120   :  { %v2654_v25 = vpop.permute.xlu2 %2653 }
 0x121   :  { %v906_v12 = vsel %vm895_vm10, %v889_v39, %v2600_v40  ;;  %v907_v54 = vsel %vm895_vm10, %v890_v28, %v2601_v56  ;;  %v2656_v9 = vunpack.i.h.bf16 %v2654_v25  ;;  %v2655_v23 = vunpack.i.l.bf16 %v2654_v25 }
 0x122   :  { %v923_v5 = vsel %vm912_vm11, %v906_v12, %v2605_v6  ;;  %v924_v8 = vsel %vm912_vm11, %v907_v54, %v2606_v62 }
 0x123   :  { %v934_v18 = vpack.c.bf16 %v924_v8, %v923_v5 }
 0x125   :  { %2333 = vmatmul.msk.bf16.vlgmr.msra.gmra.mxu3 %vm952_vm12, %v934_v18  ;;  %v2619_v58 = vpop.permute.xlu1 %2618 }
 0x126   :  { %v2614_v36 = vpop.permute.xlu0 %2613  ;;  %v2621_v57 = vunpack.i.h.bf16 %v2619_v58  ;;  %v2620_v44 = vunpack.i.l.bf16 %v2619_v58 }
 0x127   :  { %v2616_v53 = vunpack.i.h.bf16 %v2614_v36  ;;  %v2615_v17 = vunpack.i.l.bf16 %v2614_v36 }
 0x128   :  { %v2669_v28 = vpop.permute.xlu2 %2668 }
 0x129   :  { %v869_v2 = vsel %vm861_vm8, %v852_v11, %v2616_v53  ;;  %v868_v55 = vsel %vm861_vm8, %v851_v27, %v2615_v17  ;;  %v2671_v0 = vunpack.i.h.bf16 %v2669_v28  ;;  %v2670_v46 = vunpack.i.l.bf16 %v2669_v28 }
 0x12a   :  { %v886_v24 = vsel %vm878_vm9, %v869_v2, %v2621_v57  ;;  %v885_v38 = vsel %vm878_vm9, %v868_v55, %v2620_v44 }
 0x12b   :  { %v902_v59 = vsel %vm895_vm10, %v885_v38, %v2625_v7  ;;  %v903_v15 = vsel %vm895_vm10, %v886_v24, %v2626_v35 }
 0x12d   :  { %v2634_v19 = vpop.permute.xlu1 %2633 }
 0x12e   :  { %v2629_v41 = vpop.permute.xlu0 %2628  ;;  %v2636_v26 = vunpack.i.h.bf16 %v2634_v19  ;;  %v2635_v31 = vunpack.i.l.bf16 %v2634_v19 }
 0x12f   :  { %v2631_v21 = vunpack.i.h.bf16 %v2629_v41  ;;  %v2630_v20 = vunpack.i.l.bf16 %v2629_v41 }
 0x130   :  { %v857_v3 = vsel %vm844_vm7, %v3929_v32, %v2635_v31  ;;  %v858_v60 = vsel %vm844_vm7, %v3933_v61, %v2636_v26 }
 0x131   :  { %v919_v22 = vsel %vm912_vm11, %v902_v59, %v2630_v20  ;;  %v920_v43 = vsel %vm912_vm11, %v903_v15, %v2631_v21  ;;  %v874_v34 = vsel %vm861_vm8, %v857_v3, %v2640_v16  ;;  %v875_v30 = vsel %vm861_vm8, %v858_v60, %v2641_v13 }
 0x132   :  { %v932_v45 = vpack.c.bf16 %v920_v43, %v919_v22 }
 0x134   :  { %2331 = vmatmul.msk.bf16.gmra.mxu0 %vm952_vm12, %v932_v45 }
 0x135   :  { %v2649_v37 = vpop.permute.xlu1 %2648 }
 0x136   :  { %v2644_v52 = vpop.permute.xlu0 %2643  ;;  %v2651_v33 = vunpack.i.h.bf16 %v2649_v37  ;;  %v2650_v10 = vunpack.i.l.bf16 %v2649_v37 }
 0x137   :  { %v2646_v48 = vunpack.i.h.bf16 %v2644_v52  ;;  %v2645_v63 = vunpack.i.l.bf16 %v2644_v52 }
 0x139   :  { %v891_v51 = vsel %vm878_vm9, %v874_v34, %v2645_v63  ;;  %v892_v62 = vsel %vm878_vm9, %v875_v30, %v2646_v48 }
 0x13a   :  { %v908_v32 = vsel %vm895_vm10, %v891_v51, %v2650_v10  ;;  %v909_v61 = vsel %vm895_vm10, %v892_v62, %v2651_v33 }
 0x13b   :  { %v925_v6 = vsel %vm912_vm11, %v908_v32, %v2655_v23  ;;  %v926_v50 = vsel %vm912_vm11, %v909_v61, %v2656_v9 }
 0x13c   :  { %v935_v56 = vpack.c.bf16 %v926_v50, %v925_v6 }
 0x13d   :  { %v2664_v40 = vpop.permute.xlu1 %2663 }
 0x13e   :  { %v2659_v39 = vpop.permute.xlu0 %2658  ;;  %2334 = vmatmul.msk.bf16.gmra.mxu3 %vm952_vm12, %v935_v56  ;;  %v2666_v54 = vunpack.i.h.bf16 %v2664_v40  ;;  %v2665_v5 = vunpack.i.l.bf16 %v2664_v40 }
 0x13f   :  { %v2661_v47 = vunpack.i.h.bf16 %v2659_v39  ;;  %v2660_v12 = vunpack.i.l.bf16 %v2659_v39 }
 0x141   :  { %v853_v8 = vsel %vm844_vm7, %v3875_v42, %v2660_v12  ;;  %v854_v18 = vsel %vm844_vm7, %v3883_v49, %v2661_v47  ;;  %v2684_v42 = vpop.permute.xlu2 %2683 }
 0x142   :  { %v870_v58 = vsel %vm861_vm8, %v853_v8, %v2665_v5  ;;  %v871_v36 = vsel %vm861_vm8, %v854_v18, %v2666_v54  ;;  %v2686_v38 = vunpack.i.h.bf16 %v2684_v42  ;;  %v2685_v19 = vunpack.i.l.bf16 %v2684_v42 }
 0x143   :  { %v887_v2 = vsel %vm878_vm9, %v870_v58, %v2670_v46  ;;  %v888_v55 = vsel %vm878_vm9, %v871_v36, %v2671_v0 }
 0x144   :  { %v859_v15 = vsel %vm844_vm7, %v3904_v14, %v2685_v19  ;;  %v860_v26 = vsel %vm844_vm7, %v3907_v4, %v2686_v38 }
 0x145   :  { %v2679_v53 = vpop.permute.xlu1 %2678 }
 0x146   :  { %v2674_v17 = vpop.permute.xlu0 %2673  ;;  %v2681_v27 = vunpack.i.h.bf16 %v2679_v53  ;;  %v2680_v11 = vunpack.i.l.bf16 %v2679_v53 }
 0x147   :  { %v2676_v57 = vunpack.i.h.bf16 %v2674_v17  ;;  %v2675_v44 = vunpack.i.l.bf16 %v2674_v17 }
 0x149   :  { %v904_v1 = vsel %vm895_vm10, %v887_v2, %v2675_v44  ;;  %v905_v49 = vsel %vm895_vm10, %v888_v55, %v2676_v57  ;;  %v2699_v43 = vpop.permute.xlu2 %2698 }
 0x14a   :  { %v921_v35 = vsel %vm912_vm11, %v904_v1, %v2680_v11  ;;  %v922_v7 = vsel %vm912_vm11, %v905_v49, %v2681_v27  ;;  %v2701_v16 = vunpack.i.h.bf16 %v2699_v43  ;;  %v2700_v25 = vunpack.i.l.bf16 %v2699_v43 }
 0x14b   :  { %v933_v24 = vpack.c.bf16 %v922_v7, %v921_v35 }
 0x14d   :  { %2332 = vmatmul.msk.bf16.gmra.mxu0 %vm952_vm12, %v933_v24  ;;  %v2694_v21 = vpop.permute.xlu1 %2693 }
 0x14e   :  { %v2689_v41 = vpop.permute.xlu0 %2688  ;;  %v2696_v31 = vunpack.i.h.bf16 %v2694_v21  ;;  %v2695_v22 = vunpack.i.l.bf16 %v2694_v21 }
 0x14f   :  { %v2691_v20 = vunpack.i.h.bf16 %v2689_v41  ;;  %v2690_v59 = vunpack.i.l.bf16 %v2689_v41 }
 0x151   :  { %v876_v45 = vsel %vm861_vm8, %v859_v15, %v2690_v59  ;;  %v877_v13 = vsel %vm861_vm8, %v860_v26, %v2691_v20  ;;  %vm2012_vm8 = vcmask 588800  }
 0x152   :  { %v893_v3 = vsel %vm878_vm9, %v876_v45, %v2695_v22  ;;  %v894_v60 = vsel %vm878_vm9, %v877_v13, %v2696_v31 }
 0x153   :  { %v910_v14 = vsel %vm895_vm10, %v893_v3, %v2700_v25  ;;  %v911_v4 = vsel %vm895_vm10, %v894_v60, %v2701_v16 }
 0x156   :  { %v2704_v37 = vpop.permute.xlu0 %2703 }
 0x157   :  { %v2706_v52 = vunpack.i.h.bf16 %v2704_v37  ;;  %v2705_v33 = vunpack.i.l.bf16 %v2704_v37 }
 0x159   :  { %v927_v10 = vsel %vm912_vm11, %v910_v14, %v2705_v33  ;;  %v928_v9 = vsel %vm912_vm11, %v911_v4, %v2706_v52 }
 0x15a   :  { %v936_v23 = vpack.c.bf16 %v928_v9, %v927_v10 }
 0x15c   :  { %2335 = vmatmul.msk.bf16.gmra.mxu3 %vm952_vm12, %v936_v23 }
 0x17a   :  { %v4079_v48 = vpop.f32.mrf.mxu0 }
 0x17b   :  { %v1068_v50 = vmul.f32 %v4079_v48, %v4079_v48  ;;  %v1030_v28 = vsel %vm810_vm4, %v4079_v48, 0.0 }
 0x17d   :  { %v1084_v18 = vsel %vm810_vm4, %v1068_v50, 0.0 }
 0x182   :  { %v4081_v63 = vpop.f32.mrf.mxu0 }
 0x183   :  { %v1069_v6 = vmul.f32 %v4081_v63, %v4081_v63  ;;  %v1031_v56 = vsel %vm810_vm4, %v4081_v63, 0.0 }
 0x184   :  { %v1032_v5 = vadd.f32 %v1031_v56, %v1030_v28 }
 0x185   :  { %v1085_v47 = vsel %vm810_vm4, %v1069_v6, 0.0 }
 0x186   :  { %v1086_v36 = vadd.f32 %v1085_v47, %v1084_v18 }
 0x18a   :  { %v4083_v34 = vpop.f32.mrf.mxu0 }
 0x18b   :  { %v1070_v40 = vmul.f32 %v4083_v34, %v4083_v34  ;;  %v1033_v12 = vsel %vm810_vm4, %v4083_v34, 0.0 }
 0x18c   :  { %v1034_v53 = vadd.f32 %v1033_v12, %v1032_v5 }
 0x18d   :  { %v1087_v0 = vsel %vm810_vm4, %v1070_v40, 0.0 }
 0x18e   :  { %v1088_v57 = vadd.f32 %v1087_v0, %v1086_v36 }
 0x192   :  { %v4085_v30 = vpop.f32.mrf.mxu0 }
 0x193   :  { %v1071_v54 = vmul.f32 %v4085_v30, %v4085_v30  ;;  %v1035_v46 = vsel %vm810_vm4, %v4085_v30, 0.0 }
 0x194   :  { %v1036_v44 = vadd.f32 %v1035_v46, %v1034_v53 }
 0x195   :  { %v1089_v17 = vsel %vm810_vm4, %v1071_v54, 0.0 }
 0x196   :  { %v1090_v49 = vadd.f32 %v1089_v17, %v1088_v57 }
 0x19a   :  { %v4087_v51 = vpop.f32.mrf.mxu0 }
 0x19b   :  { %v1072_v58 = vmul.f32 %v4087_v51, %v4087_v51  ;;  %v1037_v27 = vsel %vm810_vm4, %v4087_v51, 0.0 }
 0x19c   :  { %v1038_v35 = vadd.f32 %v1037_v27, %v1036_v44 }
 0x19d   :  { %v1091_v2 = vsel %vm810_vm4, %v1072_v58, 0.0 }
 0x19e   :  { %v1092_v19 = vadd.f32 %v1091_v2, %v1090_v49 }
 0x1a2   :  { %v4089_v62 = vpop.f32.mrf.mxu0 }
 0x1a3   :  { %v1073_v11 = vmul.f32 %v4089_v62, %v4089_v62  ;;  %v1039_v55 = vsel %vm810_vm4, %v4089_v62, 0.0 }
 0x1a4   :  { %v1040_v41 = vadd.f32 %v1039_v55, %v1038_v35 }
 0x1a5   :  { %v1093_v7 = vsel %vm810_vm4, %v1073_v11, 0.0 }
 0x1a6   :  { %v1094_v26 = vadd.f32 %v1093_v7, %v1092_v19 }
 0x1a8   :  { %v4093_v61 = vpop.f32.mrf.mxu3 }
 0x1a9   :  { %v1078_v10 = vmul.f32 %v4093_v61, %v4093_v61  ;;  %v1049_v6 = vsel %vm810_vm4, %v4093_v61, 0.0 }
 0x1ab   :  { %v1103_v56 = vsel %vm810_vm4, %v1078_v10, 0.0 }
 0x1b0   :  { %v4112_v8 = vpop.f32.mrf.mxu3 }
 0x1b1   :  { %v4091_v32 = vpop.f32.mrf.mxu0  ;;  %v1079_v40 = vmul.f32 %v4112_v8, %v4112_v8  ;;  %v1051_v47 = vsel %vm810_vm4, %v4112_v8, 0.0 }
 0x1b2   :  { %v1074_v42 = vmul.f32 %v4091_v32, %v4091_v32  ;;  %v1041_v24 = vsel %vm810_vm4, %v4091_v32, 0.0 }
 0x1b3   :  { %v1042_v31 = vadd.f32 %v1041_v24, %v1040_v41  ;;  %v1105_v54 = vsel %vm810_vm4, %v1079_v40, 0.0 }
 0x1b4   :  { %v1095_v20 = vsel %vm810_vm4, %v1074_v42, 0.0 }
 0x1b5   :  { %v1096_v45 = vadd.f32 %v1095_v20, %v1094_v26 }
 0x1b9   :  { %v4103_v39 = vpop.f32.mrf.mxu0 }
 0x1ba   :  { %v1075_v38 = vmul.f32 %v4103_v39, %v4103_v39  ;;  %v1043_v59 = vsel %vm810_vm4, %v4103_v39, 0.0 }
 0x1bb   :  { %v1044_v13 = vadd.f32 %v1043_v59, %v1042_v31 }
 0x1bc   :  { %v1097_v22 = vsel %vm810_vm4, %v1075_v38, 0.0 }
 0x1bd   :  { %v1098_v3 = vadd.f32 %v1097_v22, %v1096_v45 }
 0x1c1   :  { %v4137_v21 = vpop.f32.mrf.mxu3 }
 0x1c2   :  { %v1080_v5 = vmul.f32 %v4137_v21, %v4137_v21  ;;  %v1053_v46 = vsel %vm810_vm4, %v4137_v21, 0.0 }
 0x1c4   :  { %v1107_v36 = vsel %vm810_vm4, %v1080_v5, 0.0  ;;  %v247_v5 = vld [vmem:[%s5218_s4] sm:$0x1]  ;;  %s3043_s4 = smov 40  }
 0x1c9   :  { %v4157_v9 = vpop.f32.mrf.mxu3 }
 0x1ca   :  { %v4130_v1 = vpop.f32.mrf.mxu0  ;;  %v1081_v53 = vmul.f32 %v4157_v9, %v4157_v9  ;;  %v1055_v11 = vsel %vm810_vm4, %v4157_v9, 0.0 }
 0x1cb   :  { %v1076_v15 = vmul.f32 %v4130_v1, %v4130_v1  ;;  %v1045_v43 = vsel %vm810_vm4, %v4130_v1, 0.0 }
 0x1cc   :  { %v1046_v60 = vadd.f32 %v1045_v43, %v1044_v13  ;;  %v1109_v2 = vsel %vm810_vm4, %v1081_v53, 0.0 }
 0x1cd   :  { %v1099_v16 = vsel %vm810_vm4, %v1076_v15, 0.0 }
 0x1ce   :  { %v1100_v33 = vadd.f32 %v1099_v16, %v1098_v3 }
 0x1d2   :  { %v4148_v25 = vpop.f32.mrf.mxu0 }
 0x1d3   :  { %v1047_v37 = vsel %vm810_vm4, %v4148_v25, 0.0  ;;  %v1077_v52 = vmul.f32 %v4148_v25, %v4148_v25 }
 0x1d4   :  { %v1048_v14 = vadd.f32 %v1047_v37, %v1046_v60 }
 0x1d5   :  { %v1101_v4 = vsel %vm810_vm4, %v1077_v52, 0.0 }
 0x1d6   :  { %v1102_v23 = vadd.f32 %v1101_v4, %v1100_v33  ;;  %v1050_v50 = vadd.f32 %v1049_v6, %v1048_v14 }
 0x1d8   :  { %v1104_v28 = vadd.f32 %v1103_v56, %v1102_v23  ;;  %v1052_v12 = vadd.f32 %v1051_v47, %v1050_v50 }
 0x1da   :  { %v1106_v18 = vadd.f32 %v1105_v54, %v1104_v28  ;;  %v1054_v58 = vadd.f32 %v1053_v46, %v1052_v12  ;;  %v246_v28 = vld [vmem:[%s5217_s3] sm:$0x1]  ;;  %s3042_s3 = smov 48  }
 0x1dc   :  { %v1108_v27 = vadd.f32 %v1107_v36, %v1106_v18  ;;  %v1056_v44 = vadd.f32 %v1055_v11, %v1054_v58 }
 0x1de   :  { %v1110_v49 = vadd.f32 %v1109_v2, %v1108_v27 }
 0x1df   :  { %v4169_v0 = vpop.f32.mrf.mxu3 }
 0x1e0   :  { %v1082_v17 = vmul.f32 %v4169_v0, %v4169_v0  ;;  %v1057_v57 = vsel %vm810_vm4, %v4169_v0, 0.0 }
 0x1e1   :  { %v1058_v42 = vadd.f32 %v1057_v57, %v1056_v44 }
 0x1e2   :  { %v1111_v55 = vsel %vm810_vm4, %v1082_v17, 0.0 }
 0x1e3   :  { %v1112_v38 = vadd.f32 %v1111_v55, %v1110_v49 }
 0x1e7   :  { %v4184_v35 = vpop.f32.mrf.mxu3 }
 0x1e8   :  { %v1059_v7 = vsel %vm810_vm4, %v4184_v35, 0.0  ;;  %v1083_v24 = vmul.f32 %v4184_v35, %v4184_v35 }
 0x1e9   :  { %v1060_v19 = vadd.f32 %v1059_v7, %v1058_v42 }
 0x1ea   :  { %v1113_v41 = vsel %vm810_vm4, %v1083_v24, 0.0 }
 0x1eb   :  { %v1061_v20 = vrot.slane %v1060_v19, 4  ;;  %v1114_v59 = vadd.f32 %v1113_v41, %v1112_v38 }
 0x1ed   :  { %v1062_v15 = vadd.f32 %v1061_v20, %v1060_v19  ;;  %v1115_v26 = vrot.slane %v1114_v59, 4 }
 0x1ef   :  { %v1063_v31 = vrot.slane %v1062_v15, 2  ;;  %v1116_v22 = vadd.f32 %v1115_v26, %v1114_v59 }
 0x1f1   :  { %v1064_v43 = vadd.f32 %v1063_v31, %v1062_v15  ;;  %v1117_v45 = vrot.slane %v1116_v22, 2 }
 0x1f3   :  { %v1065_v13 = vrot.slane %v1064_v43, 1  ;;  %v1118_v16 = vadd.f32 %v1117_v45, %v1116_v22 }
 0x1f5   :  { %v1066_v3 = vadd.f32 %v1065_v13, %v1064_v43  ;;  %v1119_v60 = vrot.slane %v1118_v16, 1 }
 0x1f7   :  { %v1067_v37 = vmul.f32 0.0078125, %v1066_v3  ;;  %v1120_v52 = vadd.f32 %v1119_v60, %v1118_v16 }
 0x1f9   :  { %v1121_v33 = vmul.f32 0.0078125, %v1120_v52  ;;  %v1122_v14 = vmul.f32 %v1067_v37, %v1067_v37 }
 0x1fb   :  { %v1123_v4 = vsub.f32 %v1121_v33, %v1122_v14 }
 0x1fd   :  { %v1124_v10 = vadd.f32 1e-05, %v1123_v4 }
 0x1ff   :  { %3027 = vrsqrt.f32 %v1124_v10  ;;  %vm1131_vm15 = vweird.f32 %v1124_v10 }
 0x205   :  { %v3028_v23 = vpop.eup %3027 }
 0x206   :  { %v1126_v6 = vmul.f32 %v3028_v23, %v1124_v10  ;;  %vm1132_vm14 = vweird.f32 %v3028_v23 }
 0x207   :  { %vm1133_vm0 = vmor %vm1131_vm15, %vm1132_vm14 }
 0x208   :  { %v1127_v50 = vmul.f32 %v3028_v23, %v1126_v6 }
 0x20a   :  { %v1128_v56 = vmul.f32 0.5, %v1127_v50 }
 0x20c   :  { %v1129_v40 = vsub.f32 1.5, %v1128_v56 }
 0x20e   :  { %v1130_v47 = vmul.f32 %v3028_v23, %v1129_v40 }
 0x210   :  { %v1134_v12 = vsel %vm1133_vm0, %v3028_v23, %v1130_v47 }
 0x211   :  { %v1135_v54 = vmul.f32 %v1134_v12, %v246_v28 }
 0x213   :  { %v1136_v18 = vmul.f32 %v1135_v54, %v1067_v37  ;;  %v1139_v46 = vperm.slane %v1135_v54, 0 }
 0x215   :  { %v1137_v58 = vsub.f32 %v247_v5, %v1136_v18  ;;  %v1156_v36 = vmul.f32 %v1139_v46, %v4184_v35  ;;  %v1141_v17 = vmul.f32 %v1139_v46, %v4079_v48  ;;  %v1142_v27 = vmul.f32 %v1139_v46, %v4081_v63 }
 0x216   :  { %v1144_v11 = vmul.f32 %v1139_v46, %v4085_v30  ;;  %v1145_v29 = vmul.f32 %v1139_v46, %v4087_v51  ;;  %v1143_v57 = vmul.f32 %v1139_v46, %v4083_v34  ;;  %v1150_v44 = vmul.f32 %v1139_v46, %v4148_v25 }
 0x217   :  { %v1158_v53 = vperm.slane %v1137_v58, 0  ;;  %v1151_v35 = vmul.f32 %v1139_v46, %v4093_v61  ;;  %v1149_v48 = vmul.f32 %v1139_v46, %v4130_v1  ;;  %v1154_v34 = vmul.f32 %v1139_v46, %v4157_v9 }
 0x218   :  { %v1155_v59 = vmul.f32 %v1139_v46, %v4169_v0  ;;  %v1146_v31 = vmul.f32 %v1139_v46, %v4089_v62  ;;  %v1147_v22 = vmul.f32 %v1139_v46, %v4091_v32  ;;  %v1152_v43 = vmul.f32 %v1139_v46, %v4112_v8 }
 0x219   :  { %v1175_v2 = vadd.f32 %v1158_v53, %v1156_v36  ;;  %v1160_v55 = vadd.f32 %v1158_v53, %v1141_v17  ;;  %v1161_v42 = vadd.f32 %v1158_v53, %v1142_v27  ;;  %v1163_v49 = vadd.f32 %v1158_v53, %v1144_v11 }
 0x21a   :  { %v1164_v7 = vadd.f32 %v1158_v53, %v1145_v29  ;;  %v1162_v24 = vadd.f32 %v1158_v53, %v1143_v57  ;;  %v1169_v30 = vadd.f32 %v1158_v53, %v1150_v44  ;;  %v1170_v51 = vadd.f32 %v1158_v53, %v1151_v35 }
 0x21b   :  { %v1191_v38 = vmax.f32 %v1175_v2, 0.0  ;;  %v1176_v63 = vmax.f32 %v1160_v55, 0.0  ;;  %v1177_v19 = vmax.f32 %v1161_v42, 0.0  ;;  %v1179_v41 = vmax.f32 %v1163_v49, 0.0  ;;  %v4314_v49 = vld [vmem:[#allocation3 + $0xa8] sm:$0x3] }
 0x21c   :  { %v1180_v25 = vmax.f32 %v1164_v7, 0.0  ;;  %v1168_v20 = vadd.f32 %v1158_v53, %v1149_v48  ;;  %v1178_v15 = vmax.f32 %v1162_v24, 0.0  ;;  %v1173_v61 = vadd.f32 %v1158_v53, %v1154_v34 }
 0x21d   :  { %1249 = vst.msk [vmem:[#allocation3 + $0x121] sm:$0xff] %vm810_vm4, %v1191_v38  ;;  %v1185_v1 = vmax.f32 %v1169_v30, 0.0  ;;  %v1174_v26 = vadd.f32 %v1158_v53, %v1155_v59  ;;  %v1186_v9 = vmax.f32 %v1170_v51, 0.0  ;;  %v1153_v45 = vmul.f32 %v1139_v46, %v4137_v21 }
 0x21e   :  { %1234 = vst.msk [vmem:[#allocation3 + $0x11] sm:$0xff] %vm810_vm4, %v1176_v63  ;;  %v1184_v0 = vmax.f32 %v1168_v20, 0.0  ;;  %v1165_v13 = vadd.f32 %v1158_v53, %v1146_v31  ;;  %v1166_v16 = vadd.f32 %v1158_v53, %v1147_v22  ;;  %v1189_v3 = vmax.f32 %v1173_v61, 0.0 }
 0x21f   :  { %1235 = vst.msk [vmem:[#allocation3 + $0x21] sm:$0xff] %vm810_vm4, %v1177_v19  ;;  %v1171_v60 = vadd.f32 %v1158_v53, %v1152_v43  ;;  %v1172_v37 = vadd.f32 %v1158_v53, %v1153_v45  ;;  %v1148_v62 = vmul.f32 %v1139_v46, %v4103_v39  ;;  %v1190_v32 = vmax.f32 %v1174_v26, 0.0  ;;  %v4357_v26 = vld [vmem:[#allocation3 + $0x8] sm:$0x3] }
 0x220   :  { %1237 = vst.msk [vmem:[#allocation3 + $0x41] sm:$0xff] %vm810_vm4, %v1179_v41  ;;  %v1181_v21 = vmax.f32 %v1165_v13, 0.0  ;;  %v1182_v33 = vmax.f32 %v1166_v16, 0.0  ;;  %v1358_v34 = vrot.slane %v4314_v49, 1 }
 0x221   :  { %1238 = vst.msk [vmem:[#allocation3 + $0x51] sm:$0xff] %vm810_vm4, %v1180_v25  ;;  %v1167_v8 = vadd.f32 %v1158_v53, %v1148_v62  ;;  %v1187_v10 = vmax.f32 %v1171_v60, 0.0  ;;  %v1188_v39 = vmax.f32 %v1172_v37, 0.0  ;;  %v4291_v53 = vld [vmem:[#allocation3 + $0xa0] sm:$0xff]  ;;  %v1382_v60 = vrot.slane %v4357_v26, 2 }
 0x222   :  { %1236 = vst.msk [vmem:[#allocation3 + $0x31] sm:$0xff] %vm810_vm4, %v1178_v15  ;;  %v1357_v51 = vrot.slane %v4291_v53, 1 }
 0x223   :  { %1243 = vst.msk [vmem:[#allocation3 + $0xc1] sm:$0xff] %vm810_vm4, %v1185_v1  ;;  %v1183_v5 = vmax.f32 %v1167_v8, 0.0  ;;  %v4355_v1 = vld [vmem:[#allocation3] sm:$0xff] }
 0x224   :  { %1244 = vst.msk [vmem:[#allocation3 + $0xd1] sm:$0xff] %vm810_vm4, %v1186_v9  ;;  %v1359_v31 = vsel %vm280_vm2, %v1357_v51, %v1358_v34 }
 0x225   :  { %v4261_v52 = vld [vmem:[#allocation3 + $0x10] sm:$0xff]  ;;  %1242 = vst.msk [vmem:[#allocation3 + $0xb1] sm:$0xff] %vm810_vm4, %v1184_v0  ;;  %v4367_v45 = vld [vmem:[#allocation3 + $0x18] sm:$0x3] }
 0x226   :  { %v4264_v14 = vld [vmem:[#allocation3 + $0x20] sm:$0xff]  ;;  %v4266_v4 = vld [vmem:[#allocation3 + $0x28] sm:$0x3]  ;;  %1247 = vst.msk [vmem:[#allocation3 + $0x101] sm:$0xff] %vm810_vm4, %v1189_v3  ;;  %v1381_v3 = vrot.slane %v4355_v1, 2  ;;  %v1384_v37 = vrot.slane %v4261_v52, 2 }
 0x227   :  { %v2707_v23 = vpack.i.bf16 %v4264_v14, %v4261_v52  ;;  %v4271_v6 = vld [vmem:[#allocation3 + $0x40] sm:$0xff]  ;;  %v4273_v50 = vld [vmem:[#allocation3 + $0x48] sm:$0x3]  ;;  %v1339_v56 = vrot.slane %v4264_v14, 1  ;;  %v1340_v40 = vrot.slane %v4266_v4, 1  ;;  %1248 = vst.msk [vmem:[#allocation3 + $0x111] sm:$0xff] %vm810_vm4, %v1190_v32 }
 0x228   :  { %v4278_v28 = vld [vmem:[#allocation3 + $0x50] sm:$0xff]  ;;  %v4280_v47 = vld [vmem:[#allocation3 + $0x58] sm:$0x3]  ;;  %v1345_v12 = vrot.slane %v4271_v6, 1  ;;  %v1346_v54 = vrot.slane %v4273_v50, 1  ;;  %1239 = vst.msk [vmem:[#allocation3 + $0x61] sm:$0xff] %vm810_vm4, %v1181_v21 }
 0x229   :  { %2708 = vrot.lane.b32.xlu1 %v2707_v23, %s3037_s17  ;;  %v1348_v18 = vrot.slane %v4278_v28, 1  ;;  %v1349_v46 = vrot.slane %v4280_v47, 1  ;;  %v4287_v58 = vld [vmem:[#allocation3 + $0x30] sm:$0xff]  ;;  %v4289_v36 = vld [vmem:[#allocation3 + $0x38] sm:$0x3]  ;;  %v4298_v27 = vsel %vm280_vm2, %v1339_v56, %v1340_v40  ;;  %1240 = vst.msk [vmem:[#allocation3 + $0x71] sm:$0xff] %vm810_vm4, %v1182_v33 }
 0x22a   :  { %v4295_v17 = vsel %vm280_vm2, %v1345_v12, %v1346_v54  ;;  %v1342_v11 = vrot.slane %v4287_v58, 1  ;;  %v1343_v29 = vrot.slane %v4289_v36, 1  ;;  %v4302_v57 = vld [vmem:[#allocation3 + $0xc0] sm:$0xff]  ;;  %v4304_v44 = vld [vmem:[#allocation3 + $0xc8] sm:$0x3]  ;;  %1245 = vst.msk [vmem:[#allocation3 + $0xe1] sm:$0xff] %vm810_vm4, %v1187_v10  ;;  %v2712_v59 = vpack.i.bf16 %v4287_v58, %v4264_v14 }
 0x22b   :  { %v4308_v2 = vsel %vm280_vm2, %v1348_v18, %v1349_v46  ;;  %v4310_v55 = vld [vmem:[#allocation3 + $0xd0] sm:$0xff]  ;;  %v4312_v42 = vld [vmem:[#allocation3 + $0xd8] sm:$0x3]  ;;  %v1363_v35 = vrot.slane %v4302_v57, 1  ;;  %v1364_v19 = vrot.slane %v4304_v44, 1  ;;  %1246 = vst.msk [vmem:[#allocation3 + $0xf1] sm:$0xff] %vm810_vm4, %v1188_v39  ;;  %v1383_v46 = vsel %vm329_vm3, %v1381_v3, %v1382_v60 }
 0x22c   :  { %v4318_v7 = vpack.i.bf16 %v4308_v2, %v4295_v17  ;;  %v4321_v24 = vsel %vm280_vm2, %v1342_v11, %v1343_v29  ;;  %v4324_v48 = vld [vmem:[#allocation3 + $0xb0] sm:$0xff]  ;;  %v4326_v38 = vld [vmem:[#allocation3 + $0xb8] sm:$0x3]  ;;  %v1366_v30 = vrot.slane %v4310_v55, 1  ;;  %v1367_v41 = vrot.slane %v4312_v42, 1  ;;  %1241 = vst.msk [vmem:[#allocation3 + $0x81] sm:$0xff] %vm810_vm4, %v1183_v5 }
 0x22d   :  { %v4331_v63 = vpack.i.bf16 %v4321_v24, %v4298_v27  ;;  %v1360_v25 = vrot.slane %v4324_v48, 1  ;;  %v1361_v20 = vrot.slane %v4326_v38, 1  ;;  %v4350_v15 = vsel %vm280_vm2, %v1363_v35, %v1364_v19  ;;  %v4363_v9 = vld [vmem:[#allocation3 + $0x100] sm:$0xff]  ;;  %v4365_v43 = vld [vmem:[#allocation3 + $0x108] sm:$0x3] }
 0x22e   :  { %2768 = vrot.lane.b32.xlu0 %v4318_v7, %s3035_s26  ;;  %v4353_v61 = vsel %vm280_vm2, %v1366_v30, %v1367_v41  ;;  %v4369_v0 = vld [vmem:[#allocation3 + $0x110] sm:$0xff]  ;;  %v4371_v13 = vld [vmem:[#allocation3 + $0x118] sm:$0x3]  ;;  %v1375_v32 = vrot.slane %v4363_v9, 1  ;;  %v1376_v8 = vrot.slane %v4365_v43, 1  ;;  %v1385_v21 = vrot.slane %v4367_v45, 2 }
 0x22f   :  { %2763 = vrot.lane.b32.xlu2 %v4331_v63, %s3035_s26  ;;  %v4361_v22 = vsel %vm280_vm2, %v1360_v25, %v1361_v20  ;;  %v4375_v16 = vpack.i.bf16 %v4353_v61, %v4350_v15  ;;  %v1378_v33 = vrot.slane %v4369_v0, 1  ;;  %v1379_v10 = vrot.slane %v4371_v13, 1  ;;  %v4391_v23 = vld [vmem:[#allocation3 + $0x60] sm:$0xff]  ;;  %v4393_v56 = vld [vmem:[#allocation3 + $0x68] sm:$0x3] }
 0x230   :  { %v2777_v62 = vpack.i.bf16 %v4361_v22, %v1359_v31  ;;  %v2717_v39 = vpack.i.bf16 %v4302_v57, %v4324_v48  ;;  %v4405_v18 = vsel %vm280_vm2, %v1375_v32, %v1376_v8  ;;  %v4409_v11 = vsel %vm329_vm3, %v1384_v37, %v1385_v21  ;;  %v4416_v30 = vld [vmem:[#allocation3 + $0x70] sm:$0xff]  ;;  %v4418_v41 = vld [vmem:[#allocation3 + $0x78] sm:$0x3] }
 0x231   :  { %2713 = vrot.lane.b32.xlu1 %v2712_v59, %s3042_s3  ;;  %v4395_v40 = vld [vmem:[#allocation3 + $0xe0] sm:$0xff]  ;;  %v4397_v12 = vld [vmem:[#allocation3 + $0xe8] sm:$0x3]  ;;  %v1396_v29 = vrot.slane %v4278_v28, 2  ;;  %v4413_v35 = vsel %vm280_vm2, %v1378_v33, %v1379_v10  ;;  %v1397_v19 = vrot.slane %v4280_v47, 2  ;;  %v1399_v51 = vrot.slane %v4391_v23, 2 }
 0x232   :  { %v4399_v54 = vld [vmem:[#allocation3 + $0xf0] sm:$0xff]  ;;  %v4401_v5 = vld [vmem:[#allocation3 + $0xf8] sm:$0x3]  ;;  %5260 = vst [vmem:[#allocation8_spill] sm:$0xff] %v4413_v35  ;;  %v1400_v34 = vrot.slane %v4393_v56, 2  ;;  %v1417_v25 = vrot.slane %v4395_v40, 2  ;;  %v2797_v3 = vpack.i.bf16 %v4409_v11, %v1383_v46  ;;  %v4429_v47 = vpack.i.bf16 %v4413_v35, %v4405_v18 }
 0x233   :  { %v1418_v20 = vrot.slane %v4397_v12, 2  ;;  %v1420_v59 = vrot.slane %v4399_v54, 2  ;;  %v1421_v31 = vrot.slane %v4401_v5, 2  ;;  %v1393_v60 = vrot.slane %v4271_v6, 2 }
 0x234   :  { %v1402_v37 = vrot.slane %v4416_v30, 2  ;;  %v2722_v32 = vpack.i.bf16 %v4310_v55, %v4302_v57  ;;  %v1394_v8 = vrot.slane %v4273_v50, 2  ;;  %v4439_v21 = vsel %vm329_vm3, %v1396_v29, %v1397_v19 }
 0x235   :  { %v4446_v10 = vsel %vm329_vm3, %v1399_v51, %v1400_v34  ;;  %v4452_v46 = vsel %vm329_vm3, %v1420_v59, %v1421_v31  ;;  %v1412_v59 = vrot.slane %v4304_v44, 2  ;;  %v1423_v31 = vrot.slane %v4363_v9, 2 }
 0x236   :  { %2783 = vrot.lane.b32.xlu0 %v4375_v16, %s3035_s26  ;;  %v4459_v29 = vsel %vm329_vm3, %v1393_v60, %v1394_v8  ;;  %v1415_v60 = vrot.slane %v4312_v42, 2  ;;  %v1427_v44 = vrot.slane %v4371_v13, 2  ;;  %v1391_v42 = vrot.slane %v4289_v36, 2 }
 0x237   :  { %2778 = vrot.lane.b32.xlu2 %v2777_v62, %s3035_s26  ;;  %v1403_v62 = vrot.slane %v4418_v41, 2  ;;  %v2742_v36 = vpack.i.bf16 %v4399_v54, %v4395_v40 }
 0x239   :  { %2718 = vrot.lane.b32.xlu1 %v2717_v39, %s3037_s17  ;;  %v4449_v39 = vsel %vm329_vm3, %v1417_v25, %v1418_v20  ;;  %v4456_v50 = vsel %vm329_vm3, %v1402_v37, %v1403_v62  ;;  %v1411_v25 = vrot.slane %v4302_v57, 2  ;;  %v4474_v20 = vpack.i.bf16 %v4439_v21, %v4459_v29 }
 0x23a   :  { %v4463_v19 = vpack.i.bf16 %v4452_v46, %v4449_v39  ;;  %v4469_v34 = vpack.i.bf16 %v4456_v50, %v4446_v10  ;;  %v1424_v37 = vrot.slane %v4365_v43, 2  ;;  %v1426_v62 = vrot.slane %v4369_v0, 2 }
 0x23b   :  { %v1413_v51 = vsel %vm329_vm3, %v1411_v25, %v1412_v59  ;;  %v1337_v25 = vrot.slane %v4367_v45, 1  ;;  %v2732_v59 = vpack.i.bf16 %v4278_v28, %v4271_v6  ;;  %v2737_v45 = vpack.i.bf16 %v4395_v40, %v4310_v55 }
 0x23c   :  { %v4490_v8 = vsel %vm329_vm3, %v1423_v31, %v1424_v37  ;;  %v4496_v43 = vsel %vm329_vm3, %v1426_v62, %v1427_v44  ;;  %v1387_v31 = vrot.slane %v4264_v14, 2  ;;  %v1388_v37 = vrot.slane %v4266_v4, 2 }
 0x23d   :  { %v4504_v35 = vpack.i.bf16 %v4496_v43, %v4490_v8  ;;  %v1336_v62 = vrot.slane %v4261_v52, 1  ;;  %v1390_v44 = vrot.slane %v4287_v58, 2 }
 0x23e   :  { %2798 = vrot.lane.b32.xlu0 %v2797_v3, %s3039_s22  ;;  %v1414_v3 = vrot.slane %v4310_v55, 2 }
 0x23f   :  { %2793 = vrot.lane.b32.xlu2 %v4429_v47, %s3035_s26 }
 0x240   :  { %v4500_v33 = vsel %vm329_vm3, %v1414_v3, %v1415_v60  ;;  %v1389_v3 = vsel %vm329_vm3, %v1387_v31, %v1388_v37  ;;  %v1338_v60 = vsel %vm280_vm2, %v1336_v62, %v1337_v25  ;;  %v1392_v31 = vsel %vm329_vm3, %v1390_v44, %v1391_v42 }
 0x241   :  { %2723 = vrot.lane.b32.xlu1 %v2722_v32, %s3042_s3  ;;  %v2727_v32 = vpack.i.bf16 %v4271_v6, %v4287_v58  ;;  %v2842_v13 = vpack.i.bf16 %v4500_v33, %v1413_v51  ;;  %v2857_v4 = vpack.i.bf16 %v1389_v3, %v4409_v11  ;;  %v2867_v37 = vpack.i.bf16 %v1392_v31, %v1389_v3 }
 0x242   :  { %v1408_v11 = vrot.slane %v4324_v48, 2  ;;  %v2872_v25 = vpack.i.bf16 %v4350_v15, %v4361_v22  ;;  %v1334_v15 = vrot.slane %v4357_v26, 1  ;;  %v2897_v22 = vpack.i.bf16 %v4459_v29, %v1392_v31 }
 0x243   :  { %v1351_v3 = vrot.slane %v4391_v23, 1  ;;  %v1354_v26 = vrot.slane %v4416_v30, 1 }
 0x246   :  { %2813 = vrot.lane.b32.xlu0 %v4469_v34, %s3039_s22 }
 0x247   :  { %2808 = vrot.lane.b32.xlu2 %v4474_v20, %s3039_s22 }
 0x249   :  { %2728 = vrot.lane.b32.xlu1 %v2727_v32, %s3037_s17  ;;  %v2852_v32 = vpack.i.bf16 %v4298_v27, %v1338_v60  ;;  %v1409_v27 = vrot.slane %v4326_v38, 2  ;;  %v2747_v38 = vpack.i.bf16 %v4391_v23, %v4278_v28 }
 0x24b   :  { %v1410_v62 = vsel %vm329_vm3, %v1408_v11, %v1409_v27 }
 0x24c   :  { %v2877_v42 = vpack.i.bf16 %v1413_v51, %v1410_v62  ;;  %v1333_v51 = vrot.slane %v4355_v1, 1 }
 0x24e   :  { %2848 = vrot.lane.b32.xlu0 %v4463_v19, %s3039_s22 }
 0x24f   :  { %2843 = vrot.lane.b32.xlu2 %v2842_v13, %s3039_s22 }
 0x251   :  { %2733 = vrot.lane.b32.xlu1 %v2732_v59, %s3042_s3  ;;  %v1335_v59 = vsel %vm280_vm2, %v1333_v51, %v1334_v15 }
 0x256   :  { %2858 = vrot.lane.b32.xlu0 %v2857_v4, %s3043_s4  ;;  %v1352_v4 = vrot.slane %v4393_v56, 1 }
 0x257   :  { %2853 = vrot.lane.b32.xlu2 %v2852_v32, %s3040_s23  ;;  %v1355_v32 = vrot.slane %v4418_v41, 1  ;;  %v1372_v41 = vrot.slane %v4399_v54, 1 }
 0x258   :  { %v1353_v29 = vsel %vm280_vm2, %v1351_v3, %v1352_v4 }
 0x259   :  { %2738 = vrot.lane.b32.xlu1 %v2737_v45, %s3037_s17  ;;  %v4567_v44 = vsel %vm280_vm2, %v1354_v26, %v1355_v32  ;;  %v2932_v27 = vpack.i.bf16 %v1353_v29, %v4308_v2  ;;  %v2822_v2 = vpack.i.bf16 %v4363_v9, %v4399_v54 }
 0x25a   :  { %v2772_v56 = vpack.i.bf16 %v4567_v44, %v1353_v29  ;;  %v1266_v29 = vld [vmem:[#allocation3 + $0x80] sm:$0xff] }
 0x25e   :  { %2868 = vrot.lane.b32.xlu0 %v2867_v37, %s3044_s12 }
 0x25f   :  { %2863 = vrot.lane.b32.xlu2 %v4331_v63, %s3045_s13  ;;  %v2752_v63 = vpack.i.bf16 %v4416_v30, %v4391_v23 }
 0x261   :  { %2743 = vrot.lane.b32.xlu1 %v2742_v36, %s3042_s3  ;;  %v5262_v36 = vpack.i.bf16 %v4446_v10, %v4439_v21 }
 0x266   :  { %2878 = vrot.lane.b32.xlu0 %v2877_v42, %s3043_s4 }
 0x267   :  { %2873 = vrot.lane.b32.xlu2 %v2872_v25, %s3040_s23 }
 0x269   :  { %2748 = vrot.lane.b32.xlu1 %v2747_v38, %s3037_s17 }
 0x26e   :  { %2888 = vrot.lane.b32.xlu0 %v2842_v13, %s3044_s12  ;;  %v5261_v13 = vpack.i.bf16 %v4295_v17, %v4321_v24  ;;  %v1369_v17 = vrot.slane %v4395_v40, 1  ;;  %v1370_v24 = vrot.slane %v4397_v12, 1 }
 0x26f   :  { %2883 = vrot.lane.b32.xlu2 %v4375_v16, %s3045_s13  ;;  %v2757_v16 = vpack.i.bf16 %v1338_v60, %v1335_v59  ;;  %v1373_v60 = vrot.slane %v4401_v5, 1  ;;  %v1405_v5 = vrot.slane %v4291_v53, 2 }
 0x270   :  { %v1371_v45 = vsel %vm280_vm2, %v1369_v17, %v1370_v24 }
 0x271   :  { %2753 = vrot.lane.b32.xlu1 %v2752_v63, %s3042_s3  ;;  %v1374_v31 = vsel %vm280_vm2, %v1372_v41, %v1373_v60  ;;  %v2912_v12 = vpack.i.bf16 %v1371_v45, %v4353_v61  ;;  %v1433_v60 = vrot.slane %v1266_v29, 1 }
 0x272   :  { %v2952_v59 = vpack.i.bf16 %v4405_v18, %v1374_v31  ;;  %v1267_v18 = vld [vmem:[#allocation3 + $0x88] sm:$0x3] }
 0x273   :  { %v1440_v41 = vrot.slane %v1267_v18, 2 }
 0x276   :  { %2898 = vrot.lane.b32.xlu0 %v2897_v22, %s3043_s4 }
 0x277   :  { %2893 = vrot.lane.b32.xlu2 %v5261_v13, %s3040_s23  ;;  %v5263_v13 = vpack.i.bf16 %v4490_v8, %v4452_v46 }
 0x279   :  { %2758 = vrot.lane.b32.xlu1 %v2757_v16, %s3035_s26 }
 0x27e   :  { %2908 = vrot.lane.b32.xlu0 %v4474_v20, %s3044_s12  ;;  %v2917_v20 = vpack.i.bf16 %v4449_v39, %v4500_v33  ;;  %v1406_v33 = vrot.slane %v4314_v49, 2 }
 0x27f   :  { %2903 = vrot.lane.b32.xlu2 %v4318_v7, %s3045_s13  ;;  %v2787_v7 = vpack.i.bf16 %v1374_v31, %v1371_v45  ;;  %v1434_v45 = vrot.slane %v1267_v18, 1  ;;  %v5264_v18 = vld [vmem:[#allocation8_spill] sm:$0xff] }
 0x280   :  { %v1407_v61 = vsel %vm329_vm3, %v1405_v5, %v1406_v33  ;;  %v1269_v5 = vld [vmem:[#allocation3 + $0x98] sm:$0x3] }
 0x281   :  { %2773 = vrot.lane.b32.xlu1 %v2772_v56, %s3035_s26 }
 0x286   :  { %2918 = vrot.lane.b32.xlu0 %v2917_v20, %s3043_s4 }
 0x287   :  { %2913 = vrot.lane.b32.xlu2 %v2912_v12, %s3040_s23  ;;  %v1435_v12 = vsel %vm280_vm2, %v1433_v60, %v1434_v45 }
 0x289   :  { %v4586_v11 = vpop.permute.xlu2 %2763  ;;  %2788 = vrot.lane.b32.xlu1 %v2787_v7, %s3035_s26 }
 0x28e   :  { %2928 = vrot.lane.b32.xlu0 %v4463_v19, %s3044_s12  ;;  %v2817_v19 = vpack.i.bf16 %v1410_v62, %v1407_v61 }
 0x28f   :  { %2923 = vrot.lane.b32.xlu2 %v2787_v7, %s3045_s13  ;;  %v1268_v7 = vld [vmem:[#allocation3 + $0x90] sm:$0xff] }
 0x291   :  { %v4594_v39 = vpop.permute.xlu2 %2778  ;;  %2803 = vrot.lane.b32.xlu1 %v2867_v37, %s3039_s22 }
 0x296   :  { %2938 = vrot.lane.b32.xlu0 %v5262_v36, %s3043_s4  ;;  %v1456_v36 = vrot.slane %v1269_v5, 2 }
 0x297   :  { %2933 = vrot.lane.b32.xlu2 %v2932_v27, %s3040_s23  ;;  %v1455_v27 = vrot.slane %v1268_v7, 2 }
 0x299   :  { %v4604_v42 = vpop.permute.xlu2 %2793  ;;  %2818 = vrot.lane.b32.xlu1 %v2817_v19, %s3039_s22  ;;  %v1449_v19 = vrot.slane %v1268_v7, 1 }
 0x29b   :  { %v4607_v49 = vpop.permute.xlu1 %2708 }
 0x29e   :  { %2948 = vrot.lane.b32.xlu0 %v4469_v34, %s3044_s12 }
 0x29f   :  { %2943 = vrot.lane.b32.xlu2 %v2772_v56, %s3045_s13  ;;  %v1439_v56 = vrot.slane %v1266_v29, 2 }
 0x2a0   :  { %v2769_v37 = vpop.permute.xlu0 %2768 }
 0x2a1   :  { %v2771_v21 = vunpack.i.h.bf16 %v2769_v37  ;;  %v2770_v10 = vunpack.i.l.bf16 %v2769_v37  ;;  %v2809_v25 = vpop.permute.xlu2 %2808  ;;  %2823 = vrot.lane.b32.xlu1 %v2822_v2, %s3037_s17  ;;  %v1441_v31 = vsel %vm329_vm3, %v1439_v56, %v1440_v41  ;;  %v1450_v2 = vrot.slane %v1269_v5, 1  ;;  %v1298_v56 = vld [vmem:[%s5219_s2 + $0x20] sm:$0xf] }
 0x2a2   :  { %v2811_v62 = vunpack.i.h.bf16 %v2809_v25  ;;  %v2810_v38 = vunpack.i.l.bf16 %v2809_v25  ;;  %v2977_v61 = vpack.i.bf16 %v1441_v31, %v4456_v50  ;;  %v2837_v37 = vpack.i.bf16 %v1268_v7, %v1266_v29 }
 0x2a3   :  { %v1850_v63 = vsel %vm810_vm4, %v4278_v28, %v2771_v21  ;;  %v1849_v51 = vsel %vm810_vm4, %v4271_v6, %v2770_v10  ;;  %v4619_v34 = vpop.permute.xlu1 %2713  ;;  %v2827_v6 = vpack.i.bf16 %v4369_v0, %v4363_v9  ;;  %v1457_v25 = vsel %vm329_vm3, %v1455_v27, %v1456_v36  ;;  %v2365_v27 = vld [vmem:[%s5219_s2 + $0x18] sm:$0xff] }
 0x2a4   :  { %v4622_v15 = vsel %vm844_vm7, %v1850_v63, %v2811_v62  ;;  %v4625_v22 = vsel %vm844_vm7, %v1849_v51, %v2810_v38  ;;  %v1451_v50 = vsel %vm280_vm2, %v1449_v19, %v1450_v2  ;;  %v1287_v62 = vld [vmem:[#allocation3 + $0x128] sm:$0x3]  ;;  %v2992_v63 = vpack.i.bf16 %v1457_v25, %v1441_v31 }
 0x2a5   :  { %v2982_v51 = vpack.i.bf16 %v1451_v50, %v1435_v12 }
 0x2a6   :  { %2958 = vrot.lane.b32.xlu0 %v5263_v13, %s3043_s4  ;;  %v1437_v13 = vrot.slane %v1287_v62, 1 }
 0x2a7   :  { %2953 = vrot.lane.b32.xlu2 %v2952_v59, %s3040_s23 }
 0x2a8   :  { %v2784_v28 = vpop.permute.xlu0 %2783 }
 0x2a9   :  { %v2786_v16 = vunpack.i.h.bf16 %v2784_v28  ;;  %v2785_v3 = vunpack.i.l.bf16 %v2784_v28  ;;  %v2844_v4 = vpop.permute.xlu2 %2843  ;;  %2828 = vrot.lane.b32.xlu1 %v2827_v6, %s3042_s3 }
 0x2aa   :  { %v2846_v26 = vunpack.i.h.bf16 %v2844_v4  ;;  %v2845_v32 = vunpack.i.l.bf16 %v2844_v4 }
 0x2ab   :  { %v1856_v17 = vsel %vm810_vm4, %v4310_v55, %v2786_v16  ;;  %v1855_v46 = vsel %vm810_vm4, %v4302_v57, %v2785_v3  ;;  %v4640_v8 = vpop.permute.xlu1 %2718  ;;  %v2832_v57 = vpack.i.bf16 %v1266_v29, %v4416_v30  ;;  %v1443_v16 = vrot.slane %v1287_v62, 2 }
 0x2ac   :  { %v4643_v9 = vsel %vm844_vm7, %v1856_v17, %v2846_v26  ;;  %v4646_v24 = vsel %vm844_vm7, %v1855_v46, %v2845_v32  ;;  %v1288_v26 = vld [vmem:[#allocation3 + $0x130] sm:$0xff]  ;;  %v1289_v32 = vld [vmem:[#allocation3 + $0x138] sm:$0x3] }
 0x2ad   :  { %v1452_v60 = vrot.slane %v1288_v26, 1  ;;  %v1453_v45 = vrot.slane %v1289_v32, 1  ;;  %v1458_v7 = vrot.slane %v1288_v26, 2  ;;  %v1459_v5 = vrot.slane %v1289_v32, 2 }
 0x2ae   :  { %2968 = vrot.lane.b32.xlu0 %v4504_v35, %s3044_s12 }
 0x2af   :  { %2963 = vrot.lane.b32.xlu2 %v4429_v47, %s3045_s13  ;;  %v2972_v47 = vpack.i.bf16 %v1435_v12, %v4567_v44  ;;  %v1286_v44 = vld [vmem:[#allocation3 + $0x120] sm:$0xff] }
 0x2b0   :  { %v4653_v55 = vpop.permute.xlu0 %2798  ;;  %v1436_v59 = vrot.slane %v1286_v44, 1  ;;  %v1442_v28 = vrot.slane %v1286_v44, 2  ;;  %v2987_v41 = vpack.i.bf16 %v1286_v44, %v4369_v0  ;;  %v1454_v0 = vsel %vm280_vm2, %v1452_v60, %v1453_v45 }
 0x2b1   :  { %v4655_v20 = vpop.permute.xlu2 %2853  ;;  %2833 = vrot.lane.b32.xlu1 %v2832_v57, %s3037_s17  ;;  %v2002_v57 = vunpack.c.l.b16 %v1298_v56  ;;  %v3012_v25 = vpack.i.bf16 %v1288_v26, %v1286_v44  ;;  %v2711_v60 = vunpack.i.h.bf16 %v4607_v49  ;;  %v2710_v45 = vunpack.i.l.bf16 %v4607_v49 }
 0x2b2   :  { %v1438_v4 = vsel %vm280_vm2, %v1436_v59, %v1437_v13  ;;  %v1444_v46 = vsel %vm329_vm3, %v1442_v28, %v1443_v16  ;;  %v2362_v13 = vld [vmem:[%s5219_s2] sm:$0xff]  ;;  %vm1909_vm2 = vcmask 326656  }
 0x2b3   :  { %v4660_v33 = vpop.permute.xlu1 %2723  ;;  %v3002_v17 = vpack.i.bf16 %v1438_v4, %v5264_v18  ;;  %v2007_v31 = vpack.c.b16 %v2002_v57, %v2002_v57  ;;  %v3017_v2 = vpack.i.bf16 %v1454_v0, %v1438_v4  ;;  %v2801_v57 = vunpack.i.h.bf16 %v4653_v55 }
 0x2b6   :  { %2978 = vrot.lane.b32.xlu0 %v2977_v61, %s3043_s4 }
 0x2b7   :  { %2973 = vrot.lane.b32.xlu2 %v2972_v47, %s3040_s23  ;;  %v2039_v47 = vsel %vm2037_vm1, %v2007_v31, 0 }
 0x2b8   :  { %v4666_v21 = vpop.permute.xlu0 %2813  ;;  %2044 = vmatpush.bf16.msra.mxu1 %v2039_v47  ;;  %2369 = vmatpush.bf16.msra.mxu2 %v2039_v47 }
 0x2b9   :  { %v4668_v10 = vpop.permute.xlu2 %2863  ;;  %2838 = vrot.lane.b32.xlu1 %v2837_v37, %s3042_s3  ;;  %v1460_v37 = vsel %vm329_vm3, %v1458_v7, %v1459_v5  ;;  %v2856_v7 = vunpack.i.h.bf16 %v4655_v20  ;;  %v2855_v5 = vunpack.i.l.bf16 %v4655_v20  ;;  %vm1926_vm3 = vcmask 392192  }
 0x2bb   :  { %v4673_v38 = vpop.permute.xlu1 %2728 }
 0x2bc   :  { %2045 = vmatpush.bf16.msra.mxu1 %v2365_v27  ;;  %2370 = vmatpush.bf16.msra.mxu2 %v2365_v27 }
 0x2be   :  { %2993 = vrot.lane.b32.xlu0 %v2992_v63, %s3044_s12  ;;  %v3022_v63 = vpack.i.bf16 %v1460_v37, %v1444_v46 }
 0x2bf   :  { %2983 = vrot.lane.b32.xlu2 %v2982_v51, %s3045_s13 }
 0x2c0   :  { %v4677_v6 = vpop.permute.xlu0 %2848 }
 0x2c1   :  { %v4679_v3 = vpop.permute.xlu2 %2873  ;;  %2998 = vrot.lane.b32.xlu1 %v4504_v35, %s3039_s22  ;;  %v3007_v35 = vpack.i.bf16 %v1444_v46, %v4496_v43 }
 0x2c3   :  { %v4684_v29 = vpop.permute.xlu1 %2733 }
 0x2c6   :  { %3003 = vrot.lane.b32.xlu0 %v3002_v17, %s3040_s23 }
 0x2c7   :  { %2988 = vrot.lane.b32.xlu2 %v2987_v41, %s3037_s17 }
 0x2c8   :  { %v4695_v12 = vpop.permute.xlu0 %2858 }
 0x2c9   :  { %v4697_v61 = vpop.permute.xlu2 %2883  ;;  %3008 = vrot.lane.b32.xlu1 %v3007_v35, %s3043_s4  ;;  %v2800_v35 = vunpack.i.l.bf16 %v4653_v55  ;;  %v2861_v27 = vunpack.i.h.bf16 %v4695_v12  ;;  %v2860_v55 = vunpack.i.l.bf16 %v4695_v12 }
 0x2cb   :  { %v2739_v36 = vpop.permute.xlu1 %2738 }
 0x2cc   :  { %v2741_v43 = vunpack.i.h.bf16 %v2739_v36  ;;  %v2740_v19 = vunpack.i.l.bf16 %v2739_v36 }
 0x2ce   :  { %v4707_v50 = vsel %vm878_vm9, %v4643_v9, %v2741_v43  ;;  %v4711_v62 = vsel %vm878_vm9, %v4646_v24, %v2740_v19  ;;  %3018 = vrot.lane.b32.xlu0 %v3017_v2, %s3045_s13  ;;  %v2364_v9 = vld [vmem:[%s5219_s2 + $0x10] sm:$0xff]  ;;  %v2363_v24 = vld [vmem:[%s5219_s2 + $0x8] sm:$0xff] }
 0x2cf   :  { %3013 = vrot.lane.b32.xlu2 %v3012_v25, %s3042_s3  ;;  %2046 = vmatpush.bf16.msra.mxu1 %v2364_v9  ;;  %v2866_v25 = vunpack.i.h.bf16 %v4668_v10 }
 0x2d0   :  { %v4715_v51 = vpop.permute.xlu0 %2868  ;;  %2371 = vmatpush.bf16.msra.mxu2 %v2364_v9  ;;  %v2865_v9 = vunpack.i.l.bf16 %v4668_v10 }
 0x2d1   :  { %v4717_v59 = vpop.permute.xlu2 %2893  ;;  %3023 = vrot.lane.b32.xlu1 %v3022_v63, %s3044_s12 }
 0x2d3   :  { %v4723_v44 = vpop.permute.xlu1 %2743  ;;  %2047 = vmatpush.bf16.msra.mxu1 %v2363_v24 }
 0x2d4   :  { %2372 = vmatpush.bf16.msra.mxu2 %v2363_v24 }
 0x2d7   :  { %2048 = vmatpush.bf16.msra.mxu1 %v2362_v13 }
 0x2d8   :  { %v4731_v28 = vpop.permute.xlu0 %2878  ;;  %2373 = vmatpush.bf16.msra.mxu2 %v2362_v13 }
 0x2d9   :  { %v4733_v16 = vpop.permute.xlu2 %2903 }
 0x2db   :  { %v4735_v4 = vpop.permute.xlu1 %2748 }
 0x2e0   :  { %v4737_v26 = vpop.permute.xlu0 %2888 }
 0x2e1   :  { %v2914_v32 = vpop.permute.xlu2 %2913 }
 0x2e3   :  { %v4739_v18 = vpop.permute.xlu1 %2753 }
 0x2e8   :  { %v4741_v17 = vpop.permute.xlu0 %2898 }
 0x2e9   :  { %v4747_v31 = vpop.permute.xlu2 %2923 }
 0x2eb   :  { %v2759_v46 = vpop.permute.xlu1 %2758 }
 0x2ec   :  { %v2761_v56 = vunpack.i.h.bf16 %v2759_v46  ;;  %v2760_v41 = vunpack.i.l.bf16 %v2759_v46 }
 0x2ee   :  { %v1846_v0 = vsel %vm810_vm4, %v4261_v52, %v2761_v56  ;;  %v1845_v47 = vsel %vm810_vm4, %v4355_v1, %v2760_v41  ;;  %v2716_v52 = vunpack.i.h.bf16 %v4619_v34  ;;  %v2715_v1 = vunpack.i.l.bf16 %v4619_v34 }
 0x2ef   :  { %v1862_v49 = vsel %vm844_vm7, %v1846_v0, %v2801_v57  ;;  %v1861_v36 = vsel %vm844_vm7, %v1845_v47, %v2800_v35  ;;  %v2871_v34 = vunpack.i.h.bf16 %v4715_v51  ;;  %v2870_v56 = vunpack.i.l.bf16 %v4715_v51 }
 0x2f0   :  { %v1878_v43 = vsel %vm878_vm9, %v1862_v49, %v2711_v60  ;;  %v1877_v19 = vsel %vm878_vm9, %v1861_v36, %v2710_v45  ;;  %v4761_v20 = vpop.permute.xlu0 %2908  ;;  %v2916_v45 = vunpack.i.h.bf16 %v2914_v32  ;;  %v2915_v57 = vunpack.i.l.bf16 %v2914_v32 }
 0x2f1   :  { %v1894_v2 = vsel %vm912_vm11, %v1878_v43, %v2856_v7  ;;  %v1893_v37 = vsel %vm912_vm11, %v1877_v19, %v2855_v5  ;;  %v4781_v7 = vpop.permute.xlu2 %2933  ;;  %v2766_v0 = vunpack.i.h.bf16 %v4586_v11  ;;  %v2765_v47 = vunpack.i.l.bf16 %v4586_v11 }
 0x2f2   :  { %v1910_v63 = vsel %vm1909_vm2, %v1893_v37, %v2860_v55  ;;  %v1911_v12 = vsel %vm1909_vm2, %v1894_v2, %v2861_v27  ;;  %v2781_v51 = vunpack.i.h.bf16 %v4594_v39  ;;  %v2780_v49 = vunpack.i.l.bf16 %v4594_v39 }
 0x2f3   :  { %v4771_v24 = vpop.permute.xlu1 %2773  ;;  %v1927_v13 = vsel %vm1926_vm3, %v1910_v63, %v2715_v1  ;;  %v1928_v46 = vsel %vm1926_vm3, %v1911_v12, %v2716_v52  ;;  %v2746_v32 = vunpack.i.h.bf16 %v4723_v44  ;;  %v2745_v43 = vunpack.i.l.bf16 %v4723_v44 }
 0x2f4   :  { %v1944_v41 = vsel %vm1943_vm5, %v1927_v13, %v2865_v9  ;;  %v1945_v60 = vsel %vm1943_vm5, %v1928_v46, %v2866_v25  ;;  %v1904_v19 = vsel %vm912_vm11, %v4707_v50, %v2916_v45  ;;  %v1903_v52 = vsel %vm912_vm11, %v4711_v62, %v2915_v57 }
 0x2f5   :  { %v1961_v10 = vsel %vm1960_vm6, %v1944_v41, %v2870_v56  ;;  %v1962_v35 = vsel %vm1960_vm6, %v1945_v60, %v2871_v34  ;;  %v1848_v44 = vsel %vm810_vm4, %v4287_v58, %v2766_v0  ;;  %v1847_v50 = vsel %vm810_vm4, %v4264_v14, %v2765_v47 }
 0x2f6   :  { %v1977_v5 = vpack.c.bf16 %v1962_v35, %v1961_v10  ;;  %v4810_v62 = vsel %vm810_vm4, %v4324_v48, %v2781_v51  ;;  %v4814_v25 = vsel %vm810_vm4, %v4291_v53, %v2780_v49  ;;  %v2721_v63 = vunpack.i.h.bf16 %v4640_v8 }
 0x2f7   :  { %v2720_v12 = vunpack.i.l.bf16 %v4640_v8  ;;  %v2726_v9 = vunpack.i.h.bf16 %v4660_v33  ;;  %v2725_v13 = vunpack.i.l.bf16 %v4660_v33  ;;  %v2731_v58 = vunpack.i.h.bf16 %v4673_v38 }
 0x2f8   :  { %v2919_v27 = vpop.permute.xlu0 %2918  ;;  %2352 = vmatmul.msk.bf16.vlgmr.msra.gmra.mxu1 %vm2012_vm8, %v1977_v5  ;;  %v2730_v14 = vunpack.i.l.bf16 %v4673_v38  ;;  %v2751_v46 = vunpack.i.h.bf16 %v4735_v4  ;;  %v2750_v48 = vunpack.i.l.bf16 %v4735_v4  ;;  %v2876_v34 = vunpack.i.h.bf16 %v4679_v3 }
 0x2f9   :  { %v2921_v36 = vunpack.i.h.bf16 %v2919_v27  ;;  %v2920_v55 = vunpack.i.l.bf16 %v2919_v27  ;;  %v2875_v53 = vunpack.i.l.bf16 %v4679_v3  ;;  %v2736_v56 = vunpack.i.h.bf16 %v4684_v29  ;;  %v4834_v35 = vpop.permute.xlu2 %2943 }
 0x2fa   :  { %v2735_v41 = vunpack.i.l.bf16 %v4684_v29  ;;  %v2885_v57 = vunpack.i.l.bf16 %v4697_v61  ;;  %v2896_v38 = vunpack.i.h.bf16 %v4717_v59  ;;  %v2895_v10 = vunpack.i.l.bf16 %v4717_v59 }
 0x2fb   :  { %v1920_v11 = vsel %vm1909_vm2, %v1903_v52, %v2920_v55  ;;  %v1921_v1 = vsel %vm1909_vm2, %v1904_v19, %v2921_v36  ;;  %v4796_v2 = vpop.permute.xlu1 %2788  ;;  %v2881_v4 = vunpack.i.h.bf16 %v4731_v28  ;;  %v2880_v5 = vunpack.i.l.bf16 %v4731_v28 }
 0x2fc   :  { %v4799_v39 = vsel %vm1926_vm3, %v1920_v11, %v2745_v43  ;;  %v4802_v37 = vsel %vm1926_vm3, %v1921_v1, %v2746_v32  ;;  %v2906_v0 = vunpack.i.h.bf16 %v4733_v16  ;;  %v2905_v29 = vunpack.i.l.bf16 %v4733_v16 }
 0x2fd   :  { %v1882_v47 = vsel %vm878_vm9, %v4622_v15, %v2751_v46  ;;  %v1881_v27 = vsel %vm878_vm9, %v4625_v22, %v2750_v48  ;;  %v2936_v36 = vunpack.i.h.bf16 %v4781_v7  ;;  %v2935_v55 = vunpack.i.l.bf16 %v4781_v7 }
 0x2fe   :  { %v2756_v19 = vunpack.i.h.bf16 %v4739_v18  ;;  %v2755_v16 = vunpack.i.l.bf16 %v4739_v18  ;;  %v2901_v15 = vunpack.i.h.bf16 %v4741_v17  ;;  %v2900_v52 = vunpack.i.l.bf16 %v4741_v17 }
 0x2ff   :  { %v2926_v22 = vunpack.i.h.bf16 %v4747_v31  ;;  %v2925_v11 = vunpack.i.l.bf16 %v4747_v31  ;;  %v2911_v7 = vunpack.i.h.bf16 %v4761_v20  ;;  %v2910_v48 = vunpack.i.l.bf16 %v4761_v20 }
 0x300   :  { %v4828_v60 = vpop.permute.xlu0 %2928  ;;  %v1898_v51 = vsel %vm912_vm11, %v1882_v47, %v2936_v36  ;;  %v1897_v17 = vsel %vm912_vm11, %v1881_v27, %v2935_v55  ;;  %v2946_v20 = vunpack.i.h.bf16 %v4834_v35  ;;  %v5265_v28 = vunpack.i.h.bf16 %v4697_v61 }
 0x301   :  { %v2931_v27 = vunpack.i.h.bf16 %v4828_v60  ;;  %v5266_v33 = vunpack.i.l.bf16 %v4737_v26 }
 0x303   :  { %v2804_v49 = vpop.permute.xlu1 %2803 }
 0x304   :  { %v2806_v32 = vunpack.i.h.bf16 %v2804_v49  ;;  %v2805_v43 = vunpack.i.l.bf16 %v2804_v49 }
 0x306   :  { %v1864_v1 = vsel %vm844_vm7, %v1848_v44, %v2806_v32  ;;  %v1863_v46 = vsel %vm844_vm7, %v1847_v50, %v2805_v43 }
 0x307   :  { %v1880_v49 = vsel %vm878_vm9, %v1864_v1, %v2731_v58  ;;  %v1879_v18 = vsel %vm878_vm9, %v1863_v46, %v2730_v14  ;;  %v2930_v58 = vunpack.i.l.bf16 %v4828_v60  ;;  %v1955_v46 = vsel %vm1943_vm5, %v4802_v37, %v2926_v22 }
 0x308   :  { %v1896_v59 = vsel %vm912_vm11, %v1880_v49, %v2896_v38  ;;  %v1895_v31 = vsel %vm912_vm11, %v1879_v18, %v2895_v10  ;;  %v2939_v45 = vpop.permute.xlu0 %2938  ;;  %v4871_v38 = vpop.permute.xlu2 %2953  ;;  %v4899_v22 = vsel %vm1960_vm6, %v1955_v46, %v2931_v27 }
 0x309   :  { %v2941_v44 = vunpack.i.h.bf16 %v2939_v45  ;;  %v2940_v32 = vunpack.i.l.bf16 %v2939_v45  ;;  %v1912_v50 = vsel %vm1909_vm2, %v1895_v31, %v2900_v52  ;;  %v1913_v43 = vsel %vm1909_vm2, %v1896_v59, %v2901_v15 }
 0x30a   :  { %v1929_v14 = vsel %vm1926_vm3, %v1912_v50, %v2735_v41  ;;  %v1930_v47 = vsel %vm1926_vm3, %v1913_v43, %v2736_v56  ;;  %v1954_v41 = vsel %vm1943_vm5, %v4799_v39, %v2925_v11  ;;  %v5267_v31 = vunpack.i.h.bf16 %v4737_v26 }
 0x30b   :  { %v1914_v10 = vsel %vm1909_vm2, %v1897_v17, %v2940_v32  ;;  %v2819_v36 = vpop.permute.xlu1 %2818  ;;  %v1946_v45 = vsel %vm1943_vm5, %v1929_v14, %v2905_v29  ;;  %v1947_v55 = vsel %vm1943_vm5, %v1930_v47, %v2906_v0  ;;  %v1915_v59 = vsel %vm1909_vm2, %v1898_v51, %v2941_v44 }
 0x30c   :  { %v2821_v15 = vunpack.i.h.bf16 %v2819_v36  ;;  %v2820_v52 = vunpack.i.l.bf16 %v2819_v36  ;;  %v1931_v56 = vsel %vm1926_vm3, %v1914_v10, %v2755_v16  ;;  %v1963_v60 = vsel %vm1960_vm6, %v1946_v45, %v2910_v48 }
 0x30d   :  { %v1964_v1 = vsel %vm1960_vm6, %v1947_v55, %v2911_v7  ;;  %v4889_v49 = vsel %vm1960_vm6, %v1954_v41, %v2930_v58  ;;  %v1932_v39 = vsel %vm1926_vm3, %v1915_v59, %v2756_v19  ;;  %v2790_v58 = vunpack.i.l.bf16 %v4796_v2 }
 0x30e   :  { %v1870_v29 = vsel %vm844_vm7, %v4810_v62, %v2821_v15  ;;  %v1869_v0 = vsel %vm844_vm7, %v4814_v25, %v2820_v52  ;;  %v1978_v51 = vpack.c.bf16 %v1964_v1, %v1963_v60  ;;  %v2945_v62 = vunpack.i.l.bf16 %v4834_v35 }
 0x30f   :  { %v1886_v16 = vsel %vm878_vm9, %v1870_v29, %v2721_v63  ;;  %v1885_v37 = vsel %vm878_vm9, %v1869_v0, %v2720_v12  ;;  %v1982_v8 = vpack.c.bf16 %v4899_v22, %v4889_v49  ;;  %v1949_v48 = vsel %vm1943_vm5, %v1932_v39, %v2946_v20 }
 0x310   :  { %v1902_v25 = vsel %vm912_vm11, %v1886_v16, %v2876_v34  ;;  %v1901_v19 = vsel %vm912_vm11, %v1885_v37, %v2875_v53  ;;  %v2949_v11 = vpop.permute.xlu0 %2948  ;;  %2353 = vmatmul.msk.bf16.gmra.mxu1 %vm2012_vm8, %v1978_v51  ;;  %v1948_v7 = vsel %vm1943_vm5, %v1931_v56, %v2945_v62  ;;  %v4939_v32 = vpop.permute.xlu2 %2963  ;;  %v2791_v20 = vunpack.i.h.bf16 %v4796_v2 }
 0x311   :  { %v2951_v63 = vunpack.i.h.bf16 %v2949_v11  ;;  %v2950_v12 = vunpack.i.l.bf16 %v2949_v11  ;;  %v1918_v35 = vsel %vm1909_vm2, %v1901_v19, %v2880_v5  ;;  %v1919_v34 = vsel %vm1909_vm2, %v1902_v25, %v2881_v4 }
 0x312   :  { %v1935_v3 = vsel %vm1926_vm3, %v1918_v35, %v2725_v13  ;;  %v1936_v53 = vsel %vm1926_vm3, %v1919_v34, %v2726_v9  ;;  %v2776_v14 = vunpack.i.h.bf16 %v4771_v24  ;;  %v2775_v47 = vunpack.i.l.bf16 %v4771_v24 }
 0x313   :  { %v2824_v18 = vpop.permute.xlu1 %2823  ;;  %v1952_v5 = vsel %vm1943_vm5, %v1935_v3, %v2885_v57  ;;  %v1953_v4 = vsel %vm1943_vm5, %v1936_v53, %v5265_v28  ;;  %v1965_v17 = vsel %vm1960_vm6, %v1948_v7, %v2950_v12  ;;  %v1966_v13 = vsel %vm1960_vm6, %v1949_v48, %v2951_v63 }
 0x314   :  { %v1969_v9 = vsel %vm1960_vm6, %v1952_v5, %v5266_v33  ;;  %v1970_v44 = vsel %vm1960_vm6, %v1953_v4, %v5267_v31  ;;  %v1979_v57 = vpack.c.bf16 %v1966_v13, %v1965_v17  ;;  %v1858_v10 = vsel %vm810_vm4, %v4399_v54, %v2791_v20 }
 0x315   :  { %v1981_v50 = vpack.c.bf16 %v1970_v44, %v1969_v9  ;;  %v1857_v36 = vsel %vm810_vm4, %v4395_v40, %v2790_v58  ;;  %v2826_v45 = vunpack.i.h.bf16 %v2824_v18  ;;  %v2825_v55 = vunpack.i.l.bf16 %v2824_v18 }
 0x316   :  { %v2851_v59 = vunpack.i.h.bf16 %v4677_v6  ;;  %v2850_v2 = vunpack.i.l.bf16 %v4677_v6  ;;  %v1852_v24 = vsel %vm810_vm4, %v4416_v30, %v2776_v14  ;;  %v1851_v15 = vsel %vm810_vm4, %v4391_v23, %v2775_v47 }
 0x317   :  { %2356 = vmatmul.msk.bf16.vlgmr.msra.gmra.mxu2 %vm2012_vm8, %v1981_v50  ;;  %v2816_v52 = vunpack.i.h.bf16 %v4666_v21  ;;  %v2815_v41 = vunpack.i.l.bf16 %v4666_v21  ;;  %v2956_v23 = vunpack.i.h.bf16 %v4871_v38  ;;  %v2955_v0 = vunpack.i.l.bf16 %v4871_v38 }
 0x318   :  { %v2959_v61 = vpop.permute.xlu0 %2958  ;;  %v2974_v27 = vpop.permute.xlu2 %2973  ;;  %v1873_v56 = vsel %vm844_vm7, %v1857_v36, %v2850_v2  ;;  %v1874_v40 = vsel %vm844_vm7, %v1858_v10, %v2851_v59  ;;  %v2966_v3 = vunpack.i.h.bf16 %v4939_v32  ;;  %v2965_v53 = vunpack.i.l.bf16 %v4939_v32 }
 0x319   :  { %v1889_v46 = vsel %vm878_vm9, %v1873_v56, %v2825_v55  ;;  %v1890_v6 = vsel %vm878_vm9, %v1874_v40, %v2826_v45  ;;  %v1867_v30 = vsel %vm844_vm7, %v1851_v15, %v2815_v41  ;;  %v1868_v29 = vsel %vm844_vm7, %v1852_v24, %v2816_v52  ;;  %v3032_v40 = vld [vmem:[#allocation3 + $0x100] sm:$0xff] }
 0x31a   :  { %v2976_v21 = vunpack.i.h.bf16 %v2974_v27  ;;  %v2975_v51 = vunpack.i.l.bf16 %v2974_v27  ;;  %v2961_v49 = vunpack.i.h.bf16 %v2959_v61  ;;  %v2960_v39 = vunpack.i.l.bf16 %v2959_v61 }
 0x31b   :  { %v2829_v43 = vpop.permute.xlu1 %2828  ;;  %v1905_v22 = vsel %vm912_vm11, %v1889_v46, %v2955_v0  ;;  %v1906_v62 = vsel %vm912_vm11, %v1890_v6, %v2956_v23  ;;  %v2795_v36 = vunpack.i.l.bf16 %v4604_v42 }
 0x31c   :  { %v2831_v25 = vunpack.i.h.bf16 %v2829_v43  ;;  %v2830_v19 = vunpack.i.l.bf16 %v2829_v43  ;;  %v1923_v7 = vsel %vm1909_vm2, %v1906_v62, %v2961_v49 }
 0x31e   :  { %v1940_v5 = vsel %vm1926_vm3, %v1923_v7, %v2831_v25 }
 0x31f   :  { %v1957_v61 = vsel %vm1943_vm5, %v1940_v5, %v2966_v3 }
 0x320   :  { %v4946_v26 = vpop.permute.xlu0 %2968  ;;  %2354 = vmatmul.msk.bf16.gmra.mxu1 %vm2012_vm8, %v1979_v57  ;;  %v2984_v63 = vpop.permute.xlu2 %2983 }
 0x321   :  { %v2986_v17 = vunpack.i.h.bf16 %v2984_v63  ;;  %v2985_v13 = vunpack.i.l.bf16 %v2984_v63  ;;  %v2971_v31 = vunpack.i.h.bf16 %v4946_v26  ;;  %v2970_v44 = vunpack.i.l.bf16 %v4946_v26 }
 0x322   :  { %v2796_v26 = vunpack.i.h.bf16 %v4604_v42 }
 0x323   :  { %v2834_v54 = vpop.permute.xlu1 %2833  ;;  %v1974_v10 = vsel %vm1960_vm6, %v1957_v61, %v2971_v31 }
 0x324   :  { %v2836_v60 = vunpack.i.h.bf16 %v2834_v54  ;;  %v2835_v1 = vunpack.i.l.bf16 %v2834_v54  ;;  %v3031_v54 = vld [vmem:[#allocation3 + $0x110] sm:$0xff] }
 0x325   :  { %v1860_v56 = vsel %vm810_vm4, %v3031_v54, %v2796_v26 }
 0x326   :  { %v1883_v16 = vsel %vm878_vm9, %v1867_v30, %v2835_v1  ;;  %v1884_v37 = vsel %vm878_vm9, %v1868_v29, %v2836_v60  ;;  %v1859_v60 = vsel %vm810_vm4, %v3032_v40, %v2795_v36 }
 0x327   :  { %2357 = vmatmul.msk.bf16.gmra.mxu2 %vm2012_vm8, %v1982_v8  ;;  %v1899_v35 = vsel %vm912_vm11, %v1883_v16, %v2975_v51  ;;  %v1900_v34 = vsel %vm912_vm11, %v1884_v37, %v2976_v21  ;;  %v1922_v8 = vsel %vm1909_vm2, %v1905_v22, %v2960_v39 }
 0x328   :  { %v2979_v11 = vpop.permute.xlu0 %2978  ;;  %v1939_v18 = vsel %vm1926_vm3, %v1922_v8, %v2830_v19  ;;  %v2989_v45 = vpop.permute.xlu2 %2988 }
 0x329   :  { %v2981_v12 = vunpack.i.h.bf16 %v2979_v11  ;;  %v2980_v38 = vunpack.i.l.bf16 %v2979_v11  ;;  %v1956_v57 = vsel %vm1943_vm5, %v1939_v18, %v2965_v53  ;;  %v2991_v6 = vunpack.i.h.bf16 %v2989_v45 }
 0x32a   :  { %v1973_v27 = vsel %vm1960_vm6, %v1956_v57, %v2970_v44  ;;  %v2990_v30 = vunpack.i.l.bf16 %v2989_v45 }
 0x32b   :  { %v2839_v48 = vpop.permute.xlu1 %2838  ;;  %v1916_v33 = vsel %vm1909_vm2, %v1899_v35, %v2980_v38  ;;  %v1917_v9 = vsel %vm1909_vm2, %v1900_v34, %v2981_v12  ;;  %v1983_v41 = vpack.c.bf16 %v1974_v10, %v1973_v27 }
 0x32c   :  { %v2841_v28 = vunpack.i.h.bf16 %v2839_v48  ;;  %v2840_v4 = vunpack.i.l.bf16 %v2839_v48 }
 0x32e   :  { %v1933_v32 = vsel %vm1926_vm3, %v1916_v33, %v2840_v4  ;;  %v1934_v50 = vsel %vm1926_vm3, %v1917_v9, %v2841_v28 }
 0x32f   :  { %v1950_v20 = vsel %vm1943_vm5, %v1933_v32, %v2985_v13  ;;  %v1951_v58 = vsel %vm1943_vm5, %v1934_v50, %v2986_v17 }
 0x330   :  { %v2994_v43 = vpop.permute.xlu0 %2993  ;;  %v3014_v16 = vpop.permute.xlu2 %3013 }
 0x331   :  { %v2996_v14 = vunpack.i.h.bf16 %v2994_v43  ;;  %v2995_v47 = vunpack.i.l.bf16 %v2994_v43  ;;  %v3016_v19 = vunpack.i.h.bf16 %v3014_v16  ;;  %v3015_v11 = vunpack.i.l.bf16 %v3014_v16 }
 0x333   :  { %v2999_v55 = vpop.permute.xlu1 %2998  ;;  %v1967_v59 = vsel %vm1960_vm6, %v1950_v20, %v2995_v47  ;;  %v1968_v2 = vsel %vm1960_vm6, %v1951_v58, %v2996_v14 }
 0x334   :  { %v3001_v24 = vunpack.i.h.bf16 %v2999_v55  ;;  %v3000_v15 = vunpack.i.l.bf16 %v2999_v55  ;;  %v1980_v52 = vpack.c.bf16 %v1968_v2, %v1967_v59 }
 0x336   :  { %2355 = vmatmul.msk.bf16.gmra.mxu1 %vm2012_vm8, %v1980_v52  ;;  %v1876_v42 = vsel %vm844_vm7, %v1860_v56, %v3001_v24  ;;  %v1875_v1 = vsel %vm844_vm7, %v1859_v60, %v3000_v15 }
 0x337   :  { %2358 = vmatmul.msk.bf16.gmra.mxu2 %vm2012_vm8, %v1983_v41  ;;  %v1891_v0 = vsel %vm878_vm9, %v1875_v1, %v2990_v30  ;;  %v1892_v21 = vsel %vm878_vm9, %v1876_v42, %v2991_v6 }
 0x338   :  { %v3004_v46 = vpop.permute.xlu0 %3003 }
 0x339   :  { %v3006_v29 = vunpack.i.h.bf16 %v3004_v46  ;;  %v3005_v23 = vunpack.i.l.bf16 %v3004_v46 }
 0x33b   :  { %v3009_v51 = vpop.permute.xlu1 %3008  ;;  %v1907_v37 = vsel %vm912_vm11, %v1891_v0, %v3005_v23  ;;  %v1908_v22 = vsel %vm912_vm11, %v1892_v21, %v3006_v29 }
 0x33c   :  { %v3011_v49 = vunpack.i.h.bf16 %v3009_v51  ;;  %v3010_v39 = vunpack.i.l.bf16 %v3009_v51 }
 0x33e   :  { %v1924_v62 = vsel %vm1909_vm2, %v1907_v37, %v3010_v39  ;;  %v1925_v25 = vsel %vm1909_vm2, %v1908_v22, %v3011_v49 }
 0x33f   :  { %v1941_v35 = vsel %vm1926_vm3, %v1924_v62, %v3015_v11  ;;  %v1942_v34 = vsel %vm1926_vm3, %v1925_v25, %v3016_v19 }
 0x340   :  { %v3019_v63 = vpop.permute.xlu0 %3018 }
 0x341   :  { %v3021_v12 = vunpack.i.h.bf16 %v3019_v63  ;;  %v3020_v38 = vunpack.i.l.bf16 %v3019_v63 }
 0x343   :  { %v3024_v3 = vpop.permute.xlu1 %3023  ;;  %v1958_v7 = vsel %vm1943_vm5, %v1941_v35, %v3020_v38  ;;  %v1959_v48 = vsel %vm1943_vm5, %v1942_v34, %v3021_v12 }
 0x344   :  { %v3026_v53 = vunpack.i.h.bf16 %v3024_v3  ;;  %v3025_v8 = vunpack.i.l.bf16 %v3024_v3 }
 0x346   :  { %v1975_v18 = vsel %vm1960_vm6, %v1958_v7, %v3025_v8  ;;  %v1976_v5 = vsel %vm1960_vm6, %v1959_v48, %v3026_v53 }
 0x347   :  { %v1984_v28 = vpack.c.bf16 %v1976_v5, %v1975_v18 }
 0x349   :  { %2359 = vmatmul.msk.bf16.gmra.mxu2 %vm2012_vm8, %v1984_v28 }
 0x375   :  { %v5017_v4 = vpop.f32.mrf.mxu1 }
 0x376   :  { %v2128_v61 = vmul.f32 %v5017_v4, %v5017_v4  ;;  %v2090_v58 = vsel %vm810_vm4, %v5017_v4, 0.0 }
 0x378   :  { %v2144_v26 = vsel %vm810_vm4, %v2128_v61, 0.0 }
 0x37d   :  { %v5019_v17 = vpop.f32.mrf.mxu1 }
 0x37e   :  { %v2129_v57 = vmul.f32 %v5019_v17, %v5019_v17  ;;  %v2091_v43 = vsel %vm810_vm4, %v5019_v17, 0.0 }
 0x37f   :  { %v2092_v10 = vadd.f32 %v2091_v43, %v2090_v58 }
 0x380   :  { %v2145_v14 = vsel %vm810_vm4, %v2129_v57, 0.0 }
 0x381   :  { %v2146_v2 = vadd.f32 %v2145_v14, %v2144_v26 }
 0x38d   :  { %v5021_v13 = vpop.f32.mrf.mxu1 }
 0x38e   :  { %v2130_v20 = vmul.f32 %v5021_v13, %v5021_v13  ;;  %v2093_v47 = vsel %vm810_vm4, %v5021_v13, 0.0 }
 0x38f   :  { %v2094_v24 = vadd.f32 %v2093_v47, %v2092_v10 }
 0x390   :  { %v2147_v36 = vsel %vm810_vm4, %v2130_v20, 0.0 }
 0x391   :  { %v2148_v56 = vadd.f32 %v2147_v36, %v2146_v2 }
 0x395   :  { %v5023_v33 = vpop.f32.mrf.mxu1 }
 0x396   :  { %v2131_v27 = vmul.f32 %v5023_v33, %v5023_v33  ;;  %v2095_v45 = vsel %vm810_vm4, %v5023_v33, 0.0 }
 0x397   :  { %v2096_v40 = vadd.f32 %v2095_v45, %v2094_v24 }
 0x398   :  { %v2149_v52 = vsel %vm810_vm4, %v2131_v27, 0.0 }
 0x399   :  { %v2150_v46 = vadd.f32 %v2149_v52, %v2148_v56 }
 0x39a   :  { %v5025_v9 = vpop.f32.mrf.mxu2 }
 0x39b   :  { %v2136_v37 = vmul.f32 %v5025_v9, %v5025_v9  ;;  %v2105_v11 = vsel %vm810_vm4, %v5025_v9, 0.0 }
 0x39d   :  { %v5027_v31 = vpop.f32.mrf.mxu1  ;;  %v2159_v34 = vsel %vm810_vm4, %v2136_v37, 0.0 }
 0x39e   :  { %v2132_v55 = vmul.f32 %v5027_v31, %v5027_v31  ;;  %v2097_v41 = vsel %vm810_vm4, %v5027_v31, 0.0 }
 0x39f   :  { %v2098_v6 = vadd.f32 %v2097_v41, %v2096_v40 }
 0x3a0   :  { %v2151_v60 = vsel %vm810_vm4, %v2132_v55, 0.0 }
 0x3a1   :  { %v2152_v23 = vadd.f32 %v2151_v60, %v2150_v46 }
 0x3a2   :  { %v5029_v44 = vpop.f32.mrf.mxu2 }
 0x3a3   :  { %v2137_v12 = vmul.f32 %v5029_v44, %v5029_v44  ;;  %v2107_v3 = vsel %vm810_vm4, %v5029_v44, 0.0 }
 0x3a5   :  { %v5033_v50 = vpop.f32.mrf.mxu1  ;;  %v2161_v7 = vsel %vm810_vm4, %v2137_v12, 0.0 }
 0x3a6   :  { %v2133_v54 = vmul.f32 %v5033_v50, %v5033_v50  ;;  %v2099_v42 = vsel %vm810_vm4, %v5033_v50, 0.0 }
 0x3a7   :  { %v2100_v0 = vadd.f32 %v2099_v42, %v2098_v6 }
 0x3a8   :  { %v2153_v30 = vsel %vm810_vm4, %v2133_v54, 0.0 }
 0x3a9   :  { %v2154_v49 = vadd.f32 %v2153_v30, %v2152_v23 }
 0x3aa   :  { %v5031_v32 = vpop.f32.mrf.mxu2 }
 0x3ab   :  { %v2138_v48 = vmul.f32 %v5031_v32, %v5031_v32  ;;  %v2109_v28 = vsel %vm810_vm4, %v5031_v32, 0.0 }
 0x3ad   :  { %v2163_v61 = vsel %vm810_vm4, %v2138_v48, 0.0 }
 0x3b2   :  { %v5056_v59 = vpop.f32.mrf.mxu2 }
 0x3b3   :  { %v5058_v15 = vpop.f32.mrf.mxu1  ;;  %v2139_v43 = vmul.f32 %v5056_v59, %v5056_v59  ;;  %v2111_v58 = vsel %vm810_vm4, %v5056_v59, 0.0 }
 0x3b4   :  { %v2134_v1 = vmul.f32 %v5058_v15, %v5058_v15  ;;  %v2101_v29 = vsel %vm810_vm4, %v5058_v15, 0.0 }
 0x3b5   :  { %v2102_v39 = vadd.f32 %v2101_v29, %v2100_v0  ;;  %v2165_v47 = vsel %vm810_vm4, %v2139_v43, 0.0  ;;  %v1299_v43 = vld [vmem:[%s5220_s5] sm:$0x1] }
 0x3b6   :  { %v2155_v21 = vsel %vm810_vm4, %v2134_v1, 0.0 }
 0x3b7   :  { %v2156_v25 = vadd.f32 %v2155_v21, %v2154_v49 }
 0x3ba   :  { %v5074_v51 = vpop.f32.mrf.mxu2 }
 0x3bb   :  { %v5076_v16 = vpop.f32.mrf.mxu1  ;;  %v2140_v27 = vmul.f32 %v5074_v51, %v5074_v51  ;;  %v2113_v36 = vsel %vm810_vm4, %v5074_v51, 0.0 }
 0x3bc   :  { %v2103_v22 = vsel %vm810_vm4, %v5076_v16, 0.0  ;;  %v2135_v62 = vmul.f32 %v5076_v16, %v5076_v16 }
 0x3bd   :  { %v2104_v19 = vadd.f32 %v2103_v22, %v2102_v39  ;;  %v2167_v55 = vsel %vm810_vm4, %v2140_v27, 0.0 }
 0x3be   :  { %v2157_v63 = vsel %vm810_vm4, %v2135_v62, 0.0 }
 0x3bf   :  { %v2106_v38 = vadd.f32 %v2105_v11, %v2104_v19  ;;  %v2158_v35 = vadd.f32 %v2157_v63, %v2156_v25 }
 0x3c1   :  { %v2160_v53 = vadd.f32 %v2159_v34, %v2158_v35  ;;  %v2108_v8 = vadd.f32 %v2107_v3, %v2106_v38 }
 0x3c2   :  { %v5095_v5 = vpop.f32.mrf.mxu2 }
 0x3c3   :  { %v2162_v18 = vadd.f32 %v2161_v7, %v2160_v53  ;;  %v2110_v57 = vadd.f32 %v2109_v28, %v2108_v8  ;;  %v2141_v2 = vmul.f32 %v5095_v5, %v5095_v5  ;;  %v2115_v41 = vsel %vm810_vm4, %v5095_v5, 0.0 }
 0x3c5   :  { %v2164_v20 = vadd.f32 %v2163_v61, %v2162_v18  ;;  %v2112_v14 = vadd.f32 %v2111_v58, %v2110_v57  ;;  %v2169_v40 = vsel %vm810_vm4, %v2141_v2, 0.0 }
 0x3c7   :  { %v2166_v10 = vadd.f32 %v2165_v47, %v2164_v20  ;;  %v2114_v45 = vadd.f32 %v2113_v36, %v2112_v14  ;;  %v1300_v47 = vld [vmem:[%s5221_s6] sm:$0x1] }
 0x3c9   :  { %v2168_v52 = vadd.f32 %v2167_v55, %v2166_v10  ;;  %v2116_v56 = vadd.f32 %v2115_v41, %v2114_v45 }
 0x3cb   :  { %v2170_v42 = vadd.f32 %v2169_v40, %v2168_v52 }
 0x3cc   :  { %v5107_v26 = vpop.f32.mrf.mxu2 }
 0x3cd   :  { %v2142_v24 = vmul.f32 %v5107_v26, %v5107_v26  ;;  %v2117_v54 = vsel %vm810_vm4, %v5107_v26, 0.0 }
 0x3ce   :  { %v2118_v1 = vadd.f32 %v2117_v54, %v2116_v56 }
 0x3cf   :  { %v2171_v60 = vsel %vm810_vm4, %v2142_v24, 0.0 }
 0x3d0   :  { %v2172_v29 = vadd.f32 %v2171_v60, %v2170_v42 }
 0x3d4   :  { %v5122_v46 = vpop.f32.mrf.mxu2 }
 0x3d5   :  { %v2119_v6 = vsel %vm810_vm4, %v5122_v46, 0.0  ;;  %v2143_v30 = vmul.f32 %v5122_v46, %v5122_v46 }
 0x3d6   :  { %v2120_v23 = vadd.f32 %v2119_v6, %v2118_v1 }
 0x3d7   :  { %v2173_v0 = vsel %vm810_vm4, %v2143_v30, 0.0 }
 0x3d8   :  { %v2121_v21 = vrot.slane %v2120_v23, 4  ;;  %v2174_v49 = vadd.f32 %v2173_v0, %v2172_v29 }
 0x3da   :  { %v2122_v39 = vadd.f32 %v2121_v21, %v2120_v23  ;;  %v2175_v37 = vrot.slane %v2174_v49, 4 }
 0x3dc   :  { %v2123_v22 = vrot.slane %v2122_v39, 2  ;;  %v2176_v62 = vadd.f32 %v2175_v37, %v2174_v49 }
 0x3de   :  { %v2124_v25 = vadd.f32 %v2123_v22, %v2122_v39  ;;  %v2177_v19 = vrot.slane %v2176_v62, 2 }
 0x3e0   :  { %v2125_v11 = vrot.slane %v2124_v25, 1  ;;  %v2178_v63 = vadd.f32 %v2177_v19, %v2176_v62 }
 0x3e2   :  { %v2126_v12 = vadd.f32 %v2125_v11, %v2124_v25  ;;  %v2179_v38 = vrot.slane %v2178_v63, 1 }
 0x3e4   :  { %v2127_v35 = vmul.f32 0.0078125, %v2126_v12  ;;  %v2180_v34 = vadd.f32 %v2179_v38, %v2178_v63 }
 0x3e6   :  { %v2181_v3 = vmul.f32 0.0078125, %v2180_v34  ;;  %v2182_v53 = vmul.f32 %v2127_v35, %v2127_v35 }
 0x3e8   :  { %v2183_v8 = vsub.f32 %v2181_v3, %v2182_v53 }
 0x3ea   :  { %v2184_v7 = vadd.f32 1e-05, %v2183_v8 }
 0x3ec   :  { %3029 = vrsqrt.f32 %v2184_v7  ;;  %vm2191_vm9 = vweird.f32 %v2184_v7 }
 0x3f2   :  { %v3030_v48 = vpop.eup %3029 }
 0x3f3   :  { %v2186_v18 = vmul.f32 %v3030_v48, %v2184_v7  ;;  %vm2192_vm7 = vweird.f32 %v3030_v48 }
 0x3f4   :  { %vm2193_vm10 = vmor %vm2191_vm9, %vm2192_vm7 }
 0x3f5   :  { %v2187_v28 = vmul.f32 %v3030_v48, %v2186_v18 }
 0x3f7   :  { %v2188_v57 = vmul.f32 0.5, %v2187_v28 }
 0x3f9   :  { %v2189_v61 = vsub.f32 1.5, %v2188_v57 }
 0x3fb   :  { %v2190_v20 = vmul.f32 %v3030_v48, %v2189_v61 }
 0x3fd   :  { %v2194_v58 = vsel %vm2193_vm10, %v3030_v48, %v2190_v20 }
 0x3fe   :  { %v2195_v14 = vmul.f32 %v2194_v58, %v1299_v43 }
 0x400   :  { %v2196_v27 = vmul.f32 %v2195_v14, %v2127_v35  ;;  %v2199_v36 = vperm.slane %v2195_v14, 0 }
 0x402   :  { %v2197_v10 = vsub.f32 %v1300_v47, %v2196_v27  ;;  %v2201_v45 = vmul.f32 %v2199_v36, %v5017_v4  ;;  %v2202_v55 = vmul.f32 %v2199_v36, %v5019_v17  ;;  %v2203_v2 = vmul.f32 %v2199_v36, %v5021_v13 }
 0x403   :  { %v2204_v52 = vmul.f32 %v2199_v36, %v5023_v33  ;;  %v2205_v41 = vmul.f32 %v2199_v36, %v5027_v31  ;;  %v2206_v60 = vmul.f32 %v2199_v36, %v5033_v50  ;;  %v2207_v1 = vmul.f32 %v2199_v36, %v5058_v15 }
 0x404   :  { %v2218_v24 = vperm.slane %v2197_v10, 0  ;;  %v2208_v4 = vmul.f32 %v2199_v36, %v5076_v16  ;;  %v2209_v17 = vmul.f32 %v2199_v36, %v5025_v9  ;;  %v2210_v31 = vmul.f32 %v2199_v36, %v5029_v44 }
 0x405   :  { %v2211_v49 = vmul.f32 %v2199_v36, %v5031_v32  ;;  %v2212_v9 = vmul.f32 %v2199_v36, %v5056_v59  ;;  %v2213_v44 = vmul.f32 %v2199_v36, %v5074_v51  ;;  %v2214_v22 = vmul.f32 %v2199_v36, %v5095_v5 }
 0x406   :  { %v2220_v54 = vadd.f32 %v2218_v24, %v2201_v45  ;;  %v2221_v56 = vadd.f32 %v2218_v24, %v2202_v55  ;;  %v2222_v40 = vadd.f32 %v2218_v24, %v2203_v2  ;;  %v2223_v42 = vadd.f32 %v2218_v24, %v2204_v52 }
 0x407   :  { %v2224_v6 = vadd.f32 %v2218_v24, %v2205_v41  ;;  %v2225_v30 = vadd.f32 %v2218_v24, %v2206_v60  ;;  %v2226_v13 = vadd.f32 %v2218_v24, %v2207_v1  ;;  %v2227_v0 = vadd.f32 %v2218_v24, %v2208_v4 }
 0x408   :  { %v2236_v29 = vmax.f32 %v2220_v54, 0.0  ;;  %v2237_v23 = vmax.f32 %v2221_v56, 0.0  ;;  %v2238_v33 = vmax.f32 %v2222_v40, 0.0  ;;  %v2239_v21 = vmax.f32 %v2223_v42, 0.0 }
 0x409   :  { %v2228_v50 = vadd.f32 %v2218_v24, %v2209_v17  ;;  %v2240_v39 = vmax.f32 %v2224_v6, 0.0  ;;  %v2229_v15 = vadd.f32 %v2218_v24, %v2210_v31  ;;  %v2241_v16 = vmax.f32 %v2225_v30, 0.0 }
 0x40a   :  { %2252 = vst.msk [vmem:[%s5222_s7] sm:$0xff] %vm810_vm4, %v2236_v29  ;;  %v2230_v37 = vadd.f32 %v2218_v24, %v2211_v49  ;;  %v2242_v32 = vmax.f32 %v2226_v13, 0.0  ;;  %v2231_v62 = vadd.f32 %v2218_v24, %v2212_v9  ;;  %v2243_v59 = vmax.f32 %v2227_v0, 0.0 }
 0x40b   :  { %2253 = vst.msk [vmem:[%s5222_s7 + $0x8] sm:$0xff] %vm810_vm4, %v2237_v23  ;;  %v2215_v25 = vmul.f32 %v2199_v36, %v5107_v26  ;;  %v2232_v19 = vadd.f32 %v2218_v24, %v2213_v44  ;;  %v2244_v51 = vmax.f32 %v2228_v50, 0.0  ;;  %v2216_v11 = vmul.f32 %v2199_v36, %v5122_v46 }
 0x40c   :  { %2254 = vst.msk [vmem:[%s5222_s7 + $0x10] sm:$0xff] %vm810_vm4, %v2238_v33  ;;  %v2233_v63 = vadd.f32 %v2218_v24, %v2214_v22  ;;  %v2245_v5 = vmax.f32 %v2229_v15, 0.0  ;;  %v2246_v38 = vmax.f32 %v2230_v37, 0.0  ;;  %v2247_v35 = vmax.f32 %v2231_v62, 0.0 }
 0x40d   :  { %2255 = vst.msk [vmem:[%s5222_s7 + $0x18] sm:$0xff] %vm810_vm4, %v2239_v21  ;;  %v2234_v12 = vadd.f32 %v2218_v24, %v2215_v25  ;;  %v2235_v26 = vadd.f32 %v2218_v24, %v2216_v11  ;;  %v2248_v46 = vmax.f32 %v2232_v19, 0.0 }
 0x40e   :  { %2256 = vst.msk [vmem:[%s5222_s7 + $0x20] sm:$0xff] %vm810_vm4, %v2240_v39  ;;  %v2249_v34 = vmax.f32 %v2233_v63, 0.0 }
 0x40f   :  { %2257 = vst.msk [vmem:[%s5222_s7 + $0x28] sm:$0xff] %vm810_vm4, %v2241_v16  ;;  %v2250_v3 = vmax.f32 %v2234_v12, 0.0  ;;  %v2251_v53 = vmax.f32 %v2235_v26, 0.0 }
 0x410   :  { %2258 = vst.msk [vmem:[%s5222_s7 + $0x30] sm:$0xff] %vm810_vm4, %v2242_v32 }
 0x411   :  { %2259 = vst.msk [vmem:[%s5222_s7 + $0x38] sm:$0xff] %vm810_vm4, %v2243_v59 }
 0x412   :  { %2260 = vst.msk [vmem:[%s5222_s7 + $0x40] sm:$0xff] %vm810_vm4, %v2244_v51 }
 0x413   :  { %2261 = vst.msk [vmem:[%s5222_s7 + $0x48] sm:$0xff] %vm810_vm4, %v2245_v5 }
 0x414   :  { %2262 = vst.msk [vmem:[%s5222_s7 + $0x50] sm:$0xff] %vm810_vm4, %v2246_v38 }
 0x415   :  { %2263 = vst.msk [vmem:[%s5222_s7 + $0x58] sm:$0xff] %vm810_vm4, %v2247_v35 }
 0x416   :  { %2264 = vst.msk [vmem:[%s5222_s7 + $0x60] sm:$0xff] %vm810_vm4, %v2248_v46 }
 0x417   :  { %2265 = vst.msk [vmem:[%s5222_s7 + $0x68] sm:$0xff] %vm810_vm4, %v2249_v34 }
 0x418   :  { %2266 = vst.msk [vmem:[%s5222_s7 + $0x70] sm:$0xff] %vm810_vm4, %v2250_v3 }
 0x419   :  { %2267 = vst.msk [vmem:[%s5222_s7 + $0x78] sm:$0xff] %vm810_vm4, %v2251_v53 }

</bundles_post_ra>
